<compile_context>
chip_gen: v7x
topology: tpu7x:2x2x1
jax: 0.10.0
libtpu: 0.0.40
codegen_flags: <defaults>
</compile_context>

<pallas_src>
import jax
import jax.numpy as jnp
from jax import lax
from jax.experimental import pallas as pl
from jax.experimental.pallas import tpu as pltpu

# ----------------------------- model config --------------------------------
D_L_ORIG = 1          # one word-index column in the raw feature vector
D_A = 4               # audio features
D_V = 4               # video features
FEAT = D_L_ORIG + D_A + D_V      # 9 raw features per timestep
EMB = 16              # d_l_embedded (word embedding size)
VOCAB = 32

DH_L = DH_A = DH_V = 8           # MFN LSTMCell hidden sizes
MEM = 8                          # MFN memory size
WINDOW = 2
TOTAL_H = DH_L + DH_A + DH_V     # 24 (packed-state width)
ATT_IN = TOTAL_H * WINDOW        # 48
GAMMA_IN = ATT_IN + MEM          # 56
FINAL = TOTAL_H + MEM            # 32
H_ATT1 = H_ATT2 = H_G1 = H_G2 = H_OUT = 16

H_TEXT = H_AUDIO = H_VIDEO = 8   # unimodal context LSTM hidden sizes
NUM_CTX = 3                      # num_context_sequence == context_size

D_PACK = EMB + D_A + D_V         # 24 packed input features [emb | audio | video]

GATE_STRIDE = 128                # each gate group padded to a full vreg lane tile
GATE_COLS = 4 * GATE_STRIDE      # 512

TILE_B_CAP = 512                 # batch rows per grid step (tunable)

# wsmall slab layout: name -> (row offset, rows, cols). Every offset/extent is a
# multiple of 8 so in-kernel slices are sublane-tile aligned.
_WS = {
    "proj": (0, NUM_CTX * TOTAL_H, FINAL),        # (72, 32)
    "a1w1": (72, ATT_IN, H_ATT1),                 # (48, 16)
    "a1w2": (120, H_ATT1, ATT_IN),                # (16, 48)
    "a2w1": (136, ATT_IN, H_ATT2),                # (48, 16)
    "a2w2": (184, H_ATT2, MEM),                   # (16, 8)
    "gw1":  (200, GAMMA_IN, H_G1 + H_G2),         # (56, 32)
    "gw2":  (256, H_G1 + H_G2, 2 * MEM),          # (32, 16)
    "ow1":  (288, FINAL, H_OUT),                  # (32, 16)
    "ow2":  (320, H_OUT, 1),                      # (16, 1)
}
WS_ROWS = 336

# bias slab layout (f32, (BIAS_ROWS, 128)): rows 0-3 ctx LSTM gate biases
# [i, f, o, g] (lanes 0:24), rows 4-7 MFN LSTM gate biases, then one row per
# MLP bias.
_BR = {"proj_b": (8, FINAL), "a1b1": (9, H_ATT1), "a1b2": (10, ATT_IN),
       "a2b1": (11, H_ATT2), "a2b2": (12, MEM), "gb1": (13, H_G1 + H_G2),
       "gb2": (14, 2 * MEM), "ob1": (15, H_OUT), "ob2": (16, 1)}
BIAS_ROWS = 24


# ----------------------------- fused Pallas kernel --------------------------

def _contextual_mfn_kernel(ctx_ref, punch_ref, wlstm_ref, wsmall_ref, bias_ref,
                           out_ref):
    """One batch tile of the whole Contextual_MFN forward.

    ctx_ref:    (S, C, TILE_B, 24) bf16  context sequences, time-major.
    punch_ref:  (T, TILE_B, 24)    bf16  punchline (== x.permute(1, 0, 2)).
    wlstm_ref:  (96, 512)          bf16  [ctx_Wx; ctx_Wh; mfn_Wx; mfn_Wh],
                                         gate groups at lane offsets 0/128/256/384.
    wsmall_ref: (336, 128)         bf16  all other weight matrices (see _WS).
    bias_ref:   (24, 128)          f32   all biases (see _BR).
    out_ref:    (TILE_B, 1)        f32
    """
    S, C, TB, DP = ctx_ref.shape
    T = punch_ref.shape[0]
    H = TOTAL_H
    NC = C * TB
    f32 = jnp.float32
    bf16 = jnp.bfloat16

    # ---- unpack weights / biases (loaded once per tile) ----
    wl = wlstm_ref[...]
    ctx_wx = wl[0:DP, :]
    ctx_wh = wl[DP:DP + H, :]
    mfn_wx = wl[DP + H:2 * DP + H, :]
    mfn_wh = wl[2 * DP + H:2 * (DP + H), :]

    ws = wsmall_ref[...]

    def w_of(name):
        r, nr, nc = _WS[name]
        return ws[r:r + nr, 0:nc]

    proj_w = w_of("proj")
    a1w1, a1w2 = w_of("a1w1"), w_of("a1w2")
    a2w1, a2w2 = w_of("a2w1"), w_of("a2w2")
    gw1, gw2 = w_of("gw1"), w_of("gw2")
    ow1, ow2 = w_of("ow1"), w_of("ow2")

    bb = bias_ref[...]

    def b_of(name):
        r, n = _BR[name]
        return bb[r:r + 1, 0:n]          # (1, n): sublane-broadcast on use

    ctx_b4 = tuple(bb[g:g + 1, 0:H] for g in range(4))      # [i, f, o, g]
    mfn_b4 = tuple(bb[4 + g:5 + g, 0:H] for g in range(4))
    proj_b = b_of("proj_b")
    a1b1, a1b2 = b_of("a1b1"), b_of("a1b2")
    a2b1, a2b2 = b_of("a2b1"), b_of("a2b2")
    gb1, gb2 = b_of("gb1"), b_of("gb2")
    ob1, ob2 = b_of("ob1"), b_of("ob2")

    def packed_cell(x_bf, h, c, wx, wh, b4):
        # x_bf: (N, 24) bf16; h, c: (N, 24) f32 packed [l | a | v].
        gates = (jnp.dot(x_bf, wx, preferred_element_type=f32)
                 + jnp.dot(h.astype(bf16), wh, preferred_element_type=f32))
        # Gate groups live at lane offsets 0/128/256/384 -> every slice below is
        # vreg-aligned (no cross-lane rotates on the recurrence critical path).
        i = jax.nn.sigmoid(gates[:, 0 * GATE_STRIDE:0 * GATE_STRIDE + H] + b4[0])
        f = jax.nn.sigmoid(gates[:, 1 * GATE_STRIDE:1 * GATE_STRIDE + H] + b4[1])
        o = jax.nn.sigmoid(gates[:, 2 * GATE_STRIDE:2 * GATE_STRIDE + H] + b4[2])
        g = jnp.tanh(gates[:, 3 * GATE_STRIDE:3 * GATE_STRIDE + H] + b4[3])
        c_new = f * c + i * g
        h_new = o * jnp.tanh(c_new)
        return h_new, c_new

    # -------- Unimodal_Context: fused 3-modality context LSTM --------
    def ctx_step(t, carry):
        h, c = carry
        x_t = ctx_ref[t].reshape(NC, DP)      # leading-dim collapse, layout-free
        return packed_cell(x_t, h, c, ctx_wx, ctx_wh, ctx_b4)

    h_ctx, _ = lax.fori_loop(
        0, S, ctx_step,
        (jnp.zeros((NC, H), f32), jnp.zeros((NC, H), f32)),
        unroll=True)   # TODO(synk): cap unroll (2-4) if S grows large.

    # -------- Multimodal_Context: fused projections (per-context dot sum) ------
    acc = jnp.zeros((TB, FINAL), f32)
    for c in range(C):                         # static Python loop, 8-aligned slabs
        acc = acc + jnp.dot(h_ctx[c * TB:(c + 1) * TB, :].astype(bf16),
                            proj_w[c * H:(c + 1) * H, :],
                            preferred_element_type=f32)
    priors = acc + proj_b                      # (TB, 32)
    c0 = priors[:, 0:H]                        # packed [c_l | c_a | c_v] priors
    mem0 = priors[:, H:H + MEM]                # memory prior (Transformer stand-in)

    # -------- MFN recurrence over the punchline --------
    def mfn_step(t, carry):
        h, c, mem = carry
        h_new, c_new = packed_cell(punch_ref[t], h, c, mfn_wx, mfn_wh, mfn_b4)
        # packed c / c_new ARE torch.cat([c_l, c_a, c_v]) / the new one.
        cstar = jnp.concatenate([c, c_new], axis=1)                  # (TB, 48)
        att_h = jnp.maximum(
            jnp.dot(cstar.astype(bf16), a1w1, preferred_element_type=f32) + a1b1,
            0.0)
        logits = jnp.dot(att_h.astype(bf16), a1w2,
                         preferred_element_type=f32) + a1b2
        e = jnp.exp(logits - jnp.max(logits, axis=1, keepdims=True))
        attention = e * pl.reciprocal(jnp.sum(e, axis=1, keepdims=True),
                                      approx=True)
        attended = attention * cstar
        attended_b = attended.astype(bf16)
        c_hid = jnp.maximum(
            jnp.dot(attended_b, a2w1, preferred_element_type=f32) + a2b1, 0.0)
        chat = jnp.tanh(
            jnp.dot(c_hid.astype(bf16), a2w2, preferred_element_type=f32) + a2b2)
        # gamma MLPs: split the first layer over [attended | mem] row blocks so
        # the `both` concatenation disappears from the per-step path.
        g_hid = jnp.maximum(
            jnp.dot(attended_b, gw1[0:ATT_IN, :], preferred_element_type=f32)
            + jnp.dot(mem.astype(bf16), gw1[ATT_IN:GAMMA_IN, :],
                      preferred_element_type=f32) + gb1, 0.0)
        gammas = jax.nn.sigmoid(
            jnp.dot(g_hid.astype(bf16), gw2, preferred_element_type=f32) + gb2)
        mem_new = gammas[:, 0:MEM] * mem + gammas[:, MEM:2 * MEM] * chat
        return h_new, c_new, mem_new

    h_last, _, mem_last = lax.fori_loop(
        0, T, mfn_step,
        (jnp.zeros((TB, H), f32), c0, mem0),
        unroll=True)   # TODO(synk): cap unroll (2-4) if the punchline grows.

    # Output MLP: split ow1 rows over [h_last | mem_last] -> no lane concat.
    hidden = jnp.maximum(
        jnp.dot(h_last.astype(bf16), ow1[0:H, :], preferred_element_type=f32)
        + jnp.dot(mem_last.astype(bf16), ow1[H:FINAL, :],
                  preferred_element_type=f32) + ob1, 0.0)
    # TODO(synk): (TILE_B, 1) is a masked narrow store; the batch-on-lanes
    # transposed layout would make this lane-dense.
    out_ref[...] = (jnp.dot(hidden.astype(bf16), ow2,
                            preferred_element_type=f32) + ob2)


# ----------------------------- parameter init / packing ---------------------

def _dense_params(key, din, dout, scale=0.1):
    w = jax.random.normal(key, (din, dout), jnp.float32) * scale
    b = jnp.zeros((1, dout), jnp.float32)
    return (w, b)


def _lstm_params(key, din, h, scale=0.1):
    kx, kh = jax.random.split(key)
    wx = jax.random.normal(kx, (din, 4 * h), jnp.float32) * scale
    wh = jax.random.normal(kh, (h, 4 * h), jnp.float32) * scale
    # bias_ih + bias_hh folded together (both zero-initialized here).
    b = jnp.zeros((1, 4 * h), jnp.float32)
    return (wx, wh, b)


def _pack_lstm_lane_aligned(parts):
    """Pack per-modality LSTMs into block-diagonal gate matmuls with each gate
    group padded to a 128-lane vreg tile: columns [i(128)|f(128)|o(128)|g(128)].

    parts: [(wx (d_m,4h_m), wh (h_m,4h_m), b (1,4h_m)), ...] with PyTorch gate
    column order [i|f|g|o].
    """
    dins = [p[0].shape[0] for p in parts]
    hs = [p[1].shape[0] for p in parts]
    D, Ht = sum(dins), sum(hs)
    wx = jnp.zeros((D, GATE_COLS), jnp.float32)
    wh = jnp.zeros((Ht, GATE_COLS), jnp.float32)
    b = jnp.zeros((4, GATE_STRIDE), jnp.float32)
    gate_map = [(0, 0), (1, 1), (3, 2), (2, 3)]   # torch (i,f,g,o) src -> dst slot
    rd = rh = 0
    for (wx_m, wh_m, b_m), d_m, h_m in zip(parts, dins, hs):
        for src, dst in gate_map:
            cs = slice(src * h_m, (src + 1) * h_m)
            cd = slice(dst * GATE_STRIDE + rh, dst * GATE_STRIDE + rh + h_m)
            wx = wx.at[rd:rd + d_m, cd].set(wx_m[:, cs])
            wh = wh.at[rh:rh + h_m, cd].set(wh_m[:, cs])
            b = b.at[dst, rh:rh + h_m].set(b_m[0, cs])
        rd += d_m
        rh += h_m
    return wx, wh, b


def _pack_projection(fc_text, fc_audio, fc_video, fc_mem, C=NUM_CTX):
    """Fuse the 4 Multimodal_Context projections into one (C*24, 32) matmul.

    Per-context row block c holds [text(8) | audio(8) | video(8)] weights; output
    columns are [c_l | c_a | c_v | mem] priors.  The mem block embeds a mean-pool
    (Transformer stand-in) as fc_mem_w / C.
    """
    wt, bt = fc_text
    wa, ba = fc_audio
    wv, bv = fc_video
    wm, bm = fc_mem
    hc = H_TEXT + H_AUDIO + H_VIDEO          # 24 per-context packed hidden
    w = jnp.zeros((C * hc, FINAL), jnp.float32)
    for c in range(C):
        r = c * hc
        w = w.at[r:r + H_TEXT, 0:DH_L].set(wt[c * H_TEXT:(c + 1) * H_TEXT, :])
        w = w.at[r + H_TEXT:r + H_TEXT + H_AUDIO,
                 DH_L:DH_L + DH_A].set(wa[c * H_AUDIO:(c + 1) * H_AUDIO, :])
        w = w.at[r + H_TEXT + H_AUDIO:r + hc,
                 DH_L + DH_A:DH_L + DH_A + DH_V].set(
                     wv[c * H_VIDEO:(c + 1) * H_VIDEO, :])
        w = w.at[r:r + hc, TOTAL_H:].set(wm / C)
    b = jnp.concatenate([bt, ba, bv, bm], axis=1)
    return w, b


def init_params(key):
    keys = iter(jax.random.split(key, 24))
    embed = jax.random.normal(next(keys), (VOCAB, EMB), jnp.float32) * 0.1

    # Unimodal_Context LSTMs (nn.LSTM, 1 layer, last hidden state used)
    uni_text = _lstm_params(next(keys), EMB, H_TEXT)
    uni_audio = _lstm_params(next(keys), D_A, H_AUDIO)
    uni_video = _lstm_params(next(keys), D_V, H_VIDEO)

    # Multimodal_Context projections
    fc_text = _dense_params(next(keys), NUM_CTX * H_TEXT, DH_L)
    fc_audio = _dense_params(next(keys), NUM_CTX * H_AUDIO, DH_A)
    fc_video = _dense_params(next(keys), NUM_CTX * H_VIDEO, DH_V)
    fc_mem = _dense_params(next(keys), H_TEXT + H_AUDIO + H_VIDEO, MEM)

    # MFN
    lstm_l = _lstm_params(next(keys), EMB, DH_L)
    lstm_a = _lstm_params(next(keys), D_A, DH_A)
    lstm_v = _lstm_params(next(keys), D_V, DH_V)
    att1_1 = _dense_params(next(keys), ATT_IN, H_ATT1)
    att1_2 = _dense_params(next(keys), H_ATT1, ATT_IN)
    att2_1 = _dense_params(next(keys), ATT_IN, H_ATT2)
    att2_2 = _dense_params(next(keys), H_ATT2, MEM)
    g1_1 = _dense_params(next(keys), GAMMA_IN, H_G1)
    g1_2 = _dense_params(next(keys), H_G1, MEM)
    g2_1 = _dense_params(next(keys), GAMMA_IN, H_G2)
    g2_2 = _dense_params(next(keys), H_G2, MEM)
    out1 = _dense_params(next(keys), FINAL, H_OUT)
    out2 = _dense_params(next(keys), H_OUT, 1)

    # ---- lane-aligned LSTM gate packing -> one (96, 512) bf16 slab ----
    ctx_wx, ctx_wh, ctx_b = _pack_lstm_lane_aligned([uni_text, uni_audio, uni_video])
    mfn_wx, mfn_wh, mfn_b = _pack_lstm_lane_aligned([lstm_l, lstm_a, lstm_v])
    wlstm = jnp.concatenate([ctx_wx, ctx_wh, mfn_wx, mfn_wh],
                            axis=0).astype(jnp.bfloat16)              # (96, 512)

    # ---- all other weight matrices -> one (336, 128) bf16 slab ----
    proj_w, proj_b = _pack_projection(fc_text, fc_audio, fc_video, fc_mem)
    gw1 = jnp.concatenate([g1_1[0], g2_1[0]], axis=1)                 # (56, 32)
    gb1 = jnp.concatenate([g1_1[1], g2_1[1]], axis=1)
    gw2 = jnp.zeros((H_G1 + H_G2, 2 * MEM), jnp.float32)
    gw2 = gw2.at[:H_G1, :MEM].set(g1_2[0]).at[H_G1:, MEM:].set(g2_2[0])
    gb2 = jnp.concatenate([g1_2[1], g2_2[1]], axis=1)

    wsmall = jnp.zeros((WS_ROWS, 128), jnp.float32)
    for name, mat in (("proj", proj_w), ("a1w1", att1_1[0]), ("a1w2", att1_2[0]),
                      ("a2w1", att2_1[0]), ("a2w2", att2_2[0]), ("gw1", gw1),
                      ("gw2", gw2), ("ow1", out1[0]), ("ow2", out2[0])):
        r, nr, nc = _WS[name]
        assert mat.shape == (nr, nc), (name, mat.shape, (nr, nc))
        wsmall = wsmall.at[r:r + nr, 0:nc].set(mat)
    wsmall = wsmall.astype(jnp.bfloat16)

    # ---- packed f32 bias slab ----
    bias = jnp.zeros((BIAS_ROWS, 128), jnp.float32)
    bias = bias.at[0:4, :].set(ctx_b)
    bias = bias.at[4:8, :].set(mfn_b)
    for name, vec in (("proj_b", proj_b), ("a1b1", att1_1[1]), ("a1b2", att1_2[1]),
                      ("a2b1", att2_1[1]), ("a2b2", att2_2[1]), ("gb1", gb1),
                      ("gb2", gb2), ("ob1", out1[1]), ("ob2", out2[1])):
        r, n = _BR[name]
        assert vec.shape == (1, n), (name, vec.shape, n)
        bias = bias.at[r, 0:n].set(vec[0])

    return dict(embed=embed, wlstm=wlstm, wsmall=wsmall, bias=bias)


# ----------------------------- full forward --------------------------------

def _round_up(x, m):
    return ((x + m - 1) // m) * m


@jax.jit
def contextual_mfn_forward(params, X_Punchline, X_Context, X_pos_Context, Y):
    # TODO(synk): X_pos_Context / Y feed only the Transformer self-attention
    # module, which is not defined in the reference source; the memory prior
    # uses a mean-pool + Linear stand-in instead.
    del X_pos_Context, Y
    embed = params["embed"]
    B, Tp, _ = X_Punchline.shape
    _, C, S, _ = X_Context.shape

    # Batch tiling: largest tile <= TILE_B_CAP that minimizes padding.
    num_tiles = -(-B // TILE_B_CAP)
    TILE_B = _round_up(-(-B // num_tiles), 8)
    NP = TILE_B * num_tiles

    # Punchline: permute(1,0,2) -> time-major, embed word index, pack, pad, bf16.
    Xp = jnp.transpose(X_Punchline, (1, 0, 2))                        # (T, B, F)
    x_l = jnp.take(embed, Xp[:, :, 0].astype(jnp.int32), axis=0)      # (T, B, 16)
    punch = jnp.concatenate([x_l, Xp[:, :, D_L_ORIG:]], axis=2)       # (T, B, 24)
    punch = jnp.pad(punch, ((0, 0), (0, NP - B), (0, 0))).astype(jnp.bfloat16)

    # Context: (B, C, S, F) -> (S, C, B, 24).  The 4-D layout keeps one batch
    # tile a rectangular block the BlockSpec index_map can express, while the
    # per-context slabs stay contiguous 8-aligned sublane slices in-kernel.
    Xc = jnp.transpose(X_Context, (2, 1, 0, 3))                       # (S, C, B, F)
    x_lc = jnp.take(embed, Xc[..., 0].astype(jnp.int32), axis=0)      # (S, C, B, 16)
    ctx = jnp.concatenate([x_lc, Xc[..., D_L_ORIG:]], axis=3)         # (S, C, B, 24)
    ctx = jnp.pad(ctx, ((0, 0), (0, 0), (0, NP - B), (0, 0))).astype(jnp.bfloat16)

    # Advisory cost estimate (keeps XLA from treating the serial loops as cheap).
    cell_flops = 2 * D_PACK * GATE_COLS + 2 * TOTAL_H * GATE_COLS
    mlp_flops = 2 * (ATT_IN * H_ATT1 + H_ATT1 * ATT_IN + ATT_IN * H_ATT2
                     + H_ATT2 * MEM + GAMMA_IN * (H_G1 + H_G2)
                     + (H_G1 + H_G2) * 2 * MEM)
    flops = (S * NP * C * cell_flops + Tp * NP * (cell_flops + mlp_flops)
             + NP * 2 * (C * TOTAL_H * FINAL + FINAL * H_OUT + H_OUT))
    transcendentals = (S * NP * C * 5 * TOTAL_H
                       + Tp * NP * (5 * TOTAL_H + ATT_IN + 3 * MEM + 1))
    bytes_accessed = (2 * (int(ctx.size) + int(punch.size))
                      + 2 * (int(params["wlstm"].size) + int(params["wsmall"].size))
                      + 4 * int(params["bias"].size) + 4 * NP)

    # VMEM budget from actual tile sizes, clamped <= 40 MiB (v7x has 64 MiB).
    tile_in_bytes = 2 * 2 * (S * C + Tp) * TILE_B * D_PACK   # double-buffered bf16
    act_bytes = 16 * TILE_B * GATE_COLS * 4                  # loop-internal headroom
    vmem_limit = int(min(40 * 1024 * 1024,
                         max(20 * 1024 * 1024,
                             tile_in_bytes + act_bytes + 4 * 1024 * 1024)))

    out = pl.pallas_call(
        _contextual_mfn_kernel,
        out_shape=jax.ShapeDtypeStruct((NP, 1), jnp.float32),
        grid=(num_tiles,),
        in_specs=[
            pl.BlockSpec((S, C, TILE_B, D_PACK), lambda i: (0, 0, i, 0)),
            pl.BlockSpec((Tp, TILE_B, D_PACK), lambda i: (0, i, 0)),
            pl.BlockSpec(params["wlstm"].shape, lambda i: (0, 0)),
            pl.BlockSpec(params["wsmall"].shape, lambda i: (0, 0)),
            pl.BlockSpec(params["bias"].shape, lambda i: (0, 0)),
        ],
        out_specs=pl.BlockSpec((TILE_B, 1), lambda i: (i, 0)),
        compiler_params=pltpu.CompilerParams(
            dimension_semantics=("parallel",),        # megacore sharding on v7x
            vmem_limit_bytes=vmem_limit),
        cost_estimate=pl.CostEstimate(flops=int(flops),
                                      transcendentals=int(transcendentals),
                                      bytes_accessed=int(bytes_accessed)),
    )(ctx, punch, params["wlstm"], params["wsmall"], params["bias"])
    return out[:B]


# --------------------------------- main -------------------------------------

if __name__ == "__main__":
    key = jax.random.PRNGKey(0)
    kp, kc, kf1, kf2, kparam = jax.random.split(key, 5)

    B, Tp, C, S = 2, 6, NUM_CTX, 5
    idx_p = jax.random.randint(kp, (B, Tp, 1), 0, VOCAB).astype(jnp.float32)
    feat_p = jax.random.normal(kf1, (B, Tp, D_A + D_V), jnp.float32)
    X_Punchline = jnp.concatenate([idx_p, feat_p], axis=2)            # (2, 6, 9)

    idx_c = jax.random.randint(kc, (B, C, S, 1), 0, VOCAB).astype(jnp.float32)
    feat_c = jax.random.normal(kf2, (B, C, S, D_A + D_V), jnp.float32)
    X_Context = jnp.concatenate([idx_c, feat_c], axis=3)              # (2, 3, 5, 9)

    X_pos_Context = jnp.zeros((B, C), jnp.int32)   # unused by the stand-in
    Y = jnp.zeros((B, 1), jnp.float32)             # unused by the stand-in

    params = init_params(kparam)
    prediction = contextual_mfn_forward(params, X_Punchline, X_Context,
                                        X_pos_Context, Y)
    jax.block_until_ready(prediction)
    assert prediction.shape == (B, 1)
    print("KERNEL_OK")
</pallas_src>

<mosaic_0001>
module attributes {stable_mosaic.version = 11 : i64} {
  func.func @_contextual_mfn_kernel(%arg0: i32, %arg1: memref<5x3x8x24xbf16, #tpu.memory_space<vmem>>, %arg2: memref<6x8x24xbf16, #tpu.memory_space<vmem>>, %arg3: memref<96x512xbf16, #tpu.memory_space<vmem>>, %arg4: memref<336x128xbf16, #tpu.memory_space<vmem>>, %arg5: memref<24x128xf32, #tpu.memory_space<vmem>>, %arg6: memref<8x1xf32, #tpu.memory_space<vmem>>) attributes {dimension_semantics = [#tpu.dimension_semantics<parallel>], iteration_bounds = array<i64: 1>, scalar_prefetch = 0 : i64, scratch_operands = 0 : i64, tpu.core_type = #tpu.core_type<tc>, window_params = [{transform_indices = @transform_0, window_bounds = array<i64: 5, 3, 8, 24>}, {transform_indices = @transform_1, window_bounds = array<i64: 6, 8, 24>}, {pipeline_mode = #tpu.pipeline_mode<synchronous>, transform_indices = @transform_2, window_bounds = array<i64: 96, 512>}, {pipeline_mode = #tpu.pipeline_mode<synchronous>, transform_indices = @transform_3, window_bounds = array<i64: 336, 128>}, {pipeline_mode = #tpu.pipeline_mode<synchronous>, transform_indices = @transform_4, window_bounds = array<i64: 24, 128>}, {transform_indices = @transform_5, window_bounds = array<i64: 8, 1>}]} {
    %c0 = arith.constant 0 : index
    %c0_0 = arith.constant 0 : index
    %0 = vector.load %arg3[%c0, %c0_0] : memref<96x512xbf16, #tpu.memory_space<vmem>>, vector<96x512xbf16>
    %1 = vector.extract_strided_slice %0 {offsets = [0, 0], sizes = [24, 512], strides = [1, 1]} : vector<96x512xbf16> to vector<24x512xbf16>
    %2 = vector.extract_strided_slice %0 {offsets = [24, 0], sizes = [24, 512], strides = [1, 1]} : vector<96x512xbf16> to vector<24x512xbf16>
    %3 = vector.extract_strided_slice %0 {offsets = [48, 0], sizes = [24, 512], strides = [1, 1]} : vector<96x512xbf16> to vector<24x512xbf16>
    %4 = vector.extract_strided_slice %0 {offsets = [72, 0], sizes = [24, 512], strides = [1, 1]} : vector<96x512xbf16> to vector<24x512xbf16>
    %c0_1 = arith.constant 0 : index
    %c0_2 = arith.constant 0 : index
    %5 = vector.load %arg4[%c0_1, %c0_2] : memref<336x128xbf16, #tpu.memory_space<vmem>>, vector<336x128xbf16>
    %6 = vector.extract_strided_slice %5 {offsets = [0, 0], sizes = [72, 32], strides = [1, 1]} : vector<336x128xbf16> to vector<72x32xbf16>
    %7 = vector.extract_strided_slice %5 {offsets = [72, 0], sizes = [48, 16], strides = [1, 1]} : vector<336x128xbf16> to vector<48x16xbf16>
    %8 = vector.extract_strided_slice %5 {offsets = [120, 0], sizes = [16, 48], strides = [1, 1]} : vector<336x128xbf16> to vector<16x48xbf16>
    %9 = vector.extract_strided_slice %5 {offsets = [136, 0], sizes = [48, 16], strides = [1, 1]} : vector<336x128xbf16> to vector<48x16xbf16>
    %10 = vector.extract_strided_slice %5 {offsets = [184, 0], sizes = [16, 8], strides = [1, 1]} : vector<336x128xbf16> to vector<16x8xbf16>
    %11 = vector.extract_strided_slice %5 {offsets = [200, 0], sizes = [56, 32], strides = [1, 1]} : vector<336x128xbf16> to vector<56x32xbf16>
    %12 = vector.extract_strided_slice %5 {offsets = [256, 0], sizes = [32, 16], strides = [1, 1]} : vector<336x128xbf16> to vector<32x16xbf16>
    %13 = vector.extract_strided_slice %5 {offsets = [288, 0], sizes = [32, 16], strides = [1, 1]} : vector<336x128xbf16> to vector<32x16xbf16>
    %14 = vector.extract_strided_slice %5 {offsets = [320, 0], sizes = [16, 1], strides = [1, 1]} : vector<336x128xbf16> to vector<16x1xbf16>
    %c0_3 = arith.constant 0 : index
    %c0_4 = arith.constant 0 : index
    %15 = vector.load %arg5[%c0_3, %c0_4] : memref<24x128xf32, #tpu.memory_space<vmem>>, vector<24x128xf32>
    %16 = vector.extract_strided_slice %15 {offsets = [0, 0], sizes = [1, 24], strides = [1, 1]} : vector<24x128xf32> to vector<1x24xf32>
    %17 = vector.extract_strided_slice %15 {offsets = [1, 0], sizes = [1, 24], strides = [1, 1]} : vector<24x128xf32> to vector<1x24xf32>
    %18 = vector.extract_strided_slice %15 {offsets = [2, 0], sizes = [1, 24], strides = [1, 1]} : vector<24x128xf32> to vector<1x24xf32>
    %19 = vector.extract_strided_slice %15 {offsets = [3, 0], sizes = [1, 24], strides = [1, 1]} : vector<24x128xf32> to vector<1x24xf32>
    %20 = vector.extract_strided_slice %15 {offsets = [4, 0], sizes = [1, 24], strides = [1, 1]} : vector<24x128xf32> to vector<1x24xf32>
    %21 = vector.extract_strided_slice %15 {offsets = [5, 0], sizes = [1, 24], strides = [1, 1]} : vector<24x128xf32> to vector<1x24xf32>
    %22 = vector.extract_strided_slice %15 {offsets = [6, 0], sizes = [1, 24], strides = [1, 1]} : vector<24x128xf32> to vector<1x24xf32>
    %23 = vector.extract_strided_slice %15 {offsets = [7, 0], sizes = [1, 24], strides = [1, 1]} : vector<24x128xf32> to vector<1x24xf32>
    %24 = vector.extract_strided_slice %15 {offsets = [8, 0], sizes = [1, 32], strides = [1, 1]} : vector<24x128xf32> to vector<1x32xf32>
    %25 = vector.extract_strided_slice %15 {offsets = [9, 0], sizes = [1, 16], strides = [1, 1]} : vector<24x128xf32> to vector<1x16xf32>
    %26 = vector.extract_strided_slice %15 {offsets = [10, 0], sizes = [1, 48], strides = [1, 1]} : vector<24x128xf32> to vector<1x48xf32>
    %27 = vector.extract_strided_slice %15 {offsets = [11, 0], sizes = [1, 16], strides = [1, 1]} : vector<24x128xf32> to vector<1x16xf32>
    %28 = vector.extract_strided_slice %15 {offsets = [12, 0], sizes = [1, 8], strides = [1, 1]} : vector<24x128xf32> to vector<1x8xf32>
    %29 = vector.extract_strided_slice %15 {offsets = [13, 0], sizes = [1, 32], strides = [1, 1]} : vector<24x128xf32> to vector<1x32xf32>
    %30 = vector.extract_strided_slice %15 {offsets = [14, 0], sizes = [1, 16], strides = [1, 1]} : vector<24x128xf32> to vector<1x16xf32>
    %31 = vector.extract_strided_slice %15 {offsets = [15, 0], sizes = [1, 16], strides = [1, 1]} : vector<24x128xf32> to vector<1x16xf32>
    %32 = vector.extract_strided_slice %15 {offsets = [16, 0], sizes = [1, 1], strides = [1, 1]} : vector<24x128xf32> to vector<1x1xf32>
    %cst = arith.constant 0.000000e+00 : f32
    %33 = vector.broadcast %cst : f32 to vector<24x24xf32>
    %cst_5 = arith.constant 0.000000e+00 : f32
    %34 = vector.broadcast %cst_5 : f32 to vector<24x24xf32>
    %c0_i32 = arith.constant 0 : i32
    %35 = arith.index_cast %c0_i32 : i32 to index
    %c0_6 = arith.constant 0 : index
    %c0_7 = arith.constant 0 : index
    %c0_8 = arith.constant 0 : index
    %36 = vector.load %arg1[%35, %c0_6, %c0_7, %c0_8] : memref<5x3x8x24xbf16, #tpu.memory_space<vmem>>, vector<1x3x8x24xbf16>
    %37 = vector.shape_cast %36 : vector<1x3x8x24xbf16> to vector<3x8x24xbf16>
    %38 = vector.shape_cast %37 : vector<3x8x24xbf16> to vector<24x24xbf16>
    %cst_9 = arith.constant dense<0.000000e+00> : vector<24x512xf32>
    %39 = tpu.matmul %38, %1, %cst_9 {dimension_numbers = #tpu.dot_dimension_numbers<[1], [0], [0], [1], [0, 0, 1, 1], [], []>} : vector<24x24xbf16>, vector<24x512xbf16>, vector<24x512xf32> -> vector<24x512xf32>
    %40 = arith.truncf %33 : vector<24x24xf32> to vector<24x24xbf16>
    %cst_10 = arith.constant dense<0.000000e+00> : vector<24x512xf32>
    %41 = tpu.matmul %40, %2, %cst_10 {dimension_numbers = #tpu.dot_dimension_numbers<[1], [0], [0], [1], [0, 0, 1, 1], [], []>} : vector<24x24xbf16>, vector<24x512xbf16>, vector<24x512xf32> -> vector<24x512xf32>
    %42 = arith.addf %39, %41 : vector<24x512xf32>
    %43 = vector.extract_strided_slice %42 {offsets = [0, 0], sizes = [24, 24], strides = [1, 1]} : vector<24x512xf32> to vector<24x24xf32>
    %44 = vector.broadcast %16 : vector<1x24xf32> to vector<24x24xf32>
    %45 = arith.addf %43, %44 : vector<24x24xf32>
    %46 = arith.negf %45 : vector<24x24xf32>
    %47 = math.exp %46 : vector<24x24xf32>
    %cst_11 = arith.constant 1.000000e+00 : f32
    %48 = vector.broadcast %cst_11 : f32 to vector<24x24xf32>
    %49 = arith.addf %48, %47 : vector<24x24xf32>
    %50 = arith.divf %48, %49 : vector<24x24xf32>
    %51 = vector.extract_strided_slice %42 {offsets = [0, 128], sizes = [24, 24], strides = [1, 1]} : vector<24x512xf32> to vector<24x24xf32>
    %52 = vector.broadcast %17 : vector<1x24xf32> to vector<24x24xf32>
    %53 = arith.addf %51, %52 : vector<24x24xf32>
    %54 = arith.negf %53 : vector<24x24xf32>
    %55 = math.exp %54 : vector<24x24xf32>
    %cst_12 = arith.constant 1.000000e+00 : f32
    %56 = vector.broadcast %cst_12 : f32 to vector<24x24xf32>
    %57 = arith.addf %56, %55 : vector<24x24xf32>
    %58 = arith.divf %56, %57 : vector<24x24xf32>
    %59 = vector.extract_strided_slice %42 {offsets = [0, 256], sizes = [24, 24], strides = [1, 1]} : vector<24x512xf32> to vector<24x24xf32>
    %60 = vector.broadcast %18 : vector<1x24xf32> to vector<24x24xf32>
    %61 = arith.addf %59, %60 : vector<24x24xf32>
    %62 = arith.negf %61 : vector<24x24xf32>
    %63 = math.exp %62 : vector<24x24xf32>
    %cst_13 = arith.constant 1.000000e+00 : f32
    %64 = vector.broadcast %cst_13 : f32 to vector<24x24xf32>
    %65 = arith.addf %64, %63 : vector<24x24xf32>
    %66 = arith.divf %64, %65 : vector<24x24xf32>
    %67 = vector.extract_strided_slice %42 {offsets = [0, 384], sizes = [24, 24], strides = [1, 1]} : vector<24x512xf32> to vector<24x24xf32>
    %68 = vector.broadcast %19 : vector<1x24xf32> to vector<24x24xf32>
    %69 = arith.addf %67, %68 : vector<24x24xf32>
    %70 = math.tanh %69 : vector<24x24xf32>
    %71 = arith.mulf %58, %34 : vector<24x24xf32>
    %72 = arith.mulf %50, %70 : vector<24x24xf32>
    %73 = arith.addf %71, %72 : vector<24x24xf32>
    %74 = math.tanh %73 : vector<24x24xf32>
    %75 = arith.mulf %66, %74 : vector<24x24xf32>
    %c1_i32 = arith.constant 1 : i32
    %76 = arith.index_cast %c1_i32 : i32 to index
    %c0_14 = arith.constant 0 : index
    %c0_15 = arith.constant 0 : index
    %c0_16 = arith.constant 0 : index
    %77 = vector.load %arg1[%76, %c0_14, %c0_15, %c0_16] : memref<5x3x8x24xbf16, #tpu.memory_space<vmem>>, vector<1x3x8x24xbf16>
    %78 = vector.shape_cast %77 : vector<1x3x8x24xbf16> to vector<3x8x24xbf16>
    %79 = vector.shape_cast %78 : vector<3x8x24xbf16> to vector<24x24xbf16>
    %cst_17 = arith.constant dense<0.000000e+00> : vector<24x512xf32>
    %80 = tpu.matmul %79, %1, %cst_17 {dimension_numbers = #tpu.dot_dimension_numbers<[1], [0], [0], [1], [0, 0, 1, 1], [], []>} : vector<24x24xbf16>, vector<24x512xbf16>, vector<24x512xf32> -> vector<24x512xf32>
    %81 = arith.truncf %75 : vector<24x24xf32> to vector<24x24xbf16>
    %cst_18 = arith.constant dense<0.000000e+00> : vector<24x512xf32>
    %82 = tpu.matmul %81, %2, %cst_18 {dimension_numbers = #tpu.dot_dimension_numbers<[1], [0], [0], [1], [0, 0, 1, 1], [], []>} : vector<24x24xbf16>, vector<24x512xbf16>, vector<24x512xf32> -> vector<24x512xf32>
    %83 = arith.addf %80, %82 : vector<24x512xf32>
    %84 = vector.extract_strided_slice %83 {offsets = [0, 0], sizes = [24, 24], strides = [1, 1]} : vector<24x512xf32> to vector<24x24xf32>
    %85 = vector.broadcast %16 : vector<1x24xf32> to vector<24x24xf32>
    %86 = arith.addf %84, %85 : vector<24x24xf32>
    %87 = arith.negf %86 : vector<24x24xf32>
    %88 = math.exp %87 : vector<24x24xf32>
    %cst_19 = arith.constant 1.000000e+00 : f32
    %89 = vector.broadcast %cst_19 : f32 to vector<24x24xf32>
    %90 = arith.addf %89, %88 : vector<24x24xf32>
    %91 = arith.divf %89, %90 : vector<24x24xf32>
    %92 = vector.extract_strided_slice %83 {offsets = [0, 128], sizes = [24, 24], strides = [1, 1]} : vector<24x512xf32> to vector<24x24xf32>
    %93 = vector.broadcast %17 : vector<1x24xf32> to vector<24x24xf32>
    %94 = arith.addf %92, %93 : vector<24x24xf32>
    %95 = arith.negf %94 : vector<24x24xf32>
    %96 = math.exp %95 : vector<24x24xf32>
    %cst_20 = arith.constant 1.000000e+00 : f32
    %97 = vector.broadcast %cst_20 : f32 to vector<24x24xf32>
    %98 = arith.addf %97, %96 : vector<24x24xf32>
    %99 = arith.divf %97, %98 : vector<24x24xf32>
    %100 = vector.extract_strided_slice %83 {offsets = [0, 256], sizes = [24, 24], strides = [1, 1]} : vector<24x512xf32> to vector<24x24xf32>
    %101 = vector.broadcast %18 : vector<1x24xf32> to vector<24x24xf32>
    %102 = arith.addf %100, %101 : vector<24x24xf32>
    %103 = arith.negf %102 : vector<24x24xf32>
    %104 = math.exp %103 : vector<24x24xf32>
    %cst_21 = arith.constant 1.000000e+00 : f32
    %105 = vector.broadcast %cst_21 : f32 to vector<24x24xf32>
    %106 = arith.addf %105, %104 : vector<24x24xf32>
    %107 = arith.divf %105, %106 : vector<24x24xf32>
    %108 = vector.extract_strided_slice %83 {offsets = [0, 384], sizes = [24, 24], strides = [1, 1]} : vector<24x512xf32> to vector<24x24xf32>
    %109 = vector.broadcast %19 : vector<1x24xf32> to vector<24x24xf32>
    %110 = arith.addf %108, %109 : vector<24x24xf32>
    %111 = math.tanh %110 : vector<24x24xf32>
    %112 = arith.mulf %99, %73 : vector<24x24xf32>
    %113 = arith.mulf %91, %111 : vector<24x24xf32>
    %114 = arith.addf %112, %113 : vector<24x24xf32>
    %115 = math.tanh %114 : vector<24x24xf32>
    %116 = arith.mulf %107, %115 : vector<24x24xf32>
    %c2_i32 = arith.constant 2 : i32
    %117 = arith.index_cast %c2_i32 : i32 to index
    %c0_22 = arith.constant 0 : index
    %c0_23 = arith.constant 0 : index
    %c0_24 = arith.constant 0 : index
    %118 = vector.load %arg1[%117, %c0_22, %c0_23, %c0_24] : memref<5x3x8x24xbf16, #tpu.memory_space<vmem>>, vector<1x3x8x24xbf16>
    %119 = vector.shape_cast %118 : vector<1x3x8x24xbf16> to vector<3x8x24xbf16>
    %120 = vector.shape_cast %119 : vector<3x8x24xbf16> to vector<24x24xbf16>
    %cst_25 = arith.constant dense<0.000000e+00> : vector<24x512xf32>
    %121 = tpu.matmul %120, %1, %cst_25 {dimension_numbers = #tpu.dot_dimension_numbers<[1], [0], [0], [1], [0, 0, 1, 1], [], []>} : vector<24x24xbf16>, vector<24x512xbf16>, vector<24x512xf32> -> vector<24x512xf32>
    %122 = arith.truncf %116 : vector<24x24xf32> to vector<24x24xbf16>
    %cst_26 = arith.constant dense<0.000000e+00> : vector<24x512xf32>
    %123 = tpu.matmul %122, %2, %cst_26 {dimension_numbers = #tpu.dot_dimension_numbers<[1], [0], [0], [1], [0, 0, 1, 1], [], []>} : vector<24x24xbf16>, vector<24x512xbf16>, vector<24x512xf32> -> vector<24x512xf32>
    %124 = arith.addf %121, %123 : vector<24x512xf32>
    %125 = vector.extract_strided_slice %124 {offsets = [0, 0], sizes = [24, 24], strides = [1, 1]} : vector<24x512xf32> to vector<24x24xf32>
    %126 = vector.broadcast %16 : vector<1x24xf32> to vector<24x24xf32>
    %127 = arith.addf %125, %126 : vector<24x24xf32>
    %128 = arith.negf %127 : vector<24x24xf32>
    %129 = math.exp %128 : vector<24x24xf32>
    %cst_27 = arith.constant 1.000000e+00 : f32
    %130 = vector.broadcast %cst_27 : f32 to vector<24x24xf32>
    %131 = arith.addf %130, %129 : vector<24x24xf32>
    %132 = arith.divf %130, %131 : vector<24x24xf32>
    %133 = vector.extract_strided_slice %124 {offsets = [0, 128], sizes = [24, 24], strides = [1, 1]} : vector<24x512xf32> to vector<24x24xf32>
    %134 = vector.broadcast %17 : vector<1x24xf32> to vector<24x24xf32>
    %135 = arith.addf %133, %134 : vector<24x24xf32>
    %136 = arith.negf %135 : vector<24x24xf32>
    %137 = math.exp %136 : vector<24x24xf32>
    %cst_28 = arith.constant 1.000000e+00 : f32
    %138 = vector.broadcast %cst_28 : f32 to vector<24x24xf32>
    %139 = arith.addf %138, %137 : vector<24x24xf32>
    %140 = arith.divf %138, %139 : vector<24x24xf32>
    %141 = vector.extract_strided_slice %124 {offsets = [0, 256], sizes = [24, 24], strides = [1, 1]} : vector<24x512xf32> to vector<24x24xf32>
    %142 = vector.broadcast %18 : vector<1x24xf32> to vector<24x24xf32>
    %143 = arith.addf %141, %142 : vector<24x24xf32>
    %144 = arith.negf %143 : vector<24x24xf32>
    %145 = math.exp %144 : vector<24x24xf32>
    %cst_29 = arith.constant 1.000000e+00 : f32
    %146 = vector.broadcast %cst_29 : f32 to vector<24x24xf32>
    %147 = arith.addf %146, %145 : vector<24x24xf32>
    %148 = arith.divf %146, %147 : vector<24x24xf32>
    %149 = vector.extract_strided_slice %124 {offsets = [0, 384], sizes = [24, 24], strides = [1, 1]} : vector<24x512xf32> to vector<24x24xf32>
    %150 = vector.broadcast %19 : vector<1x24xf32> to vector<24x24xf32>
    %151 = arith.addf %149, %150 : vector<24x24xf32>
    %152 = math.tanh %151 : vector<24x24xf32>
    %153 = arith.mulf %140, %114 : vector<24x24xf32>
    %154 = arith.mulf %132, %152 : vector<24x24xf32>
    %155 = arith.addf %153, %154 : vector<24x24xf32>
    %156 = math.tanh %155 : vector<24x24xf32>
    %157 = arith.mulf %148, %156 : vector<24x24xf32>
    %c3_i32 = arith.constant 3 : i32
    %158 = arith.index_cast %c3_i32 : i32 to index
    %c0_30 = arith.constant 0 : index
    %c0_31 = arith.constant 0 : index
    %c0_32 = arith.constant 0 : index
    %159 = vector.load %arg1[%158, %c0_30, %c0_31, %c0_32] : memref<5x3x8x24xbf16, #tpu.memory_space<vmem>>, vector<1x3x8x24xbf16>
    %160 = vector.shape_cast %159 : vector<1x3x8x24xbf16> to vector<3x8x24xbf16>
    %161 = vector.shape_cast %160 : vector<3x8x24xbf16> to vector<24x24xbf16>
    %cst_33 = arith.constant dense<0.000000e+00> : vector<24x512xf32>
    %162 = tpu.matmul %161, %1, %cst_33 {dimension_numbers = #tpu.dot_dimension_numbers<[1], [0], [0], [1], [0, 0, 1, 1], [], []>} : vector<24x24xbf16>, vector<24x512xbf16>, vector<24x512xf32> -> vector<24x512xf32>
    %163 = arith.truncf %157 : vector<24x24xf32> to vector<24x24xbf16>
    %cst_34 = arith.constant dense<0.000000e+00> : vector<24x512xf32>
    %164 = tpu.matmul %163, %2, %cst_34 {dimension_numbers = #tpu.dot_dimension_numbers<[1], [0], [0], [1], [0, 0, 1, 1], [], []>} : vector<24x24xbf16>, vector<24x512xbf16>, vector<24x512xf32> -> vector<24x512xf32>
    %165 = arith.addf %162, %164 : vector<24x512xf32>
    %166 = vector.extract_strided_slice %165 {offsets = [0, 0], sizes = [24, 24], strides = [1, 1]} : vector<24x512xf32> to vector<24x24xf32>
    %167 = vector.broadcast %16 : vector<1x24xf32> to vector<24x24xf32>
    %168 = arith.addf %166, %167 : vector<24x24xf32>
    %169 = arith.negf %168 : vector<24x24xf32>
    %170 = math.exp %169 : vector<24x24xf32>
    %cst_35 = arith.constant 1.000000e+00 : f32
    %171 = vector.broadcast %cst_35 : f32 to vector<24x24xf32>
    %172 = arith.addf %171, %170 : vector<24x24xf32>
    %173 = arith.divf %171, %172 : vector<24x24xf32>
    %174 = vector.extract_strided_slice %165 {offsets = [0, 128], sizes = [24, 24], strides = [1, 1]} : vector<24x512xf32> to vector<24x24xf32>
    %175 = vector.broadcast %17 : vector<1x24xf32> to vector<24x24xf32>
    %176 = arith.addf %174, %175 : vector<24x24xf32>
    %177 = arith.negf %176 : vector<24x24xf32>
    %178 = math.exp %177 : vector<24x24xf32>
    %cst_36 = arith.constant 1.000000e+00 : f32
    %179 = vector.broadcast %cst_36 : f32 to vector<24x24xf32>
    %180 = arith.addf %179, %178 : vector<24x24xf32>
    %181 = arith.divf %179, %180 : vector<24x24xf32>
    %182 = vector.extract_strided_slice %165 {offsets = [0, 256], sizes = [24, 24], strides = [1, 1]} : vector<24x512xf32> to vector<24x24xf32>
    %183 = vector.broadcast %18 : vector<1x24xf32> to vector<24x24xf32>
    %184 = arith.addf %182, %183 : vector<24x24xf32>
    %185 = arith.negf %184 : vector<24x24xf32>
    %186 = math.exp %185 : vector<24x24xf32>
    %cst_37 = arith.constant 1.000000e+00 : f32
    %187 = vector.broadcast %cst_37 : f32 to vector<24x24xf32>
    %188 = arith.addf %187, %186 : vector<24x24xf32>
    %189 = arith.divf %187, %188 : vector<24x24xf32>
    %190 = vector.extract_strided_slice %165 {offsets = [0, 384], sizes = [24, 24], strides = [1, 1]} : vector<24x512xf32> to vector<24x24xf32>
    %191 = vector.broadcast %19 : vector<1x24xf32> to vector<24x24xf32>
    %192 = arith.addf %190, %191 : vector<24x24xf32>
    %193 = math.tanh %192 : vector<24x24xf32>
    %194 = arith.mulf %181, %155 : vector<24x24xf32>
    %195 = arith.mulf %173, %193 : vector<24x24xf32>
    %196 = arith.addf %194, %195 : vector<24x24xf32>
    %197 = math.tanh %196 : vector<24x24xf32>
    %198 = arith.mulf %189, %197 : vector<24x24xf32>
    %c4_i32 = arith.constant 4 : i32
    %199 = arith.index_cast %c4_i32 : i32 to index
    %c0_38 = arith.constant 0 : index
    %c0_39 = arith.constant 0 : index
    %c0_40 = arith.constant 0 : index
    %200 = vector.load %arg1[%199, %c0_38, %c0_39, %c0_40] : memref<5x3x8x24xbf16, #tpu.memory_space<vmem>>, vector<1x3x8x24xbf16>
    %201 = vector.shape_cast %200 : vector<1x3x8x24xbf16> to vector<3x8x24xbf16>
    %202 = vector.shape_cast %201 : vector<3x8x24xbf16> to vector<24x24xbf16>
    %cst_41 = arith.constant dense<0.000000e+00> : vector<24x512xf32>
    %203 = tpu.matmul %202, %1, %cst_41 {dimension_numbers = #tpu.dot_dimension_numbers<[1], [0], [0], [1], [0, 0, 1, 1], [], []>} : vector<24x24xbf16>, vector<24x512xbf16>, vector<24x512xf32> -> vector<24x512xf32>
    %204 = arith.truncf %198 : vector<24x24xf32> to vector<24x24xbf16>
    %cst_42 = arith.constant dense<0.000000e+00> : vector<24x512xf32>
    %205 = tpu.matmul %204, %2, %cst_42 {dimension_numbers = #tpu.dot_dimension_numbers<[1], [0], [0], [1], [0, 0, 1, 1], [], []>} : vector<24x24xbf16>, vector<24x512xbf16>, vector<24x512xf32> -> vector<24x512xf32>
    %206 = arith.addf %203, %205 : vector<24x512xf32>
    %207 = vector.extract_strided_slice %206 {offsets = [0, 0], sizes = [24, 24], strides = [1, 1]} : vector<24x512xf32> to vector<24x24xf32>
    %208 = vector.broadcast %16 : vector<1x24xf32> to vector<24x24xf32>
    %209 = arith.addf %207, %208 : vector<24x24xf32>
    %210 = arith.negf %209 : vector<24x24xf32>
    %211 = math.exp %210 : vector<24x24xf32>
    %cst_43 = arith.constant 1.000000e+00 : f32
    %212 = vector.broadcast %cst_43 : f32 to vector<24x24xf32>
    %213 = arith.addf %212, %211 : vector<24x24xf32>
    %214 = arith.divf %212, %213 : vector<24x24xf32>
    %215 = vector.extract_strided_slice %206 {offsets = [0, 128], sizes = [24, 24], strides = [1, 1]} : vector<24x512xf32> to vector<24x24xf32>
    %216 = vector.broadcast %17 : vector<1x24xf32> to vector<24x24xf32>
    %217 = arith.addf %215, %216 : vector<24x24xf32>
    %218 = arith.negf %217 : vector<24x24xf32>
    %219 = math.exp %218 : vector<24x24xf32>
    %cst_44 = arith.constant 1.000000e+00 : f32
    %220 = vector.broadcast %cst_44 : f32 to vector<24x24xf32>
    %221 = arith.addf %220, %219 : vector<24x24xf32>
    %222 = arith.divf %220, %221 : vector<24x24xf32>
    %223 = vector.extract_strided_slice %206 {offsets = [0, 256], sizes = [24, 24], strides = [1, 1]} : vector<24x512xf32> to vector<24x24xf32>
    %224 = vector.broadcast %18 : vector<1x24xf32> to vector<24x24xf32>
    %225 = arith.addf %223, %224 : vector<24x24xf32>
    %226 = arith.negf %225 : vector<24x24xf32>
    %227 = math.exp %226 : vector<24x24xf32>
    %cst_45 = arith.constant 1.000000e+00 : f32
    %228 = vector.broadcast %cst_45 : f32 to vector<24x24xf32>
    %229 = arith.addf %228, %227 : vector<24x24xf32>
    %230 = arith.divf %228, %229 : vector<24x24xf32>
    %231 = vector.extract_strided_slice %206 {offsets = [0, 384], sizes = [24, 24], strides = [1, 1]} : vector<24x512xf32> to vector<24x24xf32>
    %232 = vector.broadcast %19 : vector<1x24xf32> to vector<24x24xf32>
    %233 = arith.addf %231, %232 : vector<24x24xf32>
    %234 = math.tanh %233 : vector<24x24xf32>
    %235 = arith.mulf %222, %196 : vector<24x24xf32>
    %236 = arith.mulf %214, %234 : vector<24x24xf32>
    %237 = arith.addf %235, %236 : vector<24x24xf32>
    %238 = math.tanh %237 : vector<24x24xf32>
    %239 = arith.mulf %230, %238 : vector<24x24xf32>
    %c5_i32 = arith.constant 5 : i32
    %cst_46 = arith.constant 0.000000e+00 : f32
    %240 = vector.broadcast %cst_46 : f32 to vector<8x32xf32>
    %241 = vector.extract_strided_slice %239 {offsets = [0, 0], sizes = [8, 24], strides = [1, 1]} : vector<24x24xf32> to vector<8x24xf32>
    %242 = arith.truncf %241 : vector<8x24xf32> to vector<8x24xbf16>
    %243 = vector.extract_strided_slice %6 {offsets = [0, 0], sizes = [24, 32], strides = [1, 1]} : vector<72x32xbf16> to vector<24x32xbf16>
    %cst_47 = arith.constant dense<0.000000e+00> : vector<8x32xf32>
    %244 = tpu.matmul %242, %243, %cst_47 {dimension_numbers = #tpu.dot_dimension_numbers<[1], [0], [0], [1], [0, 0, 1, 1], [], []>} : vector<8x24xbf16>, vector<24x32xbf16>, vector<8x32xf32> -> vector<8x32xf32>
    %245 = arith.addf %240, %244 : vector<8x32xf32>
    %246 = vector.extract_strided_slice %239 {offsets = [8, 0], sizes = [8, 24], strides = [1, 1]} : vector<24x24xf32> to vector<8x24xf32>
    %247 = arith.truncf %246 : vector<8x24xf32> to vector<8x24xbf16>
    %248 = vector.extract_strided_slice %6 {offsets = [24, 0], sizes = [24, 32], strides = [1, 1]} : vector<72x32xbf16> to vector<24x32xbf16>
    %cst_48 = arith.constant dense<0.000000e+00> : vector<8x32xf32>
    %249 = tpu.matmul %247, %248, %cst_48 {dimension_numbers = #tpu.dot_dimension_numbers<[1], [0], [0], [1], [0, 0, 1, 1], [], []>} : vector<8x24xbf16>, vector<24x32xbf16>, vector<8x32xf32> -> vector<8x32xf32>
    %250 = arith.addf %245, %249 : vector<8x32xf32>
    %251 = vector.extract_strided_slice %239 {offsets = [16, 0], sizes = [8, 24], strides = [1, 1]} : vector<24x24xf32> to vector<8x24xf32>
    %252 = arith.truncf %251 : vector<8x24xf32> to vector<8x24xbf16>
    %253 = vector.extract_strided_slice %6 {offsets = [48, 0], sizes = [24, 32], strides = [1, 1]} : vector<72x32xbf16> to vector<24x32xbf16>
    %cst_49 = arith.constant dense<0.000000e+00> : vector<8x32xf32>
    %254 = tpu.matmul %252, %253, %cst_49 {dimension_numbers = #tpu.dot_dimension_numbers<[1], [0], [0], [1], [0, 0, 1, 1], [], []>} : vector<8x24xbf16>, vector<24x32xbf16>, vector<8x32xf32> -> vector<8x32xf32>
    %255 = arith.addf %250, %254 : vector<8x32xf32>
    %256 = vector.broadcast %24 : vector<1x32xf32> to vector<8x32xf32>
    %257 = arith.addf %255, %256 : vector<8x32xf32>
    %258 = vector.extract_strided_slice %257 {offsets = [0, 0], sizes = [8, 24], strides = [1, 1]} : vector<8x32xf32> to vector<8x24xf32>
    %259 = vector.extract_strided_slice %257 {offsets = [0, 24], sizes = [8, 8], strides = [1, 1]} : vector<8x32xf32> to vector<8x8xf32>
    %cst_50 = arith.constant 0.000000e+00 : f32
    %260 = vector.broadcast %cst_50 : f32 to vector<8x24xf32>
    %c0_i32_51 = arith.constant 0 : i32
    %261 = arith.index_cast %c0_i32_51 : i32 to index
    %c0_52 = arith.constant 0 : index
    %c0_53 = arith.constant 0 : index
    %262 = vector.load %arg2[%261, %c0_52, %c0_53] : memref<6x8x24xbf16, #tpu.memory_space<vmem>>, vector<1x8x24xbf16>
    %263 = vector.shape_cast %262 : vector<1x8x24xbf16> to vector<8x24xbf16>
    %cst_54 = arith.constant dense<0.000000e+00> : vector<8x512xf32>
    %264 = tpu.matmul %263, %3, %cst_54 {dimension_numbers = #tpu.dot_dimension_numbers<[1], [0], [0], [1], [0, 0, 1, 1], [], []>} : vector<8x24xbf16>, vector<24x512xbf16>, vector<8x512xf32> -> vector<8x512xf32>
    %265 = arith.truncf %260 : vector<8x24xf32> to vector<8x24xbf16>
    %cst_55 = arith.constant dense<0.000000e+00> : vector<8x512xf32>
    %266 = tpu.matmul %265, %4, %cst_55 {dimension_numbers = #tpu.dot_dimension_numbers<[1], [0], [0], [1], [0, 0, 1, 1], [], []>} : vector<8x24xbf16>, vector<24x512xbf16>, vector<8x512xf32> -> vector<8x512xf32>
    %267 = arith.addf %264, %266 : vector<8x512xf32>
    %268 = vector.extract_strided_slice %267 {offsets = [0, 0], sizes = [8, 24], strides = [1, 1]} : vector<8x512xf32> to vector<8x24xf32>
    %269 = vector.broadcast %20 : vector<1x24xf32> to vector<8x24xf32>
    %270 = arith.addf %268, %269 : vector<8x24xf32>
    %271 = arith.negf %270 : vector<8x24xf32>
    %272 = math.exp %271 : vector<8x24xf32>
    %cst_56 = arith.constant 1.000000e+00 : f32
    %273 = vector.broadcast %cst_56 : f32 to vector<8x24xf32>
    %274 = arith.addf %273, %272 : vector<8x24xf32>
    %275 = arith.divf %273, %274 : vector<8x24xf32>
    %276 = vector.extract_strided_slice %267 {offsets = [0, 128], sizes = [8, 24], strides = [1, 1]} : vector<8x512xf32> to vector<8x24xf32>
    %277 = vector.broadcast %21 : vector<1x24xf32> to vector<8x24xf32>
    %278 = arith.addf %276, %277 : vector<8x24xf32>
    %279 = arith.negf %278 : vector<8x24xf32>
    %280 = math.exp %279 : vector<8x24xf32>
    %cst_57 = arith.constant 1.000000e+00 : f32
    %281 = vector.broadcast %cst_57 : f32 to vector<8x24xf32>
    %282 = arith.addf %281, %280 : vector<8x24xf32>
    %283 = arith.divf %281, %282 : vector<8x24xf32>
    %284 = vector.extract_strided_slice %267 {offsets = [0, 256], sizes = [8, 24], strides = [1, 1]} : vector<8x512xf32> to vector<8x24xf32>
    %285 = vector.broadcast %22 : vector<1x24xf32> to vector<8x24xf32>
    %286 = arith.addf %284, %285 : vector<8x24xf32>
    %287 = arith.negf %286 : vector<8x24xf32>
    %288 = math.exp %287 : vector<8x24xf32>
    %cst_58 = arith.constant 1.000000e+00 : f32
    %289 = vector.broadcast %cst_58 : f32 to vector<8x24xf32>
    %290 = arith.addf %289, %288 : vector<8x24xf32>
    %291 = arith.divf %289, %290 : vector<8x24xf32>
    %292 = vector.extract_strided_slice %267 {offsets = [0, 384], sizes = [8, 24], strides = [1, 1]} : vector<8x512xf32> to vector<8x24xf32>
    %293 = vector.broadcast %23 : vector<1x24xf32> to vector<8x24xf32>
    %294 = arith.addf %292, %293 : vector<8x24xf32>
    %295 = math.tanh %294 : vector<8x24xf32>
    %296 = arith.mulf %283, %258 : vector<8x24xf32>
    %297 = arith.mulf %275, %295 : vector<8x24xf32>
    %298 = arith.addf %296, %297 : vector<8x24xf32>
    %299 = math.tanh %298 : vector<8x24xf32>
    %300 = arith.mulf %291, %299 : vector<8x24xf32>
    %301 = tpu.concatenate %258, %298 in 1 : vector<8x24xf32>, vector<8x24xf32> -> vector<8x48xf32>
    %302 = arith.truncf %301 : vector<8x48xf32> to vector<8x48xbf16>
    %cst_59 = arith.constant dense<0.000000e+00> : vector<8x16xf32>
    %303 = tpu.matmul %302, %7, %cst_59 {dimension_numbers = #tpu.dot_dimension_numbers<[1], [0], [0], [1], [0, 0, 1, 1], [], []>} : vector<8x48xbf16>, vector<48x16xbf16>, vector<8x16xf32> -> vector<8x16xf32>
    %304 = vector.broadcast %25 : vector<1x16xf32> to vector<8x16xf32>
    %305 = arith.addf %303, %304 : vector<8x16xf32>
    %cst_60 = arith.constant 0.000000e+00 : f32
    %306 = vector.broadcast %cst_60 : f32 to vector<8x16xf32>
    %307 = arith.maximumf %305, %306 : vector<8x16xf32>
    %308 = arith.truncf %307 : vector<8x16xf32> to vector<8x16xbf16>
    %cst_61 = arith.constant dense<0.000000e+00> : vector<8x48xf32>
    %309 = tpu.matmul %308, %8, %cst_61 {dimension_numbers = #tpu.dot_dimension_numbers<[1], [0], [0], [1], [0, 0, 1, 1], [], []>} : vector<8x16xbf16>, vector<16x48xbf16>, vector<8x48xf32> -> vector<8x48xf32>
    %310 = vector.broadcast %26 : vector<1x48xf32> to vector<8x48xf32>
    %311 = arith.addf %309, %310 : vector<8x48xf32>
    %cst_62 = arith.constant dense<0xFF800000> : vector<8xf32>
    %312 = vector.multi_reduction <maximumf>, %311, %cst_62 [1] : vector<8x48xf32> to vector<8xf32>
    %313 = vector.shape_cast %312 : vector<8xf32> to vector<8x1xf32>
    %314 = vector.broadcast %313 : vector<8x1xf32> to vector<8x48xf32>
    %315 = arith.subf %311, %314 : vector<8x48xf32>
    %316 = math.exp %315 : vector<8x48xf32>
    %cst_63 = arith.constant dense<0.000000e+00> : vector<8xf32>
    %317 = vector.multi_reduction <add>, %316, %cst_63 [1] : vector<8x48xf32> to vector<8xf32>
    %318 = vector.shape_cast %317 : vector<8xf32> to vector<8x1xf32>
    %319 = tpu.reciprocal %318 {approx = true} : vector<8x1xf32> -> vector<8x1xf32>
    %320 = vector.broadcast %319 : vector<8x1xf32> to vector<8x48xf32>
    %321 = arith.mulf %316, %320 : vector<8x48xf32>
    %322 = arith.mulf %321, %301 : vector<8x48xf32>
    %323 = arith.truncf %322 : vector<8x48xf32> to vector<8x48xbf16>
    %cst_64 = arith.constant dense<0.000000e+00> : vector<8x16xf32>
    %324 = tpu.matmul %323, %9, %cst_64 {dimension_numbers = #tpu.dot_dimension_numbers<[1], [0], [0], [1], [0, 0, 1, 1], [], []>} : vector<8x48xbf16>, vector<48x16xbf16>, vector<8x16xf32> -> vector<8x16xf32>
    %325 = vector.broadcast %27 : vector<1x16xf32> to vector<8x16xf32>
    %326 = arith.addf %324, %325 : vector<8x16xf32>
    %cst_65 = arith.constant 0.000000e+00 : f32
    %327 = vector.broadcast %cst_65 : f32 to vector<8x16xf32>
    %328 = arith.maximumf %326, %327 : vector<8x16xf32>
    %329 = arith.truncf %328 : vector<8x16xf32> to vector<8x16xbf16>
    %cst_66 = arith.constant dense<0.000000e+00> : vector<8x8xf32>
    %330 = tpu.matmul %329, %10, %cst_66 {dimension_numbers = #tpu.dot_dimension_numbers<[1], [0], [0], [1], [0, 0, 1, 1], [], []>} : vector<8x16xbf16>, vector<16x8xbf16>, vector<8x8xf32> -> vector<8x8xf32>
    %331 = vector.broadcast %28 : vector<1x8xf32> to vector<8x8xf32>
    %332 = arith.addf %330, %331 : vector<8x8xf32>
    %333 = math.tanh %332 : vector<8x8xf32>
    %334 = vector.extract_strided_slice %11 {offsets = [0, 0], sizes = [48, 32], strides = [1, 1]} : vector<56x32xbf16> to vector<48x32xbf16>
    %cst_67 = arith.constant dense<0.000000e+00> : vector<8x32xf32>
    %335 = tpu.matmul %323, %334, %cst_67 {dimension_numbers = #tpu.dot_dimension_numbers<[1], [0], [0], [1], [0, 0, 1, 1], [], []>} : vector<8x48xbf16>, vector<48x32xbf16>, vector<8x32xf32> -> vector<8x32xf32>
    %336 = arith.truncf %259 : vector<8x8xf32> to vector<8x8xbf16>
    %337 = vector.extract_strided_slice %11 {offsets = [48, 0], sizes = [8, 32], strides = [1, 1]} : vector<56x32xbf16> to vector<8x32xbf16>
    %cst_68 = arith.constant dense<0.000000e+00> : vector<8x32xf32>
    %338 = tpu.matmul %336, %337, %cst_68 {dimension_numbers = #tpu.dot_dimension_numbers<[1], [0], [0], [1], [0, 0, 1, 1], [], []>} : vector<8x8xbf16>, vector<8x32xbf16>, vector<8x32xf32> -> vector<8x32xf32>
    %339 = arith.addf %335, %338 : vector<8x32xf32>
    %340 = vector.broadcast %29 : vector<1x32xf32> to vector<8x32xf32>
    %341 = arith.addf %339, %340 : vector<8x32xf32>
    %cst_69 = arith.constant 0.000000e+00 : f32
    %342 = vector.broadcast %cst_69 : f32 to vector<8x32xf32>
    %343 = arith.maximumf %341, %342 : vector<8x32xf32>
    %344 = arith.truncf %343 : vector<8x32xf32> to vector<8x32xbf16>
    %cst_70 = arith.constant dense<0.000000e+00> : vector<8x16xf32>
    %345 = tpu.matmul %344, %12, %cst_70 {dimension_numbers = #tpu.dot_dimension_numbers<[1], [0], [0], [1], [0, 0, 1, 1], [], []>} : vector<8x32xbf16>, vector<32x16xbf16>, vector<8x16xf32> -> vector<8x16xf32>
    %346 = vector.broadcast %30 : vector<1x16xf32> to vector<8x16xf32>
    %347 = arith.addf %345, %346 : vector<8x16xf32>
    %348 = arith.negf %347 : vector<8x16xf32>
    %349 = math.exp %348 : vector<8x16xf32>
    %cst_71 = arith.constant 1.000000e+00 : f32
    %350 = vector.broadcast %cst_71 : f32 to vector<8x16xf32>
    %351 = arith.addf %350, %349 : vector<8x16xf32>
    %352 = arith.divf %350, %351 : vector<8x16xf32>
    %353 = vector.extract_strided_slice %352 {offsets = [0, 0], sizes = [8, 8], strides = [1, 1]} : vector<8x16xf32> to vector<8x8xf32>
    %354 = arith.mulf %353, %259 : vector<8x8xf32>
    %355 = vector.extract_strided_slice %352 {offsets = [0, 8], sizes = [8, 8], strides = [1, 1]} : vector<8x16xf32> to vector<8x8xf32>
    %356 = arith.mulf %355, %333 : vector<8x8xf32>
    %357 = arith.addf %354, %356 : vector<8x8xf32>
    %c1_i32_72 = arith.constant 1 : i32
    %358 = arith.index_cast %c1_i32_72 : i32 to index
    %c0_73 = arith.constant 0 : index
    %c0_74 = arith.constant 0 : index
    %359 = vector.load %arg2[%358, %c0_73, %c0_74] : memref<6x8x24xbf16, #tpu.memory_space<vmem>>, vector<1x8x24xbf16>
    %360 = vector.shape_cast %359 : vector<1x8x24xbf16> to vector<8x24xbf16>
    %cst_75 = arith.constant dense<0.000000e+00> : vector<8x512xf32>
    %361 = tpu.matmul %360, %3, %cst_75 {dimension_numbers = #tpu.dot_dimension_numbers<[1], [0], [0], [1], [0, 0, 1, 1], [], []>} : vector<8x24xbf16>, vector<24x512xbf16>, vector<8x512xf32> -> vector<8x512xf32>
    %362 = arith.truncf %300 : vector<8x24xf32> to vector<8x24xbf16>
    %cst_76 = arith.constant dense<0.000000e+00> : vector<8x512xf32>
    %363 = tpu.matmul %362, %4, %cst_76 {dimension_numbers = #tpu.dot_dimension_numbers<[1], [0], [0], [1], [0, 0, 1, 1], [], []>} : vector<8x24xbf16>, vector<24x512xbf16>, vector<8x512xf32> -> vector<8x512xf32>
    %364 = arith.addf %361, %363 : vector<8x512xf32>
    %365 = vector.extract_strided_slice %364 {offsets = [0, 0], sizes = [8, 24], strides = [1, 1]} : vector<8x512xf32> to vector<8x24xf32>
    %366 = vector.broadcast %20 : vector<1x24xf32> to vector<8x24xf32>
    %367 = arith.addf %365, %366 : vector<8x24xf32>
    %368 = arith.negf %367 : vector<8x24xf32>
    %369 = math.exp %368 : vector<8x24xf32>
    %cst_77 = arith.constant 1.000000e+00 : f32
    %370 = vector.broadcast %cst_77 : f32 to vector<8x24xf32>
    %371 = arith.addf %370, %369 : vector<8x24xf32>
    %372 = arith.divf %370, %371 : vector<8x24xf32>
    %373 = vector.extract_strided_slice %364 {offsets = [0, 128], sizes = [8, 24], strides = [1, 1]} : vector<8x512xf32> to vector<8x24xf32>
    %374 = vector.broadcast %21 : vector<1x24xf32> to vector<8x24xf32>
    %375 = arith.addf %373, %374 : vector<8x24xf32>
    %376 = arith.negf %375 : vector<8x24xf32>
    %377 = math.exp %376 : vector<8x24xf32>
    %cst_78 = arith.constant 1.000000e+00 : f32
    %378 = vector.broadcast %cst_78 : f32 to vector<8x24xf32>
    %379 = arith.addf %378, %377 : vector<8x24xf32>
    %380 = arith.divf %378, %379 : vector<8x24xf32>
    %381 = vector.extract_strided_slice %364 {offsets = [0, 256], sizes = [8, 24], strides = [1, 1]} : vector<8x512xf32> to vector<8x24xf32>
    %382 = vector.broadcast %22 : vector<1x24xf32> to vector<8x24xf32>
    %383 = arith.addf %381, %382 : vector<8x24xf32>
    %384 = arith.negf %383 : vector<8x24xf32>
    %385 = math.exp %384 : vector<8x24xf32>
    %cst_79 = arith.constant 1.000000e+00 : f32
    %386 = vector.broadcast %cst_79 : f32 to vector<8x24xf32>
    %387 = arith.addf %386, %385 : vector<8x24xf32>
    %388 = arith.divf %386, %387 : vector<8x24xf32>
    %389 = vector.extract_strided_slice %364 {offsets = [0, 384], sizes = [8, 24], strides = [1, 1]} : vector<8x512xf32> to vector<8x24xf32>
    %390 = vector.broadcast %23 : vector<1x24xf32> to vector<8x24xf32>
    %391 = arith.addf %389, %390 : vector<8x24xf32>
    %392 = math.tanh %391 : vector<8x24xf32>
    %393 = arith.mulf %380, %298 : vector<8x24xf32>
    %394 = arith.mulf %372, %392 : vector<8x24xf32>
    %395 = arith.addf %393, %394 : vector<8x24xf32>
    %396 = math.tanh %395 : vector<8x24xf32>
    %397 = arith.mulf %388, %396 : vector<8x24xf32>
    %398 = tpu.concatenate %298, %395 in 1 : vector<8x24xf32>, vector<8x24xf32> -> vector<8x48xf32>
    %399 = arith.truncf %398 : vector<8x48xf32> to vector<8x48xbf16>
    %cst_80 = arith.constant dense<0.000000e+00> : vector<8x16xf32>
    %400 = tpu.matmul %399, %7, %cst_80 {dimension_numbers = #tpu.dot_dimension_numbers<[1], [0], [0], [1], [0, 0, 1, 1], [], []>} : vector<8x48xbf16>, vector<48x16xbf16>, vector<8x16xf32> -> vector<8x16xf32>
    %401 = vector.broadcast %25 : vector<1x16xf32> to vector<8x16xf32>
    %402 = arith.addf %400, %401 : vector<8x16xf32>
    %cst_81 = arith.constant 0.000000e+00 : f32
    %403 = vector.broadcast %cst_81 : f32 to vector<8x16xf32>
    %404 = arith.maximumf %402, %403 : vector<8x16xf32>
    %405 = arith.truncf %404 : vector<8x16xf32> to vector<8x16xbf16>
    %cst_82 = arith.constant dense<0.000000e+00> : vector<8x48xf32>
    %406 = tpu.matmul %405, %8, %cst_82 {dimension_numbers = #tpu.dot_dimension_numbers<[1], [0], [0], [1], [0, 0, 1, 1], [], []>} : vector<8x16xbf16>, vector<16x48xbf16>, vector<8x48xf32> -> vector<8x48xf32>
    %407 = vector.broadcast %26 : vector<1x48xf32> to vector<8x48xf32>
    %408 = arith.addf %406, %407 : vector<8x48xf32>
    %cst_83 = arith.constant dense<0xFF800000> : vector<8xf32>
    %409 = vector.multi_reduction <maximumf>, %408, %cst_83 [1] : vector<8x48xf32> to vector<8xf32>
    %410 = vector.shape_cast %409 : vector<8xf32> to vector<8x1xf32>
    %411 = vector.broadcast %410 : vector<8x1xf32> to vector<8x48xf32>
    %412 = arith.subf %408, %411 : vector<8x48xf32>
    %413 = math.exp %412 : vector<8x48xf32>
    %cst_84 = arith.constant dense<0.000000e+00> : vector<8xf32>
    %414 = vector.multi_reduction <add>, %413, %cst_84 [1] : vector<8x48xf32> to vector<8xf32>
    %415 = vector.shape_cast %414 : vector<8xf32> to vector<8x1xf32>
    %416 = tpu.reciprocal %415 {approx = true} : vector<8x1xf32> -> vector<8x1xf32>
    %417 = vector.broadcast %416 : vector<8x1xf32> to vector<8x48xf32>
    %418 = arith.mulf %413, %417 : vector<8x48xf32>
    %419 = arith.mulf %418, %398 : vector<8x48xf32>
    %420 = arith.truncf %419 : vector<8x48xf32> to vector<8x48xbf16>
    %cst_85 = arith.constant dense<0.000000e+00> : vector<8x16xf32>
    %421 = tpu.matmul %420, %9, %cst_85 {dimension_numbers = #tpu.dot_dimension_numbers<[1], [0], [0], [1], [0, 0, 1, 1], [], []>} : vector<8x48xbf16>, vector<48x16xbf16>, vector<8x16xf32> -> vector<8x16xf32>
    %422 = vector.broadcast %27 : vector<1x16xf32> to vector<8x16xf32>
    %423 = arith.addf %421, %422 : vector<8x16xf32>
    %cst_86 = arith.constant 0.000000e+00 : f32
    %424 = vector.broadcast %cst_86 : f32 to vector<8x16xf32>
    %425 = arith.maximumf %423, %424 : vector<8x16xf32>
    %426 = arith.truncf %425 : vector<8x16xf32> to vector<8x16xbf16>
    %cst_87 = arith.constant dense<0.000000e+00> : vector<8x8xf32>
    %427 = tpu.matmul %426, %10, %cst_87 {dimension_numbers = #tpu.dot_dimension_numbers<[1], [0], [0], [1], [0, 0, 1, 1], [], []>} : vector<8x16xbf16>, vector<16x8xbf16>, vector<8x8xf32> -> vector<8x8xf32>
    %428 = vector.broadcast %28 : vector<1x8xf32> to vector<8x8xf32>
    %429 = arith.addf %427, %428 : vector<8x8xf32>
    %430 = math.tanh %429 : vector<8x8xf32>
    %431 = vector.extract_strided_slice %11 {offsets = [0, 0], sizes = [48, 32], strides = [1, 1]} : vector<56x32xbf16> to vector<48x32xbf16>
    %cst_88 = arith.constant dense<0.000000e+00> : vector<8x32xf32>
    %432 = tpu.matmul %420, %431, %cst_88 {dimension_numbers = #tpu.dot_dimension_numbers<[1], [0], [0], [1], [0, 0, 1, 1], [], []>} : vector<8x48xbf16>, vector<48x32xbf16>, vector<8x32xf32> -> vector<8x32xf32>
    %433 = arith.truncf %357 : vector<8x8xf32> to vector<8x8xbf16>
    %434 = vector.extract_strided_slice %11 {offsets = [48, 0], sizes = [8, 32], strides = [1, 1]} : vector<56x32xbf16> to vector<8x32xbf16>
    %cst_89 = arith.constant dense<0.000000e+00> : vector<8x32xf32>
    %435 = tpu.matmul %433, %434, %cst_89 {dimension_numbers = #tpu.dot_dimension_numbers<[1], [0], [0], [1], [0, 0, 1, 1], [], []>} : vector<8x8xbf16>, vector<8x32xbf16>, vector<8x32xf32> -> vector<8x32xf32>
    %436 = arith.addf %432, %435 : vector<8x32xf32>
    %437 = vector.broadcast %29 : vector<1x32xf32> to vector<8x32xf32>
    %438 = arith.addf %436, %437 : vector<8x32xf32>
    %cst_90 = arith.constant 0.000000e+00 : f32
    %439 = vector.broadcast %cst_90 : f32 to vector<8x32xf32>
    %440 = arith.maximumf %438, %439 : vector<8x32xf32>
    %441 = arith.truncf %440 : vector<8x32xf32> to vector<8x32xbf16>
    %cst_91 = arith.constant dense<0.000000e+00> : vector<8x16xf32>
    %442 = tpu.matmul %441, %12, %cst_91 {dimension_numbers = #tpu.dot_dimension_numbers<[1], [0], [0], [1], [0, 0, 1, 1], [], []>} : vector<8x32xbf16>, vector<32x16xbf16>, vector<8x16xf32> -> vector<8x16xf32>
    %443 = vector.broadcast %30 : vector<1x16xf32> to vector<8x16xf32>
    %444 = arith.addf %442, %443 : vector<8x16xf32>
    %445 = arith.negf %444 : vector<8x16xf32>
    %446 = math.exp %445 : vector<8x16xf32>
    %cst_92 = arith.constant 1.000000e+00 : f32
    %447 = vector.broadcast %cst_92 : f32 to vector<8x16xf32>
    %448 = arith.addf %447, %446 : vector<8x16xf32>
    %449 = arith.divf %447, %448 : vector<8x16xf32>
    %450 = vector.extract_strided_slice %449 {offsets = [0, 0], sizes = [8, 8], strides = [1, 1]} : vector<8x16xf32> to vector<8x8xf32>
    %451 = arith.mulf %450, %357 : vector<8x8xf32>
    %452 = vector.extract_strided_slice %449 {offsets = [0, 8], sizes = [8, 8], strides = [1, 1]} : vector<8x16xf32> to vector<8x8xf32>
    %453 = arith.mulf %452, %430 : vector<8x8xf32>
    %454 = arith.addf %451, %453 : vector<8x8xf32>
    %c2_i32_93 = arith.constant 2 : i32
    %455 = arith.index_cast %c2_i32_93 : i32 to index
    %c0_94 = arith.constant 0 : index
    %c0_95 = arith.constant 0 : index
    %456 = vector.load %arg2[%455, %c0_94, %c0_95] : memref<6x8x24xbf16, #tpu.memory_space<vmem>>, vector<1x8x24xbf16>
    %457 = vector.shape_cast %456 : vector<1x8x24xbf16> to vector<8x24xbf16>
    %cst_96 = arith.constant dense<0.000000e+00> : vector<8x512xf32>
    %458 = tpu.matmul %457, %3, %cst_96 {dimension_numbers = #tpu.dot_dimension_numbers<[1], [0], [0], [1], [0, 0, 1, 1], [], []>} : vector<8x24xbf16>, vector<24x512xbf16>, vector<8x512xf32> -> vector<8x512xf32>
    %459 = arith.truncf %397 : vector<8x24xf32> to vector<8x24xbf16>
    %cst_97 = arith.constant dense<0.000000e+00> : vector<8x512xf32>
    %460 = tpu.matmul %459, %4, %cst_97 {dimension_numbers = #tpu.dot_dimension_numbers<[1], [0], [0], [1], [0, 0, 1, 1], [], []>} : vector<8x24xbf16>, vector<24x512xbf16>, vector<8x512xf32> -> vector<8x512xf32>
    %461 = arith.addf %458, %460 : vector<8x512xf32>
    %462 = vector.extract_strided_slice %461 {offsets = [0, 0], sizes = [8, 24], strides = [1, 1]} : vector<8x512xf32> to vector<8x24xf32>
    %463 = vector.broadcast %20 : vector<1x24xf32> to vector<8x24xf32>
    %464 = arith.addf %462, %463 : vector<8x24xf32>
    %465 = arith.negf %464 : vector<8x24xf32>
    %466 = math.exp %465 : vector<8x24xf32>
    %cst_98 = arith.constant 1.000000e+00 : f32
    %467 = vector.broadcast %cst_98 : f32 to vector<8x24xf32>
    %468 = arith.addf %467, %466 : vector<8x24xf32>
    %469 = arith.divf %467, %468 : vector<8x24xf32>
    %470 = vector.extract_strided_slice %461 {offsets = [0, 128], sizes = [8, 24], strides = [1, 1]} : vector<8x512xf32> to vector<8x24xf32>
    %471 = vector.broadcast %21 : vector<1x24xf32> to vector<8x24xf32>
    %472 = arith.addf %470, %471 : vector<8x24xf32>
    %473 = arith.negf %472 : vector<8x24xf32>
    %474 = math.exp %473 : vector<8x24xf32>
    %cst_99 = arith.constant 1.000000e+00 : f32
    %475 = vector.broadcast %cst_99 : f32 to vector<8x24xf32>
    %476 = arith.addf %475, %474 : vector<8x24xf32>
    %477 = arith.divf %475, %476 : vector<8x24xf32>
    %478 = vector.extract_strided_slice %461 {offsets = [0, 256], sizes = [8, 24], strides = [1, 1]} : vector<8x512xf32> to vector<8x24xf32>
    %479 = vector.broadcast %22 : vector<1x24xf32> to vector<8x24xf32>
    %480 = arith.addf %478, %479 : vector<8x24xf32>
    %481 = arith.negf %480 : vector<8x24xf32>
    %482 = math.exp %481 : vector<8x24xf32>
    %cst_100 = arith.constant 1.000000e+00 : f32
    %483 = vector.broadcast %cst_100 : f32 to vector<8x24xf32>
    %484 = arith.addf %483, %482 : vector<8x24xf32>
    %485 = arith.divf %483, %484 : vector<8x24xf32>
    %486 = vector.extract_strided_slice %461 {offsets = [0, 384], sizes = [8, 24], strides = [1, 1]} : vector<8x512xf32> to vector<8x24xf32>
    %487 = vector.broadcast %23 : vector<1x24xf32> to vector<8x24xf32>
    %488 = arith.addf %486, %487 : vector<8x24xf32>
    %489 = math.tanh %488 : vector<8x24xf32>
    %490 = arith.mulf %477, %395 : vector<8x24xf32>
    %491 = arith.mulf %469, %489 : vector<8x24xf32>
    %492 = arith.addf %490, %491 : vector<8x24xf32>
    %493 = math.tanh %492 : vector<8x24xf32>
    %494 = arith.mulf %485, %493 : vector<8x24xf32>
    %495 = tpu.concatenate %395, %492 in 1 : vector<8x24xf32>, vector<8x24xf32> -> vector<8x48xf32>
    %496 = arith.truncf %495 : vector<8x48xf32> to vector<8x48xbf16>
    %cst_101 = arith.constant dense<0.000000e+00> : vector<8x16xf32>
    %497 = tpu.matmul %496, %7, %cst_101 {dimension_numbers = #tpu.dot_dimension_numbers<[1], [0], [0], [1], [0, 0, 1, 1], [], []>} : vector<8x48xbf16>, vector<48x16xbf16>, vector<8x16xf32> -> vector<8x16xf32>
    %498 = vector.broadcast %25 : vector<1x16xf32> to vector<8x16xf32>
    %499 = arith.addf %497, %498 : vector<8x16xf32>
    %cst_102 = arith.constant 0.000000e+00 : f32
    %500 = vector.broadcast %cst_102 : f32 to vector<8x16xf32>
    %501 = arith.maximumf %499, %500 : vector<8x16xf32>
    %502 = arith.truncf %501 : vector<8x16xf32> to vector<8x16xbf16>
    %cst_103 = arith.constant dense<0.000000e+00> : vector<8x48xf32>
    %503 = tpu.matmul %502, %8, %cst_103 {dimension_numbers = #tpu.dot_dimension_numbers<[1], [0], [0], [1], [0, 0, 1, 1], [], []>} : vector<8x16xbf16>, vector<16x48xbf16>, vector<8x48xf32> -> vector<8x48xf32>
    %504 = vector.broadcast %26 : vector<1x48xf32> to vector<8x48xf32>
    %505 = arith.addf %503, %504 : vector<8x48xf32>
    %cst_104 = arith.constant dense<0xFF800000> : vector<8xf32>
    %506 = vector.multi_reduction <maximumf>, %505, %cst_104 [1] : vector<8x48xf32> to vector<8xf32>
    %507 = vector.shape_cast %506 : vector<8xf32> to vector<8x1xf32>
    %508 = vector.broadcast %507 : vector<8x1xf32> to vector<8x48xf32>
    %509 = arith.subf %505, %508 : vector<8x48xf32>
    %510 = math.exp %509 : vector<8x48xf32>
    %cst_105 = arith.constant dense<0.000000e+00> : vector<8xf32>
    %511 = vector.multi_reduction <add>, %510, %cst_105 [1] : vector<8x48xf32> to vector<8xf32>
    %512 = vector.shape_cast %511 : vector<8xf32> to vector<8x1xf32>
    %513 = tpu.reciprocal %512 {approx = true} : vector<8x1xf32> -> vector<8x1xf32>
    %514 = vector.broadcast %513 : vector<8x1xf32> to vector<8x48xf32>
    %515 = arith.mulf %510, %514 : vector<8x48xf32>
    %516 = arith.mulf %515, %495 : vector<8x48xf32>
    %517 = arith.truncf %516 : vector<8x48xf32> to vector<8x48xbf16>
    %cst_106 = arith.constant dense<0.000000e+00> : vector<8x16xf32>
    %518 = tpu.matmul %517, %9, %cst_106 {dimension_numbers = #tpu.dot_dimension_numbers<[1], [0], [0], [1], [0, 0, 1, 1], [], []>} : vector<8x48xbf16>, vector<48x16xbf16>, vector<8x16xf32> -> vector<8x16xf32>
    %519 = vector.broadcast %27 : vector<1x16xf32> to vector<8x16xf32>
    %520 = arith.addf %518, %519 : vector<8x16xf32>
    %cst_107 = arith.constant 0.000000e+00 : f32
    %521 = vector.broadcast %cst_107 : f32 to vector<8x16xf32>
    %522 = arith.maximumf %520, %521 : vector<8x16xf32>
    %523 = arith.truncf %522 : vector<8x16xf32> to vector<8x16xbf16>
    %cst_108 = arith.constant dense<0.000000e+00> : vector<8x8xf32>
    %524 = tpu.matmul %523, %10, %cst_108 {dimension_numbers = #tpu.dot_dimension_numbers<[1], [0], [0], [1], [0, 0, 1, 1], [], []>} : vector<8x16xbf16>, vector<16x8xbf16>, vector<8x8xf32> -> vector<8x8xf32>
    %525 = vector.broadcast %28 : vector<1x8xf32> to vector<8x8xf32>
    %526 = arith.addf %524, %525 : vector<8x8xf32>
    %527 = math.tanh %526 : vector<8x8xf32>
    %528 = vector.extract_strided_slice %11 {offsets = [0, 0], sizes = [48, 32], strides = [1, 1]} : vector<56x32xbf16> to vector<48x32xbf16>
    %cst_109 = arith.constant dense<0.000000e+00> : vector<8x32xf32>
    %529 = tpu.matmul %517, %528, %cst_109 {dimension_numbers = #tpu.dot_dimension_numbers<[1], [0], [0], [1], [0, 0, 1, 1], [], []>} : vector<8x48xbf16>, vector<48x32xbf16>, vector<8x32xf32> -> vector<8x32xf32>
    %530 = arith.truncf %454 : vector<8x8xf32> to vector<8x8xbf16>
    %531 = vector.extract_strided_slice %11 {offsets = [48, 0], sizes = [8, 32], strides = [1, 1]} : vector<56x32xbf16> to vector<8x32xbf16>
    %cst_110 = arith.constant dense<0.000000e+00> : vector<8x32xf32>
    %532 = tpu.matmul %530, %531, %cst_110 {dimension_numbers = #tpu.dot_dimension_numbers<[1], [0], [0], [1], [0, 0, 1, 1], [], []>} : vector<8x8xbf16>, vector<8x32xbf16>, vector<8x32xf32> -> vector<8x32xf32>
    %533 = arith.addf %529, %532 : vector<8x32xf32>
    %534 = vector.broadcast %29 : vector<1x32xf32> to vector<8x32xf32>
    %535 = arith.addf %533, %534 : vector<8x32xf32>
    %cst_111 = arith.constant 0.000000e+00 : f32
    %536 = vector.broadcast %cst_111 : f32 to vector<8x32xf32>
    %537 = arith.maximumf %535, %536 : vector<8x32xf32>
    %538 = arith.truncf %537 : vector<8x32xf32> to vector<8x32xbf16>
    %cst_112 = arith.constant dense<0.000000e+00> : vector<8x16xf32>
    %539 = tpu.matmul %538, %12, %cst_112 {dimension_numbers = #tpu.dot_dimension_numbers<[1], [0], [0], [1], [0, 0, 1, 1], [], []>} : vector<8x32xbf16>, vector<32x16xbf16>, vector<8x16xf32> -> vector<8x16xf32>
    %540 = vector.broadcast %30 : vector<1x16xf32> to vector<8x16xf32>
    %541 = arith.addf %539, %540 : vector<8x16xf32>
    %542 = arith.negf %541 : vector<8x16xf32>
    %543 = math.exp %542 : vector<8x16xf32>
    %cst_113 = arith.constant 1.000000e+00 : f32
    %544 = vector.broadcast %cst_113 : f32 to vector<8x16xf32>
    %545 = arith.addf %544, %543 : vector<8x16xf32>
    %546 = arith.divf %544, %545 : vector<8x16xf32>
    %547 = vector.extract_strided_slice %546 {offsets = [0, 0], sizes = [8, 8], strides = [1, 1]} : vector<8x16xf32> to vector<8x8xf32>
    %548 = arith.mulf %547, %454 : vector<8x8xf32>
    %549 = vector.extract_strided_slice %546 {offsets = [0, 8], sizes = [8, 8], strides = [1, 1]} : vector<8x16xf32> to vector<8x8xf32>
    %550 = arith.mulf %549, %527 : vector<8x8xf32>
    %551 = arith.addf %548, %550 : vector<8x8xf32>
    %c3_i32_114 = arith.constant 3 : i32
    %552 = arith.index_cast %c3_i32_114 : i32 to index
    %c0_115 = arith.constant 0 : index
    %c0_116 = arith.constant 0 : index
    %553 = vector.load %arg2[%552, %c0_115, %c0_116] : memref<6x8x24xbf16, #tpu.memory_space<vmem>>, vector<1x8x24xbf16>
    %554 = vector.shape_cast %553 : vector<1x8x24xbf16> to vector<8x24xbf16>
    %cst_117 = arith.constant dense<0.000000e+00> : vector<8x512xf32>
    %555 = tpu.matmul %554, %3, %cst_117 {dimension_numbers = #tpu.dot_dimension_numbers<[1], [0], [0], [1], [0, 0, 1, 1], [], []>} : vector<8x24xbf16>, vector<24x512xbf16>, vector<8x512xf32> -> vector<8x512xf32>
    %556 = arith.truncf %494 : vector<8x24xf32> to vector<8x24xbf16>
    %cst_118 = arith.constant dense<0.000000e+00> : vector<8x512xf32>
    %557 = tpu.matmul %556, %4, %cst_118 {dimension_numbers = #tpu.dot_dimension_numbers<[1], [0], [0], [1], [0, 0, 1, 1], [], []>} : vector<8x24xbf16>, vector<24x512xbf16>, vector<8x512xf32> -> vector<8x512xf32>
    %558 = arith.addf %555, %557 : vector<8x512xf32>
    %559 = vector.extract_strided_slice %558 {offsets = [0, 0], sizes = [8, 24], strides = [1, 1]} : vector<8x512xf32> to vector<8x24xf32>
    %560 = vector.broadcast %20 : vector<1x24xf32> to vector<8x24xf32>
    %561 = arith.addf %559, %560 : vector<8x24xf32>
    %562 = arith.negf %561 : vector<8x24xf32>
    %563 = math.exp %562 : vector<8x24xf32>
    %cst_119 = arith.constant 1.000000e+00 : f32
    %564 = vector.broadcast %cst_119 : f32 to vector<8x24xf32>
    %565 = arith.addf %564, %563 : vector<8x24xf32>
    %566 = arith.divf %564, %565 : vector<8x24xf32>
    %567 = vector.extract_strided_slice %558 {offsets = [0, 128], sizes = [8, 24], strides = [1, 1]} : vector<8x512xf32> to vector<8x24xf32>
    %568 = vector.broadcast %21 : vector<1x24xf32> to vector<8x24xf32>
    %569 = arith.addf %567, %568 : vector<8x24xf32>
    %570 = arith.negf %569 : vector<8x24xf32>
    %571 = math.exp %570 : vector<8x24xf32>
    %cst_120 = arith.constant 1.000000e+00 : f32
    %572 = vector.broadcast %cst_120 : f32 to vector<8x24xf32>
    %573 = arith.addf %572, %571 : vector<8x24xf32>
    %574 = arith.divf %572, %573 : vector<8x24xf32>
    %575 = vector.extract_strided_slice %558 {offsets = [0, 256], sizes = [8, 24], strides = [1, 1]} : vector<8x512xf32> to vector<8x24xf32>
    %576 = vector.broadcast %22 : vector<1x24xf32> to vector<8x24xf32>
    %577 = arith.addf %575, %576 : vector<8x24xf32>
    %578 = arith.negf %577 : vector<8x24xf32>
    %579 = math.exp %578 : vector<8x24xf32>
    %cst_121 = arith.constant 1.000000e+00 : f32
    %580 = vector.broadcast %cst_121 : f32 to vector<8x24xf32>
    %581 = arith.addf %580, %579 : vector<8x24xf32>
    %582 = arith.divf %580, %581 : vector<8x24xf32>
    %583 = vector.extract_strided_slice %558 {offsets = [0, 384], sizes = [8, 24], strides = [1, 1]} : vector<8x512xf32> to vector<8x24xf32>
    %584 = vector.broadcast %23 : vector<1x24xf32> to vector<8x24xf32>
    %585 = arith.addf %583, %584 : vector<8x24xf32>
    %586 = math.tanh %585 : vector<8x24xf32>
    %587 = arith.mulf %574, %492 : vector<8x24xf32>
    %588 = arith.mulf %566, %586 : vector<8x24xf32>
    %589 = arith.addf %587, %588 : vector<8x24xf32>
    %590 = math.tanh %589 : vector<8x24xf32>
    %591 = arith.mulf %582, %590 : vector<8x24xf32>
    %592 = tpu.concatenate %492, %589 in 1 : vector<8x24xf32>, vector<8x24xf32> -> vector<8x48xf32>
    %593 = arith.truncf %592 : vector<8x48xf32> to vector<8x48xbf16>
    %cst_122 = arith.constant dense<0.000000e+00> : vector<8x16xf32>
    %594 = tpu.matmul %593, %7, %cst_122 {dimension_numbers = #tpu.dot_dimension_numbers<[1], [0], [0], [1], [0, 0, 1, 1], [], []>} : vector<8x48xbf16>, vector<48x16xbf16>, vector<8x16xf32> -> vector<8x16xf32>
    %595 = vector.broadcast %25 : vector<1x16xf32> to vector<8x16xf32>
    %596 = arith.addf %594, %595 : vector<8x16xf32>
    %cst_123 = arith.constant 0.000000e+00 : f32
    %597 = vector.broadcast %cst_123 : f32 to vector<8x16xf32>
    %598 = arith.maximumf %596, %597 : vector<8x16xf32>
    %599 = arith.truncf %598 : vector<8x16xf32> to vector<8x16xbf16>
    %cst_124 = arith.constant dense<0.000000e+00> : vector<8x48xf32>
    %600 = tpu.matmul %599, %8, %cst_124 {dimension_numbers = #tpu.dot_dimension_numbers<[1], [0], [0], [1], [0, 0, 1, 1], [], []>} : vector<8x16xbf16>, vector<16x48xbf16>, vector<8x48xf32> -> vector<8x48xf32>
    %601 = vector.broadcast %26 : vector<1x48xf32> to vector<8x48xf32>
    %602 = arith.addf %600, %601 : vector<8x48xf32>
    %cst_125 = arith.constant dense<0xFF800000> : vector<8xf32>
    %603 = vector.multi_reduction <maximumf>, %602, %cst_125 [1] : vector<8x48xf32> to vector<8xf32>
    %604 = vector.shape_cast %603 : vector<8xf32> to vector<8x1xf32>
    %605 = vector.broadcast %604 : vector<8x1xf32> to vector<8x48xf32>
    %606 = arith.subf %602, %605 : vector<8x48xf32>
    %607 = math.exp %606 : vector<8x48xf32>
    %cst_126 = arith.constant dense<0.000000e+00> : vector<8xf32>
    %608 = vector.multi_reduction <add>, %607, %cst_126 [1] : vector<8x48xf32> to vector<8xf32>
    %609 = vector.shape_cast %608 : vector<8xf32> to vector<8x1xf32>
    %610 = tpu.reciprocal %609 {approx = true} : vector<8x1xf32> -> vector<8x1xf32>
    %611 = vector.broadcast %610 : vector<8x1xf32> to vector<8x48xf32>
    %612 = arith.mulf %607, %611 : vector<8x48xf32>
    %613 = arith.mulf %612, %592 : vector<8x48xf32>
    %614 = arith.truncf %613 : vector<8x48xf32> to vector<8x48xbf16>
    %cst_127 = arith.constant dense<0.000000e+00> : vector<8x16xf32>
    %615 = tpu.matmul %614, %9, %cst_127 {dimension_numbers = #tpu.dot_dimension_numbers<[1], [0], [0], [1], [0, 0, 1, 1], [], []>} : vector<8x48xbf16>, vector<48x16xbf16>, vector<8x16xf32> -> vector<8x16xf32>
    %616 = vector.broadcast %27 : vector<1x16xf32> to vector<8x16xf32>
    %617 = arith.addf %615, %616 : vector<8x16xf32>
    %cst_128 = arith.constant 0.000000e+00 : f32
    %618 = vector.broadcast %cst_128 : f32 to vector<8x16xf32>
    %619 = arith.maximumf %617, %618 : vector<8x16xf32>
    %620 = arith.truncf %619 : vector<8x16xf32> to vector<8x16xbf16>
    %cst_129 = arith.constant dense<0.000000e+00> : vector<8x8xf32>
    %621 = tpu.matmul %620, %10, %cst_129 {dimension_numbers = #tpu.dot_dimension_numbers<[1], [0], [0], [1], [0, 0, 1, 1], [], []>} : vector<8x16xbf16>, vector<16x8xbf16>, vector<8x8xf32> -> vector<8x8xf32>
    %622 = vector.broadcast %28 : vector<1x8xf32> to vector<8x8xf32>
    %623 = arith.addf %621, %622 : vector<8x8xf32>
    %624 = math.tanh %623 : vector<8x8xf32>
    %625 = vector.extract_strided_slice %11 {offsets = [0, 0], sizes = [48, 32], strides = [1, 1]} : vector<56x32xbf16> to vector<48x32xbf16>
    %cst_130 = arith.constant dense<0.000000e+00> : vector<8x32xf32>
    %626 = tpu.matmul %614, %625, %cst_130 {dimension_numbers = #tpu.dot_dimension_numbers<[1], [0], [0], [1], [0, 0, 1, 1], [], []>} : vector<8x48xbf16>, vector<48x32xbf16>, vector<8x32xf32> -> vector<8x32xf32>
    %627 = arith.truncf %551 : vector<8x8xf32> to vector<8x8xbf16>
    %628 = vector.extract_strided_slice %11 {offsets = [48, 0], sizes = [8, 32], strides = [1, 1]} : vector<56x32xbf16> to vector<8x32xbf16>
    %cst_131 = arith.constant dense<0.000000e+00> : vector<8x32xf32>
    %629 = tpu.matmul %627, %628, %cst_131 {dimension_numbers = #tpu.dot_dimension_numbers<[1], [0], [0], [1], [0, 0, 1, 1], [], []>} : vector<8x8xbf16>, vector<8x32xbf16>, vector<8x32xf32> -> vector<8x32xf32>
    %630 = arith.addf %626, %629 : vector<8x32xf32>
    %631 = vector.broadcast %29 : vector<1x32xf32> to vector<8x32xf32>
    %632 = arith.addf %630, %631 : vector<8x32xf32>
    %cst_132 = arith.constant 0.000000e+00 : f32
    %633 = vector.broadcast %cst_132 : f32 to vector<8x32xf32>
    %634 = arith.maximumf %632, %633 : vector<8x32xf32>
    %635 = arith.truncf %634 : vector<8x32xf32> to vector<8x32xbf16>
    %cst_133 = arith.constant dense<0.000000e+00> : vector<8x16xf32>
    %636 = tpu.matmul %635, %12, %cst_133 {dimension_numbers = #tpu.dot_dimension_numbers<[1], [0], [0], [1], [0, 0, 1, 1], [], []>} : vector<8x32xbf16>, vector<32x16xbf16>, vector<8x16xf32> -> vector<8x16xf32>
    %637 = vector.broadcast %30 : vector<1x16xf32> to vector<8x16xf32>
    %638 = arith.addf %636, %637 : vector<8x16xf32>
    %639 = arith.negf %638 : vector<8x16xf32>
    %640 = math.exp %639 : vector<8x16xf32>
    %cst_134 = arith.constant 1.000000e+00 : f32
    %641 = vector.broadcast %cst_134 : f32 to vector<8x16xf32>
    %642 = arith.addf %641, %640 : vector<8x16xf32>
    %643 = arith.divf %641, %642 : vector<8x16xf32>
    %644 = vector.extract_strided_slice %643 {offsets = [0, 0], sizes = [8, 8], strides = [1, 1]} : vector<8x16xf32> to vector<8x8xf32>
    %645 = arith.mulf %644, %551 : vector<8x8xf32>
    %646 = vector.extract_strided_slice %643 {offsets = [0, 8], sizes = [8, 8], strides = [1, 1]} : vector<8x16xf32> to vector<8x8xf32>
    %647 = arith.mulf %646, %624 : vector<8x8xf32>
    %648 = arith.addf %645, %647 : vector<8x8xf32>
    %c4_i32_135 = arith.constant 4 : i32
    %649 = arith.index_cast %c4_i32_135 : i32 to index
    %c0_136 = arith.constant 0 : index
    %c0_137 = arith.constant 0 : index
    %650 = vector.load %arg2[%649, %c0_136, %c0_137] : memref<6x8x24xbf16, #tpu.memory_space<vmem>>, vector<1x8x24xbf16>
    %651 = vector.shape_cast %650 : vector<1x8x24xbf16> to vector<8x24xbf16>
    %cst_138 = arith.constant dense<0.000000e+00> : vector<8x512xf32>
    %652 = tpu.matmul %651, %3, %cst_138 {dimension_numbers = #tpu.dot_dimension_numbers<[1], [0], [0], [1], [0, 0, 1, 1], [], []>} : vector<8x24xbf16>, vector<24x512xbf16>, vector<8x512xf32> -> vector<8x512xf32>
    %653 = arith.truncf %591 : vector<8x24xf32> to vector<8x24xbf16>
    %cst_139 = arith.constant dense<0.000000e+00> : vector<8x512xf32>
    %654 = tpu.matmul %653, %4, %cst_139 {dimension_numbers = #tpu.dot_dimension_numbers<[1], [0], [0], [1], [0, 0, 1, 1], [], []>} : vector<8x24xbf16>, vector<24x512xbf16>, vector<8x512xf32> -> vector<8x512xf32>
    %655 = arith.addf %652, %654 : vector<8x512xf32>
    %656 = vector.extract_strided_slice %655 {offsets = [0, 0], sizes = [8, 24], strides = [1, 1]} : vector<8x512xf32> to vector<8x24xf32>
    %657 = vector.broadcast %20 : vector<1x24xf32> to vector<8x24xf32>
    %658 = arith.addf %656, %657 : vector<8x24xf32>
    %659 = arith.negf %658 : vector<8x24xf32>
    %660 = math.exp %659 : vector<8x24xf32>
    %cst_140 = arith.constant 1.000000e+00 : f32
    %661 = vector.broadcast %cst_140 : f32 to vector<8x24xf32>
    %662 = arith.addf %661, %660 : vector<8x24xf32>
    %663 = arith.divf %661, %662 : vector<8x24xf32>
    %664 = vector.extract_strided_slice %655 {offsets = [0, 128], sizes = [8, 24], strides = [1, 1]} : vector<8x512xf32> to vector<8x24xf32>
    %665 = vector.broadcast %21 : vector<1x24xf32> to vector<8x24xf32>
    %666 = arith.addf %664, %665 : vector<8x24xf32>
    %667 = arith.negf %666 : vector<8x24xf32>
    %668 = math.exp %667 : vector<8x24xf32>
    %cst_141 = arith.constant 1.000000e+00 : f32
    %669 = vector.broadcast %cst_141 : f32 to vector<8x24xf32>
    %670 = arith.addf %669, %668 : vector<8x24xf32>
    %671 = arith.divf %669, %670 : vector<8x24xf32>
    %672 = vector.extract_strided_slice %655 {offsets = [0, 256], sizes = [8, 24], strides = [1, 1]} : vector<8x512xf32> to vector<8x24xf32>
    %673 = vector.broadcast %22 : vector<1x24xf32> to vector<8x24xf32>
    %674 = arith.addf %672, %673 : vector<8x24xf32>
    %675 = arith.negf %674 : vector<8x24xf32>
    %676 = math.exp %675 : vector<8x24xf32>
    %cst_142 = arith.constant 1.000000e+00 : f32
    %677 = vector.broadcast %cst_142 : f32 to vector<8x24xf32>
    %678 = arith.addf %677, %676 : vector<8x24xf32>
    %679 = arith.divf %677, %678 : vector<8x24xf32>
    %680 = vector.extract_strided_slice %655 {offsets = [0, 384], sizes = [8, 24], strides = [1, 1]} : vector<8x512xf32> to vector<8x24xf32>
    %681 = vector.broadcast %23 : vector<1x24xf32> to vector<8x24xf32>
    %682 = arith.addf %680, %681 : vector<8x24xf32>
    %683 = math.tanh %682 : vector<8x24xf32>
    %684 = arith.mulf %671, %589 : vector<8x24xf32>
    %685 = arith.mulf %663, %683 : vector<8x24xf32>
    %686 = arith.addf %684, %685 : vector<8x24xf32>
    %687 = math.tanh %686 : vector<8x24xf32>
    %688 = arith.mulf %679, %687 : vector<8x24xf32>
    %689 = tpu.concatenate %589, %686 in 1 : vector<8x24xf32>, vector<8x24xf32> -> vector<8x48xf32>
    %690 = arith.truncf %689 : vector<8x48xf32> to vector<8x48xbf16>
    %cst_143 = arith.constant dense<0.000000e+00> : vector<8x16xf32>
    %691 = tpu.matmul %690, %7, %cst_143 {dimension_numbers = #tpu.dot_dimension_numbers<[1], [0], [0], [1], [0, 0, 1, 1], [], []>} : vector<8x48xbf16>, vector<48x16xbf16>, vector<8x16xf32> -> vector<8x16xf32>
    %692 = vector.broadcast %25 : vector<1x16xf32> to vector<8x16xf32>
    %693 = arith.addf %691, %692 : vector<8x16xf32>
    %cst_144 = arith.constant 0.000000e+00 : f32
    %694 = vector.broadcast %cst_144 : f32 to vector<8x16xf32>
    %695 = arith.maximumf %693, %694 : vector<8x16xf32>
    %696 = arith.truncf %695 : vector<8x16xf32> to vector<8x16xbf16>
    %cst_145 = arith.constant dense<0.000000e+00> : vector<8x48xf32>
    %697 = tpu.matmul %696, %8, %cst_145 {dimension_numbers = #tpu.dot_dimension_numbers<[1], [0], [0], [1], [0, 0, 1, 1], [], []>} : vector<8x16xbf16>, vector<16x48xbf16>, vector<8x48xf32> -> vector<8x48xf32>
    %698 = vector.broadcast %26 : vector<1x48xf32> to vector<8x48xf32>
    %699 = arith.addf %697, %698 : vector<8x48xf32>
    %cst_146 = arith.constant dense<0xFF800000> : vector<8xf32>
    %700 = vector.multi_reduction <maximumf>, %699, %cst_146 [1] : vector<8x48xf32> to vector<8xf32>
    %701 = vector.shape_cast %700 : vector<8xf32> to vector<8x1xf32>
    %702 = vector.broadcast %701 : vector<8x1xf32> to vector<8x48xf32>
    %703 = arith.subf %699, %702 : vector<8x48xf32>
    %704 = math.exp %703 : vector<8x48xf32>
    %cst_147 = arith.constant dense<0.000000e+00> : vector<8xf32>
    %705 = vector.multi_reduction <add>, %704, %cst_147 [1] : vector<8x48xf32> to vector<8xf32>
    %706 = vector.shape_cast %705 : vector<8xf32> to vector<8x1xf32>
    %707 = tpu.reciprocal %706 {approx = true} : vector<8x1xf32> -> vector<8x1xf32>
    %708 = vector.broadcast %707 : vector<8x1xf32> to vector<8x48xf32>
    %709 = arith.mulf %704, %708 : vector<8x48xf32>
    %710 = arith.mulf %709, %689 : vector<8x48xf32>
    %711 = arith.truncf %710 : vector<8x48xf32> to vector<8x48xbf16>
    %cst_148 = arith.constant dense<0.000000e+00> : vector<8x16xf32>
    %712 = tpu.matmul %711, %9, %cst_148 {dimension_numbers = #tpu.dot_dimension_numbers<[1], [0], [0], [1], [0, 0, 1, 1], [], []>} : vector<8x48xbf16>, vector<48x16xbf16>, vector<8x16xf32> -> vector<8x16xf32>
    %713 = vector.broadcast %27 : vector<1x16xf32> to vector<8x16xf32>
    %714 = arith.addf %712, %713 : vector<8x16xf32>
    %cst_149 = arith.constant 0.000000e+00 : f32
    %715 = vector.broadcast %cst_149 : f32 to vector<8x16xf32>
    %716 = arith.maximumf %714, %715 : vector<8x16xf32>
    %717 = arith.truncf %716 : vector<8x16xf32> to vector<8x16xbf16>
    %cst_150 = arith.constant dense<0.000000e+00> : vector<8x8xf32>
    %718 = tpu.matmul %717, %10, %cst_150 {dimension_numbers = #tpu.dot_dimension_numbers<[1], [0], [0], [1], [0, 0, 1, 1], [], []>} : vector<8x16xbf16>, vector<16x8xbf16>, vector<8x8xf32> -> vector<8x8xf32>
    %719 = vector.broadcast %28 : vector<1x8xf32> to vector<8x8xf32>
    %720 = arith.addf %718, %719 : vector<8x8xf32>
    %721 = math.tanh %720 : vector<8x8xf32>
    %722 = vector.extract_strided_slice %11 {offsets = [0, 0], sizes = [48, 32], strides = [1, 1]} : vector<56x32xbf16> to vector<48x32xbf16>
    %cst_151 = arith.constant dense<0.000000e+00> : vector<8x32xf32>
    %723 = tpu.matmul %711, %722, %cst_151 {dimension_numbers = #tpu.dot_dimension_numbers<[1], [0], [0], [1], [0, 0, 1, 1], [], []>} : vector<8x48xbf16>, vector<48x32xbf16>, vector<8x32xf32> -> vector<8x32xf32>
    %724 = arith.truncf %648 : vector<8x8xf32> to vector<8x8xbf16>
    %725 = vector.extract_strided_slice %11 {offsets = [48, 0], sizes = [8, 32], strides = [1, 1]} : vector<56x32xbf16> to vector<8x32xbf16>
    %cst_152 = arith.constant dense<0.000000e+00> : vector<8x32xf32>
    %726 = tpu.matmul %724, %725, %cst_152 {dimension_numbers = #tpu.dot_dimension_numbers<[1], [0], [0], [1], [0, 0, 1, 1], [], []>} : vector<8x8xbf16>, vector<8x32xbf16>, vector<8x32xf32> -> vector<8x32xf32>
    %727 = arith.addf %723, %726 : vector<8x32xf32>
    %728 = vector.broadcast %29 : vector<1x32xf32> to vector<8x32xf32>
    %729 = arith.addf %727, %728 : vector<8x32xf32>
    %cst_153 = arith.constant 0.000000e+00 : f32
    %730 = vector.broadcast %cst_153 : f32 to vector<8x32xf32>
    %731 = arith.maximumf %729, %730 : vector<8x32xf32>
    %732 = arith.truncf %731 : vector<8x32xf32> to vector<8x32xbf16>
    %cst_154 = arith.constant dense<0.000000e+00> : vector<8x16xf32>
    %733 = tpu.matmul %732, %12, %cst_154 {dimension_numbers = #tpu.dot_dimension_numbers<[1], [0], [0], [1], [0, 0, 1, 1], [], []>} : vector<8x32xbf16>, vector<32x16xbf16>, vector<8x16xf32> -> vector<8x16xf32>
    %734 = vector.broadcast %30 : vector<1x16xf32> to vector<8x16xf32>
    %735 = arith.addf %733, %734 : vector<8x16xf32>
    %736 = arith.negf %735 : vector<8x16xf32>
    %737 = math.exp %736 : vector<8x16xf32>
    %cst_155 = arith.constant 1.000000e+00 : f32
    %738 = vector.broadcast %cst_155 : f32 to vector<8x16xf32>
    %739 = arith.addf %738, %737 : vector<8x16xf32>
    %740 = arith.divf %738, %739 : vector<8x16xf32>
    %741 = vector.extract_strided_slice %740 {offsets = [0, 0], sizes = [8, 8], strides = [1, 1]} : vector<8x16xf32> to vector<8x8xf32>
    %742 = arith.mulf %741, %648 : vector<8x8xf32>
    %743 = vector.extract_strided_slice %740 {offsets = [0, 8], sizes = [8, 8], strides = [1, 1]} : vector<8x16xf32> to vector<8x8xf32>
    %744 = arith.mulf %743, %721 : vector<8x8xf32>
    %745 = arith.addf %742, %744 : vector<8x8xf32>
    %c5_i32_156 = arith.constant 5 : i32
    %746 = arith.index_cast %c5_i32_156 : i32 to index
    %c0_157 = arith.constant 0 : index
    %c0_158 = arith.constant 0 : index
    %747 = vector.load %arg2[%746, %c0_157, %c0_158] : memref<6x8x24xbf16, #tpu.memory_space<vmem>>, vector<1x8x24xbf16>
    %748 = vector.shape_cast %747 : vector<1x8x24xbf16> to vector<8x24xbf16>
    %cst_159 = arith.constant dense<0.000000e+00> : vector<8x512xf32>
    %749 = tpu.matmul %748, %3, %cst_159 {dimension_numbers = #tpu.dot_dimension_numbers<[1], [0], [0], [1], [0, 0, 1, 1], [], []>} : vector<8x24xbf16>, vector<24x512xbf16>, vector<8x512xf32> -> vector<8x512xf32>
    %750 = arith.truncf %688 : vector<8x24xf32> to vector<8x24xbf16>
    %cst_160 = arith.constant dense<0.000000e+00> : vector<8x512xf32>
    %751 = tpu.matmul %750, %4, %cst_160 {dimension_numbers = #tpu.dot_dimension_numbers<[1], [0], [0], [1], [0, 0, 1, 1], [], []>} : vector<8x24xbf16>, vector<24x512xbf16>, vector<8x512xf32> -> vector<8x512xf32>
    %752 = arith.addf %749, %751 : vector<8x512xf32>
    %753 = vector.extract_strided_slice %752 {offsets = [0, 0], sizes = [8, 24], strides = [1, 1]} : vector<8x512xf32> to vector<8x24xf32>
    %754 = vector.broadcast %20 : vector<1x24xf32> to vector<8x24xf32>
    %755 = arith.addf %753, %754 : vector<8x24xf32>
    %756 = arith.negf %755 : vector<8x24xf32>
    %757 = math.exp %756 : vector<8x24xf32>
    %cst_161 = arith.constant 1.000000e+00 : f32
    %758 = vector.broadcast %cst_161 : f32 to vector<8x24xf32>
    %759 = arith.addf %758, %757 : vector<8x24xf32>
    %760 = arith.divf %758, %759 : vector<8x24xf32>
    %761 = vector.extract_strided_slice %752 {offsets = [0, 128], sizes = [8, 24], strides = [1, 1]} : vector<8x512xf32> to vector<8x24xf32>
    %762 = vector.broadcast %21 : vector<1x24xf32> to vector<8x24xf32>
    %763 = arith.addf %761, %762 : vector<8x24xf32>
    %764 = arith.negf %763 : vector<8x24xf32>
    %765 = math.exp %764 : vector<8x24xf32>
    %cst_162 = arith.constant 1.000000e+00 : f32
    %766 = vector.broadcast %cst_162 : f32 to vector<8x24xf32>
    %767 = arith.addf %766, %765 : vector<8x24xf32>
    %768 = arith.divf %766, %767 : vector<8x24xf32>
    %769 = vector.extract_strided_slice %752 {offsets = [0, 256], sizes = [8, 24], strides = [1, 1]} : vector<8x512xf32> to vector<8x24xf32>
    %770 = vector.broadcast %22 : vector<1x24xf32> to vector<8x24xf32>
    %771 = arith.addf %769, %770 : vector<8x24xf32>
    %772 = arith.negf %771 : vector<8x24xf32>
    %773 = math.exp %772 : vector<8x24xf32>
    %cst_163 = arith.constant 1.000000e+00 : f32
    %774 = vector.broadcast %cst_163 : f32 to vector<8x24xf32>
    %775 = arith.addf %774, %773 : vector<8x24xf32>
    %776 = arith.divf %774, %775 : vector<8x24xf32>
    %777 = vector.extract_strided_slice %752 {offsets = [0, 384], sizes = [8, 24], strides = [1, 1]} : vector<8x512xf32> to vector<8x24xf32>
    %778 = vector.broadcast %23 : vector<1x24xf32> to vector<8x24xf32>
    %779 = arith.addf %777, %778 : vector<8x24xf32>
    %780 = math.tanh %779 : vector<8x24xf32>
    %781 = arith.mulf %768, %686 : vector<8x24xf32>
    %782 = arith.mulf %760, %780 : vector<8x24xf32>
    %783 = arith.addf %781, %782 : vector<8x24xf32>
    %784 = math.tanh %783 : vector<8x24xf32>
    %785 = arith.mulf %776, %784 : vector<8x24xf32>
    %786 = tpu.concatenate %686, %783 in 1 : vector<8x24xf32>, vector<8x24xf32> -> vector<8x48xf32>
    %787 = arith.truncf %786 : vector<8x48xf32> to vector<8x48xbf16>
    %cst_164 = arith.constant dense<0.000000e+00> : vector<8x16xf32>
    %788 = tpu.matmul %787, %7, %cst_164 {dimension_numbers = #tpu.dot_dimension_numbers<[1], [0], [0], [1], [0, 0, 1, 1], [], []>} : vector<8x48xbf16>, vector<48x16xbf16>, vector<8x16xf32> -> vector<8x16xf32>
    %789 = vector.broadcast %25 : vector<1x16xf32> to vector<8x16xf32>
    %790 = arith.addf %788, %789 : vector<8x16xf32>
    %cst_165 = arith.constant 0.000000e+00 : f32
    %791 = vector.broadcast %cst_165 : f32 to vector<8x16xf32>
    %792 = arith.maximumf %790, %791 : vector<8x16xf32>
    %793 = arith.truncf %792 : vector<8x16xf32> to vector<8x16xbf16>
    %cst_166 = arith.constant dense<0.000000e+00> : vector<8x48xf32>
    %794 = tpu.matmul %793, %8, %cst_166 {dimension_numbers = #tpu.dot_dimension_numbers<[1], [0], [0], [1], [0, 0, 1, 1], [], []>} : vector<8x16xbf16>, vector<16x48xbf16>, vector<8x48xf32> -> vector<8x48xf32>
    %795 = vector.broadcast %26 : vector<1x48xf32> to vector<8x48xf32>
    %796 = arith.addf %794, %795 : vector<8x48xf32>
    %cst_167 = arith.constant dense<0xFF800000> : vector<8xf32>
    %797 = vector.multi_reduction <maximumf>, %796, %cst_167 [1] : vector<8x48xf32> to vector<8xf32>
    %798 = vector.shape_cast %797 : vector<8xf32> to vector<8x1xf32>
    %799 = vector.broadcast %798 : vector<8x1xf32> to vector<8x48xf32>
    %800 = arith.subf %796, %799 : vector<8x48xf32>
    %801 = math.exp %800 : vector<8x48xf32>
    %cst_168 = arith.constant dense<0.000000e+00> : vector<8xf32>
    %802 = vector.multi_reduction <add>, %801, %cst_168 [1] : vector<8x48xf32> to vector<8xf32>
    %803 = vector.shape_cast %802 : vector<8xf32> to vector<8x1xf32>
    %804 = tpu.reciprocal %803 {approx = true} : vector<8x1xf32> -> vector<8x1xf32>
    %805 = vector.broadcast %804 : vector<8x1xf32> to vector<8x48xf32>
    %806 = arith.mulf %801, %805 : vector<8x48xf32>
    %807 = arith.mulf %806, %786 : vector<8x48xf32>
    %808 = arith.truncf %807 : vector<8x48xf32> to vector<8x48xbf16>
    %cst_169 = arith.constant dense<0.000000e+00> : vector<8x16xf32>
    %809 = tpu.matmul %808, %9, %cst_169 {dimension_numbers = #tpu.dot_dimension_numbers<[1], [0], [0], [1], [0, 0, 1, 1], [], []>} : vector<8x48xbf16>, vector<48x16xbf16>, vector<8x16xf32> -> vector<8x16xf32>
    %810 = vector.broadcast %27 : vector<1x16xf32> to vector<8x16xf32>
    %811 = arith.addf %809, %810 : vector<8x16xf32>
    %cst_170 = arith.constant 0.000000e+00 : f32
    %812 = vector.broadcast %cst_170 : f32 to vector<8x16xf32>
    %813 = arith.maximumf %811, %812 : vector<8x16xf32>
    %814 = arith.truncf %813 : vector<8x16xf32> to vector<8x16xbf16>
    %cst_171 = arith.constant dense<0.000000e+00> : vector<8x8xf32>
    %815 = tpu.matmul %814, %10, %cst_171 {dimension_numbers = #tpu.dot_dimension_numbers<[1], [0], [0], [1], [0, 0, 1, 1], [], []>} : vector<8x16xbf16>, vector<16x8xbf16>, vector<8x8xf32> -> vector<8x8xf32>
    %816 = vector.broadcast %28 : vector<1x8xf32> to vector<8x8xf32>
    %817 = arith.addf %815, %816 : vector<8x8xf32>
    %818 = math.tanh %817 : vector<8x8xf32>
    %819 = vector.extract_strided_slice %11 {offsets = [0, 0], sizes = [48, 32], strides = [1, 1]} : vector<56x32xbf16> to vector<48x32xbf16>
    %cst_172 = arith.constant dense<0.000000e+00> : vector<8x32xf32>
    %820 = tpu.matmul %808, %819, %cst_172 {dimension_numbers = #tpu.dot_dimension_numbers<[1], [0], [0], [1], [0, 0, 1, 1], [], []>} : vector<8x48xbf16>, vector<48x32xbf16>, vector<8x32xf32> -> vector<8x32xf32>
    %821 = arith.truncf %745 : vector<8x8xf32> to vector<8x8xbf16>
    %822 = vector.extract_strided_slice %11 {offsets = [48, 0], sizes = [8, 32], strides = [1, 1]} : vector<56x32xbf16> to vector<8x32xbf16>
    %cst_173 = arith.constant dense<0.000000e+00> : vector<8x32xf32>
    %823 = tpu.matmul %821, %822, %cst_173 {dimension_numbers = #tpu.dot_dimension_numbers<[1], [0], [0], [1], [0, 0, 1, 1], [], []>} : vector<8x8xbf16>, vector<8x32xbf16>, vector<8x32xf32> -> vector<8x32xf32>
    %824 = arith.addf %820, %823 : vector<8x32xf32>
    %825 = vector.broadcast %29 : vector<1x32xf32> to vector<8x32xf32>
    %826 = arith.addf %824, %825 : vector<8x32xf32>
    %cst_174 = arith.constant 0.000000e+00 : f32
    %827 = vector.broadcast %cst_174 : f32 to vector<8x32xf32>
    %828 = arith.maximumf %826, %827 : vector<8x32xf32>
    %829 = arith.truncf %828 : vector<8x32xf32> to vector<8x32xbf16>
    %cst_175 = arith.constant dense<0.000000e+00> : vector<8x16xf32>
    %830 = tpu.matmul %829, %12, %cst_175 {dimension_numbers = #tpu.dot_dimension_numbers<[1], [0], [0], [1], [0, 0, 1, 1], [], []>} : vector<8x32xbf16>, vector<32x16xbf16>, vector<8x16xf32> -> vector<8x16xf32>
    %831 = vector.broadcast %30 : vector<1x16xf32> to vector<8x16xf32>
    %832 = arith.addf %830, %831 : vector<8x16xf32>
    %833 = arith.negf %832 : vector<8x16xf32>
    %834 = math.exp %833 : vector<8x16xf32>
    %cst_176 = arith.constant 1.000000e+00 : f32
    %835 = vector.broadcast %cst_176 : f32 to vector<8x16xf32>
    %836 = arith.addf %835, %834 : vector<8x16xf32>
    %837 = arith.divf %835, %836 : vector<8x16xf32>
    %838 = vector.extract_strided_slice %837 {offsets = [0, 0], sizes = [8, 8], strides = [1, 1]} : vector<8x16xf32> to vector<8x8xf32>
    %839 = arith.mulf %838, %745 : vector<8x8xf32>
    %840 = vector.extract_strided_slice %837 {offsets = [0, 8], sizes = [8, 8], strides = [1, 1]} : vector<8x16xf32> to vector<8x8xf32>
    %841 = arith.mulf %840, %818 : vector<8x8xf32>
    %842 = arith.addf %839, %841 : vector<8x8xf32>
    %c6_i32 = arith.constant 6 : i32
    %843 = arith.truncf %785 : vector<8x24xf32> to vector<8x24xbf16>
    %844 = vector.extract_strided_slice %13 {offsets = [0, 0], sizes = [24, 16], strides = [1, 1]} : vector<32x16xbf16> to vector<24x16xbf16>
    %cst_177 = arith.constant dense<0.000000e+00> : vector<8x16xf32>
    %845 = tpu.matmul %843, %844, %cst_177 {dimension_numbers = #tpu.dot_dimension_numbers<[1], [0], [0], [1], [0, 0, 1, 1], [], []>} : vector<8x24xbf16>, vector<24x16xbf16>, vector<8x16xf32> -> vector<8x16xf32>
    %846 = arith.truncf %842 : vector<8x8xf32> to vector<8x8xbf16>
    %847 = vector.extract_strided_slice %13 {offsets = [24, 0], sizes = [8, 16], strides = [1, 1]} : vector<32x16xbf16> to vector<8x16xbf16>
    %cst_178 = arith.constant dense<0.000000e+00> : vector<8x16xf32>
    %848 = tpu.matmul %846, %847, %cst_178 {dimension_numbers = #tpu.dot_dimension_numbers<[1], [0], [0], [1], [0, 0, 1, 1], [], []>} : vector<8x8xbf16>, vector<8x16xbf16>, vector<8x16xf32> -> vector<8x16xf32>
    %849 = arith.addf %845, %848 : vector<8x16xf32>
    %850 = vector.broadcast %31 : vector<1x16xf32> to vector<8x16xf32>
    %851 = arith.addf %849, %850 : vector<8x16xf32>
    %cst_179 = arith.constant 0.000000e+00 : f32
    %852 = vector.broadcast %cst_179 : f32 to vector<8x16xf32>
    %853 = arith.maximumf %851, %852 : vector<8x16xf32>
    %854 = arith.truncf %853 : vector<8x16xf32> to vector<8x16xbf16>
    %cst_180 = arith.constant dense<0.000000e+00> : vector<8x1xf32>
    %855 = tpu.matmul %854, %14, %cst_180 {dimension_numbers = #tpu.dot_dimension_numbers<[1], [0], [0], [1], [0, 0, 1, 1], [], []>} : vector<8x16xbf16>, vector<16x1xbf16>, vector<8x1xf32> -> vector<8x1xf32>
    %856 = vector.broadcast %32 : vector<1x1xf32> to vector<8x1xf32>
    %857 = arith.addf %855, %856 : vector<8x1xf32>
    %c0_181 = arith.constant 0 : index
    %c0_182 = arith.constant 0 : index
    %858 = vector.load %arg6[%c0_181, %c0_182] : memref<8x1xf32, #tpu.memory_space<vmem>>, vector<8x1xf32>
    tpu.vector_store %arg6[%c0_181, %c0_182], %857 {strides = array<i32>} : memref<8x1xf32, #tpu.memory_space<vmem>>, vector<8x1xf32>,
    return
  }
  func.func @transform_0(%arg0: i32) -> (i32, i32, i32, i32) {
    %c0_i32 = arith.constant 0 : i32
    %c0_i32_0 = arith.constant 0 : i32
    %c0_i32_1 = arith.constant 0 : i32
    %c0_i32_2 = arith.constant 0 : i32
    return %c0_i32, %c0_i32_0, %arg0, %c0_i32_1 : i32, i32, i32, i32
  }
  func.func @transform_1(%arg0: i32) -> (i32, i32, i32) {
    %c0_i32 = arith.constant 0 : i32
    %c0_i32_0 = arith.constant 0 : i32
    %c0_i32_1 = arith.constant 0 : i32
    return %c0_i32, %arg0, %c0_i32_0 : i32, i32, i32
  }
  func.func @transform_2(%arg0: i32) -> (i32, i32) {
    %c0_i32 = arith.constant 0 : i32
    %c0_i32_0 = arith.constant 0 : i32
    %c0_i32_1 = arith.constant 0 : i32
    return %c0_i32, %c0_i32_0 : i32, i32
  }
  func.func @transform_3(%arg0: i32) -> (i32, i32) {
    %c0_i32 = arith.constant 0 : i32
    %c0_i32_0 = arith.constant 0 : i32
    %c0_i32_1 = arith.constant 0 : i32
    return %c0_i32, %c0_i32_0 : i32, i32
  }
  func.func @transform_4(%arg0: i32) -> (i32, i32) {
    %c0_i32 = arith.constant 0 : i32
    %c0_i32_0 = arith.constant 0 : i32
    %c0_i32_1 = arith.constant 0 : i32
    return %c0_i32, %c0_i32_0 : i32, i32
  }
  func.func @transform_5(%arg0: i32) -> (i32, i32) {
    %c0_i32 = arith.constant 0 : i32
    %c0_i32_0 = arith.constant 0 : i32
    return %arg0, %c0_i32 : i32, i32
  }
}

</mosaic_0001>

<bundles_post_ra>
// kernel: contextual_mfn_forward.1
= control target key start
LH: loop header
LB: loop body
LE: loop exit
PB: predicated region body
PF: predicated region fallthrough
CT: control target
= control target key end

     0   :  { %v8539_v1 = vmov 0   ;;  %vm127_vm0 = vcmask 1043456   ;;  %vm123_vm1 = vcmask 195584   ;;  %v400_v27 = vlaneseq  ;;  %s6946_s26 = smov 24   ;;  %s6947_s29 = smov 104   ;;  %s8532_s2 = inlined_call_operand.vmem [shape: bf16[96,512], index: 2, kind: input, shape index: {}]   ;;  %s8533_s0 = inlined_call_operand.vmem [shape: bf16[5,3,8,24], index: 0, kind: input, shape index: {}]   ;;  %s8534_s4 = inlined_call_operand.vmem [shape: f32[24,128], index: 4, kind: input, shape index: {}]   ;;  %s8535_s3 = inlined_call_operand.vmem [shape: bf16[336,128], index: 3, kind: input, shape index: {}]   ;;  %s8536_s1 = inlined_call_operand.vmem [shape: bf16[6,8,24], index: 1, kind: input, shape index: {}]   ;;  %s8537_s5 = inlined_call_operand.vmem [shape: f32[8,1], index: 5, kind: output, shape index: {}]  }
   0x1   :  { %v6983_v0 = vld [vmem:[%s8532_s2 + $0x34] ss:$16 sps:$4 sm:$0xff]   ;;  %172 = vmatprep.mubr.bf16.mxu0 %v8539_v1  ;;  %223 = vmatprep.mubr.bf16.mxu1 %v8539_v1  ;;  %v6990_v2 = vld [vmem:[%s8532_s2 + $0x3c] ss:$16 sps:$4 sm:$0xff]   ;;  %v6996_v3 = vld [vmem:[%s8532_s2 + $0x30] ss:$16 sps:$4 sm:$0xff]  }
   0x2   :  { %140 = vmatprep.subr.bf16.mxu0 %v6983_v0  ;;  %v7001_v4 = vld [vmem:[%s8532_s2 + $0x38] ss:$16 sps:$4 sm:$0xff]   ;;  %v31_v5 = vld [vmem:[%s8532_s2 + $0x50] sm:$0xff]  ;;  %191 = vmatprep.subr.bf16.mxu1 %v6990_v2  ;;  %v7029_v13 = vld [vmem:[%s8532_s2 + $0xc] ss:$16 sps:$4 sm:$0xff]   ;;  %v7108_v28 = vshrl.u32 %v400_v27, 7 }
   0x3   :  { %v7007_v6 = vcombine.high %v31_v5, %v31_v5  ;;  %v32_v7 = vld [vmem:[%s8532_s2 + $0x58] sm:$0xff]  ;;  %v5578_v8 = vcombine.low %v31_v5, %v31_v5  ;;  %141 = vmatpush1.bf16.msra.mxu0 %v6996_v3  ;;  %192 = vmatpush1.bf16.msra.mxu1 %v7001_v4  ;;  %v7019_v11 = vld [vmem:[%s8532_s2 + $0x4] ss:$16 sps:$4 sm:$0xff]   ;;  %v7042_v16 = vld [vmem:[%s8532_s2] ss:$16 sps:$4 sm:$0xff]   ;;  %vm6945_vm2 = vmmov 0  }
   0x4   :  { %v7014_v9 = vcombine.high %v32_v7, %v32_v7  ;;  %v5580_v10 = vcombine.low %v32_v7, %v32_v7  ;;  %v25_v15 = vld [vmem:[%s8532_s2 + $0x20] sm:$0xff]  ;;  %v7049_v17 = vld [vmem:[%s8532_s2 + $0x8] ss:$16 sps:$4 sm:$0xff]   ;;  %8547 = vst [vmem:[#allocation2_spill] sm:$0xff] %v7108_v28  ;;  %v7111_v33 = vsub.s32 0, %v7108_v28  ;;  %v427_v37 = vsub.s32 1, %v7108_v28 }
   0x5   :  { %5582 = vmatprep.subr.msk.bf16.mxu0 %vm127_vm0, %v7007_v6  ;;  %v7024_v12 = vsel %vm127_vm0, %v5578_v8, 0  ;;  %v26_v18 = vld [vmem:[%s8532_s2 + $0x28] sm:$0xff]  ;;  %v7055_v19 = vcombine.high %v25_v15, %v25_v15  ;;  %v5590_v20 = vcombine.low %v25_v15, %v25_v15  ;;  %v6463_v25 = vld [vmem:[%s8533_s0] sm:$0xff]   ;;  %v452_v41 = vsub.s32 2, %v7108_v28  ;;  %s6948_s27 = smov 8   ;;  %s6949_s28 = smov 120  }
   0x6   :  { %5583 = vmatprep.subr.msk.bf16.mxu1 %vm127_vm0, %v7014_v9  ;;  %v7034_v14 = vsel %vm127_vm0, %v5580_v10, 0  ;;  %v7060_v21 = vcombine.high %v26_v18, %v26_v18  ;;  %v5592_v22 = vcombine.low %v26_v18, %v26_v18  ;;  %v6464_v26 = vld [vmem:[%s8533_s0 + $0x8] ss:$0 sps:$4 sm:$0xff]   ;;  %8548 = vst [vmem:[#allocation3_spill] sm:$0xff] %v7111_v33  ;;  %v87_v36 = vld [vmem:[%s8534_s4] sm:$0xff]  ;;  %v477_v48 = vsub.s32 3, %v7108_v28 }
   0x7   :  { %143 = vmatpush1.bf16.msra.mxu0 %v7024_v12  ;;  %194 = vmatpush1.bf16.msra.mxu1 %v7034_v14  ;;  %v7068_v23 = vsel %vm127_vm0, %v5590_v20, 0  ;;  %v7118_v40 = vrot.slane %v87_v36, %v7111_v33  ;;  %v7123_v42 = vrot.slane %v87_v36, %v427_v37  ;;  %v7129_v49 = vrot.slane %v87_v36, %v452_v41 }
   0x8   :  { %298 = vmatprep.subr.bf16.mxu0 %v7019_v11  ;;  %349 = vmatprep.subr.bf16.mxu1 %v7029_v13  ;;  %v7074_v24 = vsel %vm127_vm0, %v5592_v22, 0  ;;  %v7136_v59 = vrot.slane %v87_v36, %v477_v48  ;;  %vm2254_vm3 = vcmask 392192   ;;  %vm2310_vm4 = vcmask 130048  }
   0x9   :  { %vm2492_vm5 = vcmask 64512   ;;  %vm2620_vm6 = vcmask 261120   ;;  %vm5568_vm7 = vcmask 7168  }
   0xa   :  { %173 = vmatmul.mubr.bf16.vlgmr.msra.gmra.mrb[0].mxu0 %v8539_v1  ;;  %224 = vmatmul.mubr.bf16.vlgmr.msra.gmra.mrb[0].mxu1 %v8539_v1 }
   0xb   :  { %299 = vmatpush1.bf16.msra.mxu0 %v7042_v16  ;;  %182 = vmatprep.mubr.bf16.mxu0 %v8539_v1 }
   0xc   :  { %233 = vmatprep.mubr.bf16.mxu1 %v8539_v1  ;;  %5594 = vmatprep.subr.msk.bf16.mxu0 %vm127_vm0, %v7055_v19 }
   0xd   :  { %350 = vmatpush1.bf16.msra.mxu1 %v7049_v17 }
   0xe   :  { %5597 = vmatprep.subr.msk.bf16.mxu1 %vm127_vm0, %v7060_v21 }
   0xf   :  { %301 = vmatpush1.bf16.msra.mxu0 %v7068_v23 }
  0x10   :  { %512 = vmatprep.subr.bf16.mxu0 %v6983_v0 }
  0x11   :  { %352 = vmatpush1.bf16.msra.mxu1 %v7074_v24 }
  0x12   :  { %183 = vmatmul.mubr.bf16.gmra.mrb[4].mxu0 %v8539_v1  ;;  %234 = vmatmul.mubr.bf16.gmra.mrb[4].mxu1 %v8539_v1 }
  0x13   :  { %330 = vmatprep.mubr.bf16.mxu0 %v8539_v1  ;;  %381 = vmatprep.mubr.bf16.mxu1 %v8539_v1 }
  0x14   :  { %563 = vmatprep.subr.bf16.mxu1 %v6990_v2 }
  0x1a   :  { %5595 = vmatmul.mubr.msk.bf16.vlgmr.msra.gmra.mrb[0].mxu0 %vm123_vm1, %v6463_v25  ;;  %5598 = vmatmul.mubr.msk.bf16.vlgmr.msra.gmra.mrb[0].mxu1 %vm123_vm1, %v6463_v25 }
  0x1b   :  { %340 = vmatprep.mubr.bf16.mxu0 %v8539_v1  ;;  %391 = vmatprep.mubr.bf16.mxu1 %v8539_v1 }
  0x1c   :  { %513 = vmatpush1.bf16.msra.mxu0 %v6996_v3  ;;  %564 = vmatpush1.bf16.msra.mxu1 %v7001_v4 }
  0x1d   :  { %5612 = vmatprep.subr.msk.bf16.mxu0 %vm127_vm0, %v7007_v6  ;;  %5615 = vmatprep.subr.msk.bf16.mxu1 %vm127_vm0, %v7014_v9 }
  0x20   :  { %515 = vmatpush1.bf16.msra.mxu0 %v7024_v12  ;;  %566 = vmatpush1.bf16.msra.mxu1 %v7034_v14 }
  0x21   :  { %628 = vmatprep.subr.bf16.mxu0 %v7019_v11  ;;  %679 = vmatprep.subr.bf16.mxu1 %v7029_v13 }
  0x22   :  { %5596 = vmatmul.mubr.msk.bf16.gmra.mrb[8].mxu0 %vm123_vm1, %v6464_v26  ;;  %5599 = vmatmul.mubr.msk.bf16.gmra.mrb[8].mxu1 %vm123_vm1, %v6464_v26 }
  0x23   :  { %544 = vmatprep.mubr.bf16.mxu0 %v8539_v1  ;;  %595 = vmatprep.mubr.bf16.mxu1 %v8539_v1 }
  0xe5   :  { %v184_v29 = vpop.f32.mrb[4].mxu0  ;;  %v235_v30 = vpop.f32.mrb[4].mxu1 }
  0xe6   :  { %v186_v31 = vpop.f32.mrb[5].mxu0  ;;  %v237_v32 = vpop.f32.mrb[5].mxu1 }
  0xe7   :  { %v188_v34 = vpop.f32.mrb[6].mxu0  ;;  %v239_v35 = vpop.f32.mrb[6].mxu1 }
  0xe8   :  { %v189_v38 = vpop.f32.mrb[7].mxu0  ;;  %v240_v39 = vpop.f32.mrb[7].mxu1 }
  0xed   :  { %v332_v43 = vpop.f32.mrb[0].mxu0  ;;  %v383_v44 = vpop.f32.mrb[0].mxu1 }
  0xee   :  { %v404_v45 = vadd.f32 %v7118_v40, %v332_v43  ;;  %v334_v46 = vpop.f32.mrb[1].mxu0  ;;  %v385_v47 = vpop.f32.mrb[1].mxu1  ;;  %v454_v61 = vadd.f32 %v7129_v49, %v383_v44 }
  0xef   :  { %v429_v50 = vadd.f32 %v7123_v42, %v334_v46  ;;  %v336_v51 = vpop.f32.mrb[2].mxu0  ;;  %v387_v52 = vpop.f32.mrb[2].mxu1  ;;  %v479_v8 = vadd.f32 %v7136_v59, %v385_v47 }
  0xf0   :  { %v5600_v53 = vmul.f32 -1.442695, %v404_v45  ;;  %v405_v54 = vadd.f32 %v7118_v40, %v336_v51  ;;  %v338_v55 = vpop.f32.mrb[3].mxu0  ;;  %v389_v56 = vpop.f32.mrb[3].mxu1  ;;  %v455_v63 = vadd.f32 %v7129_v49, %v387_v52  ;;  %v5606_v22 = vmul.f32 -1.442695, %v454_v61 }
  0xf1   :  { %v5603_v57 = vmul.f32 -1.442695, %v429_v50  ;;  %v430_v58 = vadd.f32 %v7123_v42, %v338_v55  ;;  %v480_v45 = vadd.f32 %v7136_v59, %v389_v56 }
  0xf2   :  { %6515 = vpow2.f32 %v5600_v53  ;;  %v5601_v60 = vmul.f32 -1.442695, %v405_v54  ;;  %v5607_v39 = vmul.f32 -1.442695, %v455_v63 }
  0xf3   :  { %v5604_v62 = vmul.f32 -1.442695, %v430_v58  ;;  %6517 = vpow2.f32 %v5603_v57 }
  0xf4   :  { %6519 = vpow2.f32 %v5601_v60 }
  0xf5   :  { %v342_v5 = vpop.f32.mrb[8].mxu0  ;;  %v393_v7 = vpop.f32.mrb[8].mxu1  ;;  %6521 = vpow2.f32 %v5604_v62 }
  0xf6   :  { %v343_v10 = vadd.f32 %v342_v5, %v184_v29  ;;  %v394_v15 = vadd.f32 %v393_v7, %v235_v30  ;;  %v344_v18 = vpop.f32.mrb[9].mxu0  ;;  %v395_v20 = vpop.f32.mrb[9].mxu1  ;;  %6523 = vtanh.f32 %v479_v8 }
  0xf7   :  { %v345_v25 = vadd.f32 %v344_v18, %v186_v31  ;;  %v396_v26 = vadd.f32 %v395_v20, %v237_v32  ;;  %v346_v27 = vpop.f32.mrb[10].mxu0  ;;  %v397_v34 = vpop.f32.mrb[10].mxu1  ;;  %6525 = vpow2.f32 %v5606_v22 }
  0xf8   :  { %v406_v35 = vadd.f32 %v7118_v40, %v343_v10  ;;  %v347_v36 = vpop.f32.mrb[11].mxu0  ;;  %v398_v38 = vpop.f32.mrb[11].mxu1  ;;  %v456_v51 = vadd.f32 %v7129_v49, %v394_v15 }
  0xf9   :  { %v431_v43 = vadd.f32 %v7123_v42, %v345_v25  ;;  %v481_v54 = vadd.f32 %v7136_v59, %v396_v26 }
  0xfa   :  { %v5602_v44 = vmul.f32 -1.442695, %v406_v35  ;;  %v5608_v56 = vmul.f32 -1.442695, %v456_v51 }
  0xfb   :  { %v5605_v29 = vmul.f32 -1.442695, %v431_v43 }
  0xfc   :  { %v6516_v30 = vpop.eup %6515  ;;  %6527 = vpow2.f32 %v5602_v44 }
  0xfd   :  { %v416_v46 = vadd.f32 1.0, %v6516_v30  ;;  %6529 = vpow2.f32 %v5607_v39  ;;  %v6518_v31 = vpop.eup %6517 }
  0xfe   :  { %6531 = vpow2.f32 %v5605_v29  ;;  %v6520_v32 = vpop.eup %6519  ;;  %v441_v47 = vadd.f32 1.0, %v6518_v31 }
  0xff   :  { %6533 = vrcp.f32 %v416_v46  ;;  %v417_v50 = vadd.f32 1.0, %v6520_v32  ;;  %v6522_v52 = vpop.eup %6521 }
 0x100   :  { %6535 = vtanh.f32 %v480_v45  ;;  %v442_v53 = vadd.f32 1.0, %v6522_v52  ;;  %v6524_v55 = vpop.eup %6523 }
 0x101   :  { %6537 = vrcp.f32 %v441_v47  ;;  %v6526_v57 = vpop.eup %6525 }
 0x102   :  { %6539 = vrcp.f32 %v417_v50  ;;  %v466_v18 = vadd.f32 1.0, %v6526_v57  ;;  %v6465_v57 = vld [vmem:[%s8533_s0 + $0xc] sm:$0xff]  }
 0x103   :  { %6541 = vrcp.f32 %v442_v53 }
 0x104   :  { %6543 = vtanh.f32 %v481_v54 }
 0x105   :  { %6545 = vpow2.f32 %v5608_v56 }
 0x106   :  { %v6528_v58 = vpop.eup %6527 }
 0x107   :  { %v6530_v60 = vpop.eup %6529  ;;  %v418_v61 = vadd.f32 1.0, %v6528_v58  ;;  %v6466_v58 = vld [vmem:[%s8533_s0 + $0x14] ss:$0 sps:$4 sm:$0xff]  }
 0x108   :  { %v6532_v62 = vpop.eup %6531  ;;  %v467_v27 = vadd.f32 1.0, %v6530_v60 }
 0x109   :  { %v6534_v63 = vpop.eup %6533  ;;  %6547 = vrcp.f32 %v418_v61  ;;  %v443_v5 = vadd.f32 1.0, %v6532_v62 }
 0x10a   :  { %v6536_v7 = vpop.eup %6535  ;;  %v488_v8 = vmul.f32 %v6534_v63, %v6524_v55 }
 0x10b   :  { %v6538_v10 = vpop.eup %6537  ;;  %6549 = vrcp.f32 %v443_v5 }
 0x10c   :  { %v6540_v15 = vpop.eup %6539  ;;  %v485_v20 = vmul.f32 0.0, %v6538_v10  ;;  %6551 = vrcp.f32 %v466_v18 }
 0x10d   :  { %v489_v22 = vmul.f32 %v6540_v15, %v6536_v7  ;;  %v6542_v25 = vpop.eup %6541 }
 0x10e   :  { %v7146_v26 = vadd.f32 %v488_v8, %v485_v20  ;;  %v486_v34 = vmul.f32 0.0, %v6542_v25  ;;  %v6544_v35 = vpop.eup %6543 }
 0x10f   :  { %v6546_v38 = vpop.eup %6545 }
 0x110   :  { %6553 = vtanh.f32 %v7146_v26  ;;  %v7149_v36 = vadd.f32 %v489_v22, %v486_v34  ;;  %v468_v29 = vadd.f32 1.0, %v6546_v38 }
 0x111   :  { %6555 = vrcp.f32 %v467_v27 }
 0x112   :  { %6557 = vtanh.f32 %v7149_v36 }
 0x113   :  { %v6548_v39 = vpop.eup %6547  ;;  %6559 = vrcp.f32 %v468_v29 }
 0x114   :  { %v490_v43 = vmul.f32 %v6548_v39, %v6544_v35 }
 0x115   :  { %v6550_v44 = vpop.eup %6549 }
 0x116   :  { %v487_v30 = vmul.f32 0.0, %v6550_v44  ;;  %v6552_v46 = vpop.eup %6551 }
 0x118   :  { %v7152_v45 = vadd.f32 %v490_v43, %v487_v30 }
 0x11a   :  { %6561 = vtanh.f32 %v7152_v45  ;;  %v6554_v31 = vpop.eup %6553 }
 0x11b   :  { %v6556_v32 = vpop.eup %6555  ;;  %v497_v50 = vmul.f32 %v6554_v31, %v6552_v46 }
 0x11c   :  { %v6558_v47 = vpop.eup %6557 }
 0x11d   :  { %v498_v51 = vmul.f32 %v6558_v47, %v6556_v32  ;;  %v6560_v53 = vpop.eup %6559 }
 0x11f   :  { %v504_v52 = vpack.c.bf16 %v498_v51, %v497_v50 }
 0x121   :  { %5613 = vmatmul.mubr.msk.bf16.vlgmr.msra.gmra.mrb[12].mxu0 %vm123_vm1, %v504_v52  ;;  %5616 = vmatmul.mubr.msk.bf16.vlgmr.msra.gmra.mrb[12].mxu1 %vm123_vm1, %v504_v52 }
 0x122   :  { %629 = vmatpush1.bf16.msra.mxu0 %v7042_v16  ;;  %554 = vmatprep.mubr.bf16.mxu0 %v8539_v1 }
 0x123   :  { %605 = vmatprep.mubr.bf16.mxu1 %v8539_v1  ;;  %5620 = vmatprep.subr.msk.bf16.mxu0 %vm127_vm0, %v7055_v19 }
 0x124   :  { %v6562_v54 = vpop.eup %6561  ;;  %680 = vmatpush1.bf16.msra.mxu1 %v7049_v17 }
 0x125   :  { %v499_v55 = vmul.f32 %v6562_v54, %v6560_v53  ;;  %5623 = vmatprep.subr.msk.bf16.mxu1 %vm127_vm0, %v7060_v21 }
 0x126   :  { %631 = vmatpush1.bf16.msra.mxu0 %v7068_v23 }
 0x127   :  { %v505_v56 = vpack.c.bf16 %v499_v55, %v499_v55  ;;  %826 = vmatprep.subr.bf16.mxu0 %v6983_v0 }
 0x128   :  { %682 = vmatpush1.bf16.msra.mxu1 %v7074_v24 }
 0x129   :  { %5614 = vmatmul.mubr.msk.bf16.gmra.mrb[16].mxu0 %vm123_vm1, %v505_v56  ;;  %5617 = vmatmul.mubr.msk.bf16.gmra.mrb[16].mxu1 %vm123_vm1, %v505_v56 }
 0x12a   :  { %660 = vmatprep.mubr.bf16.mxu0 %v8539_v1  ;;  %711 = vmatprep.mubr.bf16.mxu1 %v8539_v1 }
 0x12b   :  { %877 = vmatprep.subr.bf16.mxu1 %v6990_v2 }
 0x131   :  { %5621 = vmatmul.mubr.msk.bf16.vlgmr.msra.gmra.mrb[12].mxu0 %vm123_vm1, %v6465_v57  ;;  %5624 = vmatmul.mubr.msk.bf16.vlgmr.msra.gmra.mrb[12].mxu1 %vm123_vm1, %v6465_v57 }
 0x132   :  { %670 = vmatprep.mubr.bf16.mxu0 %v8539_v1  ;;  %721 = vmatprep.mubr.bf16.mxu1 %v8539_v1 }
 0x133   :  { %827 = vmatpush1.bf16.msra.mxu0 %v6996_v3  ;;  %878 = vmatpush1.bf16.msra.mxu1 %v7001_v4 }
 0x134   :  { %5638 = vmatprep.subr.msk.bf16.mxu0 %vm127_vm0, %v7007_v6  ;;  %5641 = vmatprep.subr.msk.bf16.mxu1 %vm127_vm0, %v7014_v9 }
 0x137   :  { %829 = vmatpush1.bf16.msra.mxu0 %v7024_v12  ;;  %880 = vmatpush1.bf16.msra.mxu1 %v7034_v14 }
 0x138   :  { %942 = vmatprep.subr.bf16.mxu0 %v7019_v11  ;;  %993 = vmatprep.subr.bf16.mxu1 %v7029_v13 }
 0x139   :  { %5622 = vmatmul.mubr.msk.bf16.gmra.mrb[20].mxu0 %vm123_vm1, %v6466_v58  ;;  %5625 = vmatmul.mubr.msk.bf16.gmra.mrb[20].mxu1 %vm123_vm1, %v6466_v58 }
 0x13a   :  { %858 = vmatprep.mubr.bf16.mxu0 %v8539_v1  ;;  %909 = vmatprep.mubr.bf16.mxu1 %v8539_v1 }
 0x1fc   :  { %v556_v60 = vpop.f32.mrb[16].mxu0  ;;  %v607_v61 = vpop.f32.mrb[16].mxu1 }
 0x1fd   :  { %v558_v62 = vpop.f32.mrb[17].mxu0  ;;  %v609_v63 = vpop.f32.mrb[17].mxu1 }
 0x1fe   :  { %v560_v5 = vpop.f32.mrb[18].mxu0  ;;  %v611_v7 = vpop.f32.mrb[18].mxu1 }
 0x1ff   :  { %v561_v8 = vpop.f32.mrb[19].mxu0  ;;  %v612_v10 = vpop.f32.mrb[19].mxu1 }
 0x204   :  { %v662_v15 = vpop.f32.mrb[12].mxu0  ;;  %v713_v18 = vpop.f32.mrb[12].mxu1 }
 0x205   :  { %v730_v20 = vadd.f32 %v662_v15, %v7118_v40  ;;  %v664_v22 = vpop.f32.mrb[13].mxu0  ;;  %v715_v25 = vpop.f32.mrb[13].mxu1  ;;  %v772_v31 = vadd.f32 %v713_v18, %v7129_v49 }
 0x206   :  { %v751_v27 = vadd.f32 %v664_v22, %v7123_v42  ;;  %v666_v34 = vpop.f32.mrb[14].mxu0  ;;  %v717_v35 = vpop.f32.mrb[14].mxu1  ;;  %v793_v52 = vadd.f32 %v715_v25, %v7136_v59 }
 0x207   :  { %v5626_v38 = vmul.f32 -1.442695, %v730_v20  ;;  %v731_v39 = vadd.f32 %v666_v34, %v7118_v40  ;;  %v668_v43 = vpop.f32.mrb[15].mxu0  ;;  %v719_v44 = vpop.f32.mrb[15].mxu1  ;;  %v773_v47 = vadd.f32 %v717_v35, %v7129_v49  ;;  %v5632_v57 = vmul.f32 -1.442695, %v772_v31 }
 0x208   :  { %v5629_v29 = vmul.f32 -1.442695, %v751_v27  ;;  %v752_v30 = vadd.f32 %v668_v43, %v7123_v42  ;;  %v794_v25 = vadd.f32 %v719_v44, %v7136_v59 }
 0x209   :  { %6563 = vpow2.f32 %v5626_v38  ;;  %v5627_v46 = vmul.f32 -1.442695, %v731_v39  ;;  %v5633_v20 = vmul.f32 -1.442695, %v773_v47 }
 0x20a   :  { %v5630_v32 = vmul.f32 -1.442695, %v752_v30  ;;  %6565 = vpow2.f32 %v5629_v29 }
 0x20b   :  { %6567 = vpow2.f32 %v5627_v46 }
 0x20c   :  { %v672_v50 = vpop.f32.mrb[20].mxu0  ;;  %v723_v51 = vpop.f32.mrb[20].mxu1  ;;  %6569 = vpow2.f32 %v5630_v32 }
 0x20d   :  { %v673_v53 = vadd.f32 %v672_v50, %v556_v60  ;;  %v724_v54 = vadd.f32 %v723_v51, %v607_v61  ;;  %v674_v55 = vpop.f32.mrb[21].mxu0  ;;  %v725_v56 = vpop.f32.mrb[21].mxu1  ;;  %6571 = vtanh.f32 %v793_v52 }
 0x20e   :  { %v675_v58 = vadd.f32 %v674_v55, %v558_v62  ;;  %v726_v5 = vadd.f32 %v725_v56, %v609_v63  ;;  %v676_v7 = vpop.f32.mrb[22].mxu0  ;;  %v727_v8 = vpop.f32.mrb[22].mxu1  ;;  %6573 = vpow2.f32 %v5632_v57 }
 0x20f   :  { %v732_v10 = vadd.f32 %v673_v53, %v7118_v40  ;;  %v677_v15 = vpop.f32.mrb[23].mxu0  ;;  %v728_v18 = vpop.f32.mrb[23].mxu1  ;;  %v774_v39 = vadd.f32 %v724_v54, %v7129_v49 }
 0x210   :  { %v753_v22 = vadd.f32 %v675_v58, %v7123_v42  ;;  %v795_v30 = vadd.f32 %v726_v5, %v7136_v59 }
 0x211   :  { %v5628_v27 = vmul.f32 -1.442695, %v732_v10  ;;  %v5634_v44 = vmul.f32 -1.442695, %v774_v39 }
 0x212   :  { %v5631_v60 = vmul.f32 -1.442695, %v753_v22 }
 0x213   :  { %v6564_v61 = vpop.eup %6563  ;;  %6575 = vpow2.f32 %v5628_v27 }
 0x214   :  { %v742_v34 = vadd.f32 1.0, %v6564_v61  ;;  %6577 = vpow2.f32 %v5633_v20  ;;  %v6566_v62 = vpop.eup %6565 }
 0x215   :  { %6579 = vpow2.f32 %v5631_v60  ;;  %v6568_v63 = vpop.eup %6567  ;;  %v763_v35 = vadd.f32 1.0, %v6566_v62 }
 0x216   :  { %6581 = vrcp.f32 %v742_v34  ;;  %v743_v38 = vadd.f32 1.0, %v6568_v63  ;;  %v6570_v43 = vpop.eup %6569 }
 0x217   :  { %6583 = vtanh.f32 %v794_v25  ;;  %v764_v29 = vadd.f32 1.0, %v6570_v43  ;;  %v6572_v46 = vpop.eup %6571 }
 0x218   :  { %6585 = vrcp.f32 %v763_v35  ;;  %v6574_v31 = vpop.eup %6573 }
 0x219   :  { %6587 = vrcp.f32 %v743_v38  ;;  %v784_v58 = vadd.f32 1.0, %v6574_v31  ;;  %v6467_v31 = vld [vmem:[%s8533_s0 + $0x18] sm:$0xff]  }
 0x21a   :  { %6589 = vrcp.f32 %v764_v29 }
 0x21b   :  { %6591 = vtanh.f32 %v795_v30 }
 0x21c   :  { %6593 = vpow2.f32 %v5634_v44 }
 0x21d   :  { %v6576_v32 = vpop.eup %6575 }
 0x21e   :  { %v6578_v47 = vpop.eup %6577  ;;  %v744_v50 = vadd.f32 1.0, %v6576_v32 }
 0x21f   :  { %v6580_v51 = vpop.eup %6579  ;;  %v785_v15 = vadd.f32 1.0, %v6578_v47 }
 0x220   :  { %v6582_v52 = vpop.eup %6581  ;;  %6595 = vrcp.f32 %v744_v50  ;;  %v765_v53 = vadd.f32 1.0, %v6580_v51 }
 0x221   :  { %v6584_v54 = vpop.eup %6583  ;;  %v802_v55 = vmul.f32 %v6582_v52, %v6572_v46 }
 0x222   :  { %v6586_v56 = vpop.eup %6585  ;;  %6597 = vrcp.f32 %v765_v53 }
 0x223   :  { %v6588_v57 = vpop.eup %6587  ;;  %v799_v5 = vmul.f32 %v6586_v56, %v7146_v26  ;;  %6599 = vrcp.f32 %v784_v58 }
 0x224   :  { %v803_v7 = vmul.f32 %v6588_v57, %v6584_v54  ;;  %v6590_v8 = vpop.eup %6589 }
 0x225   :  { %v7210_v10 = vadd.f32 %v802_v55, %v799_v5  ;;  %v800_v18 = vmul.f32 %v6590_v8, %v7149_v36  ;;  %v6592_v20 = vpop.eup %6591 }
 0x226   :  { %v6594_v27 = vpop.eup %6593 }
 0x227   :  { %6601 = vtanh.f32 %v7210_v10  ;;  %v7214_v22 = vadd.f32 %v803_v7, %v800_v18  ;;  %v786_v25 = vadd.f32 1.0, %v6594_v27 }
 0x228   :  { %6603 = vrcp.f32 %v785_v15 }
 0x229   :  { %6605 = vtanh.f32 %v7214_v22 }
 0x22a   :  { %v6596_v60 = vpop.eup %6595  ;;  %6607 = vrcp.f32 %v786_v25 }
 0x22b   :  { %v804_v61 = vmul.f32 %v6596_v60, %v6592_v20 }
 0x22c   :  { %v6598_v26 = vpop.eup %6597 }
 0x22d   :  { %v801_v34 = vmul.f32 %v6598_v26, %v7152_v45  ;;  %v6600_v36 = vpop.eup %6599 }
 0x22f   :  { %v7218_v62 = vadd.f32 %v804_v61, %v801_v34 }
 0x231   :  { %6609 = vtanh.f32 %v7218_v62  ;;  %v6602_v63 = vpop.eup %6601 }
 0x232   :  { %v6604_v35 = vpop.eup %6603  ;;  %v811_v39 = vmul.f32 %v6602_v63, %v6600_v36 }
 0x233   :  { %v6606_v38 = vpop.eup %6605 }
 0x234   :  { %v812_v43 = vmul.f32 %v6606_v38, %v6604_v35  ;;  %v6608_v30 = vpop.eup %6607 }
 0x236   :  { %v818_v29 = vpack.c.bf16 %v812_v43, %v811_v39 }
 0x238   :  { %5639 = vmatmul.mubr.msk.bf16.vlgmr.msra.gmra.mrb[24].mxu0 %vm123_vm1, %v818_v29  ;;  %5642 = vmatmul.mubr.msk.bf16.vlgmr.msra.gmra.mrb[24].mxu1 %vm123_vm1, %v818_v29 }
 0x239   :  { %943 = vmatpush1.bf16.msra.mxu0 %v7042_v16  ;;  %868 = vmatprep.mubr.bf16.mxu0 %v8539_v1 }
 0x23a   :  { %919 = vmatprep.mubr.bf16.mxu1 %v8539_v1  ;;  %5646 = vmatprep.subr.msk.bf16.mxu0 %vm127_vm0, %v7055_v19 }
 0x23b   :  { %v6610_v45 = vpop.eup %6609  ;;  %994 = vmatpush1.bf16.msra.mxu1 %v7049_v17 }
 0x23c   :  { %v813_v46 = vmul.f32 %v6610_v45, %v6608_v30  ;;  %5649 = vmatprep.subr.msk.bf16.mxu1 %vm127_vm0, %v7060_v21 }
 0x23d   :  { %945 = vmatpush1.bf16.msra.mxu0 %v7068_v23 }
 0x23e   :  { %v819_v44 = vpack.c.bf16 %v813_v46, %v813_v46  ;;  %1140 = vmatprep.subr.bf16.mxu0 %v6983_v0  ;;  %v6468_v0 = vld [vmem:[%s8533_s0 + $0x20] ss:$0 sps:$4 sm:$0xff]  }
 0x23f   :  { %996 = vmatpush1.bf16.msra.mxu1 %v7074_v24 }
 0x240   :  { %5640 = vmatmul.mubr.msk.bf16.gmra.mrb[28].mxu0 %vm123_vm1, %v819_v44  ;;  %5643 = vmatmul.mubr.msk.bf16.gmra.mrb[28].mxu1 %vm123_vm1, %v819_v44 }
 0x241   :  { %974 = vmatprep.mubr.bf16.mxu0 %v8539_v1  ;;  %1025 = vmatprep.mubr.bf16.mxu1 %v8539_v1 }
 0x242   :  { %1191 = vmatprep.subr.bf16.mxu1 %v6990_v2 }
 0x248   :  { %5647 = vmatmul.mubr.msk.bf16.vlgmr.msra.gmra.mrb[24].mxu0 %vm123_vm1, %v6467_v31  ;;  %5650 = vmatmul.mubr.msk.bf16.vlgmr.msra.gmra.mrb[24].mxu1 %vm123_vm1, %v6467_v31 }
 0x249   :  { %984 = vmatprep.mubr.bf16.mxu0 %v8539_v1  ;;  %1035 = vmatprep.mubr.bf16.mxu1 %v8539_v1 }
 0x24a   :  { %1141 = vmatpush1.bf16.msra.mxu0 %v6996_v3  ;;  %1192 = vmatpush1.bf16.msra.mxu1 %v7001_v4 }
 0x24b   :  { %5664 = vmatprep.subr.msk.bf16.mxu0 %vm127_vm0, %v7007_v6  ;;  %5667 = vmatprep.subr.msk.bf16.mxu1 %vm127_vm0, %v7014_v9 }
 0x24e   :  { %1143 = vmatpush1.bf16.msra.mxu0 %v7024_v12  ;;  %1194 = vmatpush1.bf16.msra.mxu1 %v7034_v14 }
 0x24f   :  { %1256 = vmatprep.subr.bf16.mxu0 %v7019_v11  ;;  %1307 = vmatprep.subr.bf16.mxu1 %v7029_v13 }
 0x250   :  { %5648 = vmatmul.mubr.msk.bf16.gmra.mrb[32].mxu0 %vm123_vm1, %v6468_v0  ;;  %5651 = vmatmul.mubr.msk.bf16.gmra.mrb[32].mxu1 %vm123_vm1, %v6468_v0 }
 0x251   :  { %1172 = vmatprep.mubr.bf16.mxu0 %v8539_v1  ;;  %1223 = vmatprep.mubr.bf16.mxu1 %v8539_v1 }
 0x313   :  { %v870_v2 = vpop.f32.mrb[28].mxu0  ;;  %v921_v3 = vpop.f32.mrb[28].mxu1 }
 0x314   :  { %v872_v4 = vpop.f32.mrb[29].mxu0  ;;  %v923_v32 = vpop.f32.mrb[29].mxu1 }
 0x315   :  { %v874_v47 = vpop.f32.mrb[30].mxu0  ;;  %v925_v50 = vpop.f32.mrb[30].mxu1 }
 0x316   :  { %v875_v51 = vpop.f32.mrb[31].mxu0  ;;  %v926_v52 = vpop.f32.mrb[31].mxu1 }
 0x31b   :  { %v976_v53 = vpop.f32.mrb[24].mxu0  ;;  %v1027_v11 = vpop.f32.mrb[24].mxu1 }
 0x31c   :  { %v1044_v13 = vadd.f32 %v976_v53, %v7118_v40  ;;  %v978_v54 = vpop.f32.mrb[25].mxu0  ;;  %v1029_v55 = vpop.f32.mrb[25].mxu1  ;;  %v1086_v60 = vadd.f32 %v1027_v11, %v7129_v49 }
 0x31d   :  { %v1065_v56 = vadd.f32 %v978_v54, %v7123_v42  ;;  %v980_v57 = vpop.f32.mrb[26].mxu0  ;;  %v1031_v58 = vpop.f32.mrb[26].mxu1  ;;  %v1107_v36 = vadd.f32 %v1029_v55, %v7136_v59 }
 0x31e   :  { %v5652_v5 = vmul.f32 -1.442695, %v1044_v13  ;;  %v1045_v7 = vadd.f32 %v980_v57, %v7118_v40  ;;  %v982_v8 = vpop.f32.mrb[27].mxu0  ;;  %v1033_v15 = vpop.f32.mrb[27].mxu1  ;;  %v1087_v26 = vadd.f32 %v1031_v58, %v7129_v49  ;;  %v5658_v43 = vmul.f32 -1.442695, %v1086_v60 }
 0x31f   :  { %v5655_v18 = vmul.f32 -1.442695, %v1065_v56  ;;  %v1066_v20 = vadd.f32 %v982_v8, %v7123_v42  ;;  %v1108_v52 = vadd.f32 %v1033_v15, %v7136_v59 }
 0x320   :  { %6611 = vpow2.f32 %v5652_v5  ;;  %v5653_v27 = vmul.f32 -1.442695, %v1045_v7  ;;  %v5659_v47 = vmul.f32 -1.442695, %v1087_v26 }
 0x321   :  { %v5656_v61 = vmul.f32 -1.442695, %v1066_v20  ;;  %6613 = vpow2.f32 %v5655_v18 }
 0x322   :  { %6615 = vpow2.f32 %v5653_v27 }
 0x323   :  { %v986_v25 = vpop.f32.mrb[32].mxu0  ;;  %v1037_v34 = vpop.f32.mrb[32].mxu1  ;;  %6617 = vpow2.f32 %v5656_v61 }
 0x324   :  { %v987_v63 = vadd.f32 %v986_v25, %v870_v2  ;;  %v1038_v35 = vadd.f32 %v1037_v34, %v921_v3  ;;  %v988_v38 = vpop.f32.mrb[33].mxu0  ;;  %v1039_v39 = vpop.f32.mrb[33].mxu1  ;;  %6619 = vtanh.f32 %v1107_v36 }
 0x325   :  { %v989_v29 = vadd.f32 %v988_v38, %v872_v4  ;;  %v1040_v30 = vadd.f32 %v1039_v39, %v923_v32  ;;  %v990_v45 = vpop.f32.mrb[34].mxu0  ;;  %v1041_v46 = vpop.f32.mrb[34].mxu1  ;;  %6621 = vpow2.f32 %v5658_v43 }
 0x326   :  { %v1046_v44 = vadd.f32 %v987_v63, %v7118_v40  ;;  %v991_v31 = vpop.f32.mrb[35].mxu0  ;;  %v1042_v0 = vpop.f32.mrb[35].mxu1  ;;  %v1088_v54 = vadd.f32 %v1038_v35, %v7129_v49 }
 0x327   :  { %v1067_v50 = vadd.f32 %v989_v29, %v7123_v42  ;;  %v1109_v57 = vadd.f32 %v1040_v30, %v7136_v59 }
 0x328   :  { %v5654_v51 = vmul.f32 -1.442695, %v1046_v44  ;;  %v5660_v5 = vmul.f32 -1.442695, %v1088_v54  ;;  %v6469_v54 = vld [vmem:[%s8533_s0 + $0x24] sm:$0xff]  }
 0x329   :  { %v5657_v2 = vmul.f32 -1.442695, %v1067_v50 }
 0x32a   :  { %v6612_v3 = vpop.eup %6611  ;;  %6623 = vpow2.f32 %v5654_v51 }
 0x32b   :  { %v1056_v53 = vadd.f32 1.0, %v6612_v3  ;;  %6625 = vpow2.f32 %v5659_v47  ;;  %v6614_v4 = vpop.eup %6613 }
 0x32c   :  { %6627 = vpow2.f32 %v5657_v2  ;;  %v6616_v32 = vpop.eup %6615  ;;  %v1077_v11 = vadd.f32 1.0, %v6614_v4 }
 0x32d   :  { %6629 = vrcp.f32 %v1056_v53  ;;  %v1057_v13 = vadd.f32 1.0, %v6616_v32  ;;  %v6618_v55 = vpop.eup %6617 }
 0x32e   :  { %6631 = vtanh.f32 %v1108_v52  ;;  %v1078_v56 = vadd.f32 1.0, %v6618_v55  ;;  %v6620_v58 = vpop.eup %6619  ;;  %v6913_v55 = vld [vmem:[%s8532_s2 + $0x30] ss:$16 sps:$4 sm:$0xff]  }
 0x32f   :  { %6633 = vrcp.f32 %v1077_v11  ;;  %v6622_v7 = vpop.eup %6621 }
 0x330   :  { %6635 = vrcp.f32 %v1057_v13  ;;  %v1098_v36 = vadd.f32 1.0, %v6622_v7 }
 0x331   :  { %6637 = vrcp.f32 %v1078_v56  ;;  %v6914_v56 = vld [vmem:[%s8532_s2 + $0x38] ss:$16 sps:$4 sm:$0xff]  }
 0x332   :  { %6639 = vtanh.f32 %v1109_v57  ;;  %v6470_v57 = vld [vmem:[%s8533_s0 + $0x2c] ss:$0 sps:$4 sm:$0xff]  }
 0x333   :  { %6641 = vpow2.f32 %v5660_v5 }
 0x334   :  { %v6624_v8 = vpop.eup %6623 }
 0x335   :  { %v6626_v15 = vpop.eup %6625  ;;  %v1058_v18 = vadd.f32 1.0, %v6624_v8 }
 0x336   :  { %v6628_v20 = vpop.eup %6627  ;;  %v1099_v43 = vadd.f32 1.0, %v6626_v15 }
 0x337   :  { %v6630_v27 = vpop.eup %6629  ;;  %6643 = vrcp.f32 %v1058_v18  ;;  %v1079_v60 = vadd.f32 1.0, %v6628_v20 }
 0x338   :  { %v6632_v61 = vpop.eup %6631  ;;  %v1116_v26 = vmul.f32 %v6630_v27, %v6620_v58  ;;  %v6915_v58 = vld [vmem:[%s8532_s2 + $0x4] ss:$16 sps:$4 sm:$0xff]  }
 0x339   :  { %v6634_v25 = vpop.eup %6633  ;;  %6645 = vrcp.f32 %v1079_v60 }
 0x33a   :  { %v6636_v34 = vpop.eup %6635  ;;  %v1113_v63 = vmul.f32 %v6634_v25, %v7210_v10  ;;  %6647 = vrcp.f32 %v1098_v36 }
 0x33b   :  { %v1117_v35 = vmul.f32 %v6636_v34, %v6632_v61  ;;  %v6638_v38 = vpop.eup %6637 }
 0x33c   :  { %v7276_v39 = vadd.f32 %v1116_v26, %v1113_v63  ;;  %v1114_v29 = vmul.f32 %v6638_v38, %v7214_v22  ;;  %v6640_v30 = vpop.eup %6639 }
 0x33d   :  { %v6642_v46 = vpop.eup %6641 }
 0x33e   :  { %6649 = vtanh.f32 %v7276_v39  ;;  %v7280_v45 = vadd.f32 %v1117_v35, %v1114_v29  ;;  %v1100_v0 = vadd.f32 1.0, %v6642_v46 }
 0x33f   :  { %6651 = vrcp.f32 %v1099_v43 }
 0x340   :  { %6653 = vtanh.f32 %v7280_v45 }
 0x341   :  { %v6644_v44 = vpop.eup %6643  ;;  %6655 = vrcp.f32 %v1100_v0 }
 0x342   :  { %v1118_v31 = vmul.f32 %v6644_v44, %v6640_v30 }
 0x343   :  { %v6646_v10 = vpop.eup %6645 }
 0x344   :  { %v1115_v47 = vmul.f32 %v6646_v10, %v7218_v62  ;;  %v6648_v22 = vpop.eup %6647 }
 0x346   :  { %v7284_v50 = vadd.f32 %v1118_v31, %v1115_v47 }
 0x348   :  { %6657 = vtanh.f32 %v7284_v50  ;;  %v6650_v51 = vpop.eup %6649 }
 0x349   :  { %v6652_v2 = vpop.eup %6651  ;;  %v1125_v52 = vmul.f32 %v6650_v51, %v6648_v22 }
 0x34a   :  { %v6654_v3 = vpop.eup %6653 }
 0x34b   :  { %v1126_v53 = vmul.f32 %v6654_v3, %v6652_v2  ;;  %v6656_v32 = vpop.eup %6655 }
 0x34d   :  { %v1132_v4 = vpack.c.bf16 %v1126_v53, %v1125_v52 }
 0x34f   :  { %5665 = vmatmul.mubr.msk.bf16.vlgmr.msra.gmra.mrb[36].mxu0 %vm123_vm1, %v1132_v4  ;;  %5668 = vmatmul.mubr.msk.bf16.vlgmr.msra.gmra.mrb[36].mxu1 %vm123_vm1, %v1132_v4 }
 0x350   :  { %1257 = vmatpush1.bf16.msra.mxu0 %v7042_v16  ;;  %1182 = vmatprep.mubr.bf16.mxu0 %v8539_v1  ;;  %v6911_v16 = vld [vmem:[%s8532_s2 + $0x34] ss:$16 sps:$4 sm:$0xff]  }
 0x351   :  { %1233 = vmatprep.mubr.bf16.mxu1 %v8539_v1  ;;  %5672 = vmatprep.subr.msk.bf16.mxu0 %vm127_vm0, %v7055_v19 }
 0x352   :  { %v6658_v62 = vpop.eup %6657  ;;  %1308 = vmatpush1.bf16.msra.mxu1 %v7049_v17  ;;  %v6912_v17 = vld [vmem:[%s8532_s2 + $0x3c] ss:$16 sps:$4 sm:$0xff]  }
 0x353   :  { %v1127_v11 = vmul.f32 %v6658_v62, %v6656_v32  ;;  %5675 = vmatprep.subr.msk.bf16.mxu1 %vm127_vm0, %v7060_v21 }
 0x354   :  { %1259 = vmatpush1.bf16.msra.mxu0 %v7068_v23 }
 0x355   :  { %v1133_v13 = vpack.c.bf16 %v1127_v11, %v1127_v11  ;;  %1454 = vmatprep.subr.bf16.mxu0 %v6911_v16 }
 0x356   :  { %1310 = vmatpush1.bf16.msra.mxu1 %v7074_v24 }
 0x357   :  { %5666 = vmatmul.mubr.msk.bf16.gmra.mrb[40].mxu0 %vm123_vm1, %v1133_v13  ;;  %5669 = vmatmul.mubr.msk.bf16.gmra.mrb[40].mxu1 %vm123_vm1, %v1133_v13 }
 0x358   :  { %1288 = vmatprep.mubr.bf16.mxu0 %v8539_v1  ;;  %1339 = vmatprep.mubr.bf16.mxu1 %v8539_v1 }
 0x359   :  { %1505 = vmatprep.subr.bf16.mxu1 %v6912_v17 }
 0x35f   :  { %5673 = vmatmul.mubr.msk.bf16.vlgmr.msra.gmra.mrb[36].mxu0 %vm123_vm1, %v6469_v54  ;;  %5676 = vmatmul.mubr.msk.bf16.vlgmr.msra.gmra.mrb[36].mxu1 %vm123_vm1, %v6469_v54 }
 0x360   :  { %1298 = vmatprep.mubr.bf16.mxu0 %v8539_v1  ;;  %1349 = vmatprep.mubr.bf16.mxu1 %v8539_v1 }
 0x361   :  { %1455 = vmatpush1.bf16.msra.mxu0 %v6913_v55  ;;  %1506 = vmatpush1.bf16.msra.mxu1 %v6914_v56 }
 0x362   :  { %5690 = vmatprep.subr.msk.bf16.mxu0 %vm127_vm0, %v7007_v6  ;;  %5693 = vmatprep.subr.msk.bf16.mxu1 %vm127_vm0, %v7014_v9  ;;  %v6916_v6 = vld [vmem:[%s8532_s2 + $0xc] ss:$16 sps:$4 sm:$0xff]  }
 0x365   :  { %1457 = vmatpush1.bf16.msra.mxu0 %v7024_v12  ;;  %1508 = vmatpush1.bf16.msra.mxu1 %v7034_v14 }
 0x366   :  { %1570 = vmatprep.subr.bf16.mxu0 %v6915_v58  ;;  %1621 = vmatprep.subr.bf16.mxu1 %v6916_v6 }
 0x367   :  { %5674 = vmatmul.mubr.msk.bf16.gmra.mrb[44].mxu0 %vm123_vm1, %v6470_v57  ;;  %5677 = vmatmul.mubr.msk.bf16.gmra.mrb[44].mxu1 %vm123_vm1, %v6470_v57 }
 0x368   :  { %1486 = vmatprep.mubr.bf16.mxu0 %v8539_v1  ;;  %1537 = vmatprep.mubr.bf16.mxu1 %v8539_v1 }
 0x42a   :  { %v1184_v9 = vpop.f32.mrb[40].mxu0  ;;  %v1235_v12 = vpop.f32.mrb[40].mxu1 }
 0x42b   :  { %v1186_v14 = vpop.f32.mrb[41].mxu0  ;;  %v1237_v5 = vpop.f32.mrb[41].mxu1 }
 0x42c   :  { %v1188_v7 = vpop.f32.mrb[42].mxu0  ;;  %v1239_v8 = vpop.f32.mrb[42].mxu1 }
 0x42d   :  { %v1189_v15 = vpop.f32.mrb[43].mxu0  ;;  %v1240_v18 = vpop.f32.mrb[43].mxu1 }
 0x432   :  { %v1290_v20 = vpop.f32.mrb[36].mxu0  ;;  %v1341_v27 = vpop.f32.mrb[36].mxu1 }
 0x433   :  { %v1358_v60 = vadd.f32 %v1290_v20, %v7118_v40  ;;  %v1292_v61 = vpop.f32.mrb[37].mxu0  ;;  %v1343_v26 = vpop.f32.mrb[37].mxu1  ;;  %v1400_v44 = vadd.f32 %v1341_v27, %v7129_v49 }
 0x434   :  { %v1379_v25 = vadd.f32 %v1292_v61, %v7123_v42  ;;  %v1294_v34 = vpop.f32.mrb[38].mxu0  ;;  %v1345_v36 = vpop.f32.mrb[38].mxu1  ;;  %v1421_v22 = vadd.f32 %v1343_v26, %v7136_v59 }
 0x435   :  { %v5678_v63 = vmul.f32 -1.442695, %v1358_v60  ;;  %v1359_v35 = vadd.f32 %v1294_v34, %v7118_v40  ;;  %v1296_v38 = vpop.f32.mrb[39].mxu0  ;;  %v1347_v43 = vpop.f32.mrb[39].mxu1  ;;  %v1401_v10 = vadd.f32 %v1345_v36, %v7129_v49  ;;  %v5684_v53 = vmul.f32 -1.442695, %v1400_v44 }
 0x436   :  { %v5681_v29 = vmul.f32 -1.442695, %v1379_v25  ;;  %v1380_v30 = vadd.f32 %v1296_v38, %v7123_v42  ;;  %v1422_v6 = vadd.f32 %v1347_v43, %v7136_v59 }
 0x437   :  { %6659 = vpow2.f32 %v5678_v63  ;;  %v5679_v46 = vmul.f32 -1.442695, %v1359_v35  ;;  %v5685_v54 = vmul.f32 -1.442695, %v1401_v10 }
 0x438   :  { %v5682_v31 = vmul.f32 -1.442695, %v1380_v30  ;;  %6661 = vpow2.f32 %v5681_v29 }
 0x439   :  { %6663 = vpow2.f32 %v5679_v46 }
 0x43a   :  { %v1300_v0 = vpop.f32.mrb[44].mxu0  ;;  %v1351_v47 = vpop.f32.mrb[44].mxu1  ;;  %6665 = vpow2.f32 %v5682_v31 }
 0x43b   :  { %v1301_v51 = vadd.f32 %v1300_v0, %v1184_v9  ;;  %v1352_v2 = vadd.f32 %v1351_v47, %v1235_v12  ;;  %v1302_v3 = vpop.f32.mrb[45].mxu0  ;;  %v1353_v52 = vpop.f32.mrb[45].mxu1  ;;  %6667 = vtanh.f32 %v1421_v22 }
 0x43c   :  { %v1303_v4 = vadd.f32 %v1302_v3, %v1186_v14  ;;  %v1354_v32 = vadd.f32 %v1353_v52, %v1237_v5  ;;  %v1304_v62 = vpop.f32.mrb[46].mxu0  ;;  %v1355_v11 = vpop.f32.mrb[46].mxu1  ;;  %6669 = vpow2.f32 %v5684_v53 }
 0x43d   :  { %v1360_v13 = vadd.f32 %v1301_v51, %v7118_v40  ;;  %v1305_v16 = vpop.f32.mrb[47].mxu0  ;;  %v1356_v17 = vpop.f32.mrb[47].mxu1  ;;  %v1402_v8 = vadd.f32 %v1352_v2, %v7129_v49 }
 0x43e   :  { %v1381_v55 = vadd.f32 %v1303_v4, %v7123_v42  ;;  %v1423_v20 = vadd.f32 %v1354_v32, %v7136_v59 }
 0x43f   :  { %v5680_v56 = vmul.f32 -1.442695, %v1360_v13  ;;  %v5686_v60 = vmul.f32 -1.442695, %v1402_v8 }
 0x440   :  { %v5683_v57 = vmul.f32 -1.442695, %v1381_v55 }
 0x441   :  { %v6660_v58 = vpop.eup %6659  ;;  %6671 = vpow2.f32 %v5680_v56 }
 0x442   :  { %v1370_v9 = vadd.f32 1.0, %v6660_v58  ;;  %6673 = vpow2.f32 %v5685_v54  ;;  %v6662_v12 = vpop.eup %6661 }
 0x443   :  { %6675 = vpow2.f32 %v5683_v57  ;;  %v6664_v14 = vpop.eup %6663  ;;  %v1391_v5 = vadd.f32 1.0, %v6662_v12  ;;  %v6474_v12 = vld [vmem:[%s8535_s3 + $0xc] sm:$0xff]  }
 0x444   :  { %6677 = vrcp.f32 %v1370_v9  ;;  %v1371_v7 = vadd.f32 1.0, %v6664_v14  ;;  %v6666_v15 = vpop.eup %6665  ;;  %v6475_v14 = vld [vmem:[%s8535_s3 + $0x8] ss:$0 sps:$4 sm:$0xff]  }
 0x445   :  { %6679 = vtanh.f32 %v1422_v6  ;;  %v1392_v18 = vadd.f32 1.0, %v6666_v15  ;;  %v6668_v27 = vpop.eup %6667  ;;  %v6918_v6 = vld [vmem:[%s8532_s2 + $0x8] ss:$16 sps:$4 sm:$0xff]   ;;  %v7422_v15 = vld [vmem:[%s8532_s2 + $0x94] ss:$16 sps:$4 sm:$0xff]  }
 0x446   :  { %6681 = vrcp.f32 %v1391_v5  ;;  %v6670_v61 = vpop.eup %6669  ;;  %v6476_v5 = vld [vmem:[%s8535_s3 + $0x14] ss:$0 sps:$4 sm:$0xff]  }
 0x447   :  { %6683 = vrcp.f32 %v1371_v7  ;;  %v1412_v46 = vadd.f32 1.0, %v6670_v61  ;;  %v1826_v7 = vsel %vm127_vm0, %v6475_v14, 0  ;;  %v1771_v8 = vsel %vm127_vm0, %v6476_v5, 0 }
 0x448   :  { %6685 = vrcp.f32 %v1392_v18 }
 0x449   :  { %6687 = vtanh.f32 %v1423_v20 }
 0x44a   :  { %6689 = vpow2.f32 %v5686_v60 }
 0x44b   :  { %v6672_v26 = vpop.eup %6671 }
 0x44c   :  { %v6674_v25 = vpop.eup %6673  ;;  %v1372_v34 = vadd.f32 1.0, %v6672_v26 }
 0x44d   :  { %v6676_v36 = vpop.eup %6675  ;;  %v1413_v47 = vadd.f32 1.0, %v6674_v25 }
 0x44e   :  { %v6678_v63 = vpop.eup %6677  ;;  %6691 = vrcp.f32 %v1372_v34  ;;  %v1393_v35 = vadd.f32 1.0, %v6676_v36 }
 0x44f   :  { %v6680_v38 = vpop.eup %6679  ;;  %v1430_v43 = vmul.f32 %v6678_v63, %v6668_v27 }
 0x450   :  { %v6682_v29 = vpop.eup %6681  ;;  %6693 = vrcp.f32 %v1393_v35 }
 0x451   :  { %v6684_v30 = vpop.eup %6683  ;;  %v1427_v44 = vmul.f32 %v6682_v29, %v7276_v39  ;;  %6695 = vrcp.f32 %v1412_v46 }
 0x452   :  { %v1431_v31 = vmul.f32 %v6684_v30, %v6680_v38  ;;  %v6686_v10 = vpop.eup %6685 }
 0x453   :  { %v7354_v0 = vadd.f32 %v1430_v43, %v1427_v44  ;;  %v1428_v22 = vmul.f32 %v6686_v10, %v7280_v45  ;;  %v6688_v51 = vpop.eup %6687 }
 0x454   :  { %v6690_v3 = vpop.eup %6689 }
 0x455   :  { %6697 = vtanh.f32 %v7354_v0  ;;  %v7358_v2 = vadd.f32 %v1431_v31, %v1428_v22  ;;  %v1414_v4 = vadd.f32 1.0, %v6690_v3 }
 0x456   :  { %6699 = vrcp.f32 %v1413_v47 }
 0x457   :  { %6701 = vtanh.f32 %v7358_v2 }
 0x458   :  { %v6692_v52 = vpop.eup %6691  ;;  %6703 = vrcp.f32 %v1414_v4 }
 0x459   :  { %v1432_v53 = vmul.f32 %v6692_v52, %v6688_v51 }
 0x45a   :  { %v6694_v39 = vpop.eup %6693 }
 0x45b   :  { %v1429_v32 = vmul.f32 %v6694_v39, %v7284_v50  ;;  %v6696_v45 = vpop.eup %6695  ;;  %v6917_v50 = vld [vmem:[%s8532_s2] ss:$16 sps:$4 sm:$0xff]  }
 0x45d   :  { %v7362_v62 = vadd.f32 %v1432_v53, %v1429_v32 }
 0x45f   :  { %6705 = vtanh.f32 %v7362_v62  ;;  %v6698_v11 = vpop.eup %6697 }
 0x460   :  { %v6700_v13 = vpop.eup %6699  ;;  %v1439_v17 = vmul.f32 %v6698_v11, %v6696_v45 }
 0x461   :  { %v6702_v16 = vpop.eup %6701 }
 0x462   :  { %v1440_v54 = vmul.f32 %v6702_v16, %v6700_v13  ;;  %v6704_v56 = vpop.eup %6703 }
 0x464   :  { %v1446_v55 = vpack.c.bf16 %v1440_v54, %v1439_v17 }
 0x466   :  { %5691 = vmatmul.mubr.msk.bf16.vlgmr.msra.gmra.mrb[48].mxu0 %vm123_vm1, %v1446_v55  ;;  %5694 = vmatmul.mubr.msk.bf16.vlgmr.msra.gmra.mrb[48].mxu1 %vm123_vm1, %v1446_v55 }
 0x467   :  { %1571 = vmatpush1.bf16.msra.mxu0 %v6917_v50  ;;  %1496 = vmatprep.mubr.bf16.mxu0 %v8539_v1 }
 0x468   :  { %1547 = vmatprep.mubr.bf16.mxu1 %v8539_v1  ;;  %5698 = vmatprep.subr.msk.bf16.mxu0 %vm127_vm0, %v7055_v19  ;;  %v6471_v19 = vld [vmem:[%s8533_s0 + $0x30] sm:$0xff]  }
 0x469   :  { %v6706_v57 = vpop.eup %6705  ;;  %1622 = vmatpush1.bf16.msra.mxu1 %v6918_v6 }
 0x46a   :  { %v1441_v58 = vmul.f32 %v6706_v57, %v6704_v56  ;;  %5701 = vmatprep.subr.msk.bf16.mxu1 %vm127_vm0, %v7060_v21  ;;  %v6472_v21 = vld [vmem:[%s8533_s0 + $0x38] ss:$0 sps:$4 sm:$0xff]  }
 0x46b   :  { %1573 = vmatpush1.bf16.msra.mxu0 %v7068_v23  ;;  %v6473_v23 = vld [vmem:[%s8535_s3] sm:$0xff]  }
 0x46c   :  { %v1447_v9 = vpack.c.bf16 %v1441_v58, %v1441_v58 }
 0x46d   :  { %1624 = vmatpush1.bf16.msra.mxu1 %v7074_v24  ;;  %v8543_v24 = vmov 0.0  }
 0x46e   :  { %5692 = vmatmul.mubr.msk.bf16.gmra.mrb[52].mxu0 %vm123_vm1, %v1447_v9  ;;  %5695 = vmatmul.mubr.msk.bf16.gmra.mrb[52].mxu1 %vm123_vm1, %v1447_v9 }
 0x46f   :  { %1602 = vmatprep.mubr.bf16.mxu0 %v8539_v1  ;;  %1653 = vmatprep.mubr.bf16.mxu1 %v8539_v1 }
 0x470   :  { %6024 = vmatprep.subr.bf16.mxu1 %v8543_v24  ;;  %6016 = vmatprep.subr.bf16.mxu0 %v8543_v24 }
 0x476   :  { %5699 = vmatmul.mubr.msk.bf16.vlgmr.msra.gmra.mrb[48].mxu0 %vm123_vm1, %v6471_v19  ;;  %5702 = vmatmul.mubr.msk.bf16.vlgmr.msra.gmra.mrb[48].mxu1 %vm123_vm1, %v6471_v19 }
 0x477   :  { %1612 = vmatprep.mubr.bf16.mxu0 %v8539_v1  ;;  %1663 = vmatprep.mubr.bf16.mxu1 %v8539_v1 }
 0x478   :  { %6025 = vmatpush3.bf16.msra.mxu1 %v6473_v23  ;;  %6017 = vmatpush3.bf16.msra.mxu0 %v6474_v12 }
 0x479   :  { %6026 = vmatprep.subr.bf16.mxu1 %v8543_v24  ;;  %6018 = vmatprep.subr.bf16.mxu0 %v8543_v24 }
 0x47c   :  { %6027 = vmatpush3.bf16.msra.mxu1 %v1826_v7  ;;  %6019 = vmatpush3.bf16.msra.mxu0 %v1771_v8 }
 0x47d   :  { %1973 = vmatprep.subr.bf16.mxu1 %v7422_v15  ;;  %6032 = vmatprep.subr.bf16.mxu0 %v8543_v24 }
 0x47e   :  { %5700 = vmatmul.mubr.msk.bf16.gmra.mrb[56].mxu0 %vm123_vm1, %v6472_v21  ;;  %5703 = vmatmul.mubr.msk.bf16.gmra.mrb[56].mxu1 %vm123_vm1, %v6472_v21 }
 0x47f   :  { %6028 = vmatprep.mubr.msk.bf16.mxu1 %vm6945_vm2, %v8543_v24  ;;  %6020 = vmatprep.mubr.msk.bf16.mxu0 %vm6945_vm2, %v8543_v24 }
 0x541   :  { %v1498_v18 = vpop.f32.mrb[52].mxu0  ;;  %v1549_v20 = vpop.f32.mrb[52].mxu1 }
 0x542   :  { %v1500_v27 = vpop.f32.mrb[53].mxu0  ;;  %v1551_v60 = vpop.f32.mrb[53].mxu1 }
 0x543   :  { %v1502_v61 = vpop.f32.mrb[54].mxu0  ;;  %v1553_v26 = vpop.f32.mrb[54].mxu1 }
 0x544   :  { %v1503_v25 = vpop.f32.mrb[55].mxu0  ;;  %v1554_v34 = vpop.f32.mrb[55].mxu1 }
 0x549   :  { %v1604_v36 = vpop.f32.mrb[48].mxu0  ;;  %v1655_v63 = vpop.f32.mrb[48].mxu1 }
 0x54a   :  { %v1672_v35 = vadd.f32 %v1604_v36, %v7118_v40  ;;  %v1606_v38 = vpop.f32.mrb[49].mxu0  ;;  %v1657_v43 = vpop.f32.mrb[49].mxu1  ;;  %v1714_v52 = vadd.f32 %v1655_v63, %v7129_v49 }
 0x54b   :  { %v1693_v29 = vadd.f32 %v1606_v38, %v7123_v42  ;;  %v1608_v30 = vpop.f32.mrb[50].mxu0  ;;  %v1659_v46 = vpop.f32.mrb[50].mxu1  ;;  %v1735_v45 = vadd.f32 %v1657_v43, %v7136_v59 }
 0x54c   :  { %v5704_v44 = vmul.f32 -1.442695, %v1672_v35  ;;  %v1673_v31 = vadd.f32 %v1608_v30, %v7118_v40  ;;  %v1610_v10 = vpop.f32.mrb[51].mxu0  ;;  %v1661_v47 = vpop.f32.mrb[51].mxu1  ;;  %v1715_v39 = vadd.f32 %v1659_v46, %v7129_v49  ;;  %v5710_v54 = vmul.f32 -1.442695, %v1714_v52 }
 0x54d   :  { %v5707_v22 = vmul.f32 -1.442695, %v1693_v29  ;;  %v1694_v51 = vadd.f32 %v1610_v10, %v7123_v42  ;;  %v1736_v5 = vadd.f32 %v1661_v47, %v7136_v59 }
 0x54e   :  { %6707 = vpow2.f32 %v5704_v44  ;;  %v5705_v3 = vmul.f32 -1.442695, %v1673_v31  ;;  %v5711_v19 = vmul.f32 -1.442695, %v1715_v39 }
 0x54f   :  { %v5708_v53 = vmul.f32 -1.442695, %v1694_v51  ;;  %6709 = vpow2.f32 %v5707_v22 }
 0x550   :  { %6711 = vpow2.f32 %v5705_v3 }
 0x551   :  { %v1614_v4 = vpop.f32.mrb[56].mxu0  ;;  %v1665_v32 = vpop.f32.mrb[56].mxu1  ;;  %6713 = vpow2.f32 %v5708_v53 }
 0x552   :  { %v1615_v11 = vadd.f32 %v1614_v4, %v1498_v18  ;;  %v1666_v13 = vadd.f32 %v1665_v32, %v1549_v20  ;;  %v1616_v16 = vpop.f32.mrb[57].mxu0  ;;  %v1667_v17 = vpop.f32.mrb[57].mxu1  ;;  %6715 = vtanh.f32 %v1735_v45 }
 0x553   :  { %v1617_v55 = vadd.f32 %v1616_v16, %v1500_v27  ;;  %v1668_v56 = vadd.f32 %v1667_v17, %v1551_v60  ;;  %v1618_v50 = vpop.f32.mrb[58].mxu0  ;;  %v1669_v57 = vpop.f32.mrb[58].mxu1  ;;  %6717 = vpow2.f32 %v5710_v54 }
 0x554   :  { %v1674_v58 = vadd.f32 %v1615_v11, %v7118_v40  ;;  %v1619_v6 = vpop.f32.mrb[59].mxu0  ;;  %v1670_v9 = vpop.f32.mrb[59].mxu1  ;;  %v1716_v27 = vadd.f32 %v1666_v13, %v7129_v49 }
 0x555   :  { %v1695_v21 = vadd.f32 %v1617_v55, %v7123_v42  ;;  %v1737_v61 = vadd.f32 %v1668_v56, %v7136_v59  ;;  %v7447_v56 = vld [vmem:[%s8532_s2 + $0x90] ss:$16 sps:$4 sm:$0xff]   ;;  %v6480_v9 = vld [vmem:[%s8535_s3 + $0x18] sm:$0xff]  }
 0x556   :  { %v5706_v23 = vmul.f32 -1.442695, %v1674_v58  ;;  %v5712_v25 = vmul.f32 -1.442695, %v1716_v27 }
 0x557   :  { %v5709_v12 = vmul.f32 -1.442695, %v1695_v21  ;;  %v6483_v21 = vld [vmem:[%s8535_s3 + $0x20] ss:$0 sps:$4 sm:$0xff]  }
 0x558   :  { %v6708_v14 = vpop.eup %6707  ;;  %6719 = vpow2.f32 %v5706_v23 }
 0x559   :  { %v1684_v7 = vadd.f32 1.0, %v6708_v14  ;;  %6721 = vpow2.f32 %v5711_v19  ;;  %v6710_v8 = vpop.eup %6709  ;;  %v37_v14 = vld [vmem:[%s8532_s2 + $0x80] sm:$0xff] }
 0x55a   :  { %6723 = vpow2.f32 %v5709_v12  ;;  %v6712_v18 = vpop.eup %6711  ;;  %v1705_v40 = vadd.f32 1.0, %v6710_v8  ;;  %v7468_v12 = vld [vmem:[%s8532_s2 + $0x64] ss:$16 sps:$4 sm:$0xff]   ;;  %v1882_v8 = vsel %vm127_vm0, %v6483_v21, 0  ;;  %v7490_v27 = vcombine.high %v37_v14, %v37_v14 }
 0x55b   :  { %6725 = vrcp.f32 %v1684_v7  ;;  %v1685_v20 = vadd.f32 1.0, %v6712_v18  ;;  %v6714_v42 = vpop.eup %6713  ;;  %v7482_v18 = vld [vmem:[%s8532_s2 + $0x60] ss:$16 sps:$4 sm:$0xff]  }
 0x55c   :  { %6727 = vtanh.f32 %v1736_v5  ;;  %v1706_v60 = vadd.f32 1.0, %v6714_v42  ;;  %v6716_v26 = vpop.eup %6715  ;;  %v5736_v42 = vcombine.low %v37_v14, %v37_v14 }
 0x55d   :  { %6729 = vrcp.f32 %v1705_v40  ;;  %v6718_v34 = vpop.eup %6717  ;;  %v7487_v40 = vld [vmem:[%s8532_s2 + $0x9c] ss:$16 sps:$4 sm:$0xff]  }
 0x55e   :  { %6731 = vrcp.f32 %v1685_v20  ;;  %v1726_v44 = vadd.f32 1.0, %v6718_v34 }
 0x55f   :  { %6733 = vrcp.f32 %v1706_v60  ;;  %v44_v60 = vld [vmem:[%s8532_s2 + $0xb8] sm:$0xff] }
 0x560   :  { %6735 = vtanh.f32 %v1737_v61  ;;  %v5728_v34 = vcombine.low %v44_v60, %v44_v60 }
 0x561   :  { %6737 = vpow2.f32 %v5712_v25  ;;  %v7503_v25 = vcombine.high %v44_v60, %v44_v60 }
 0x562   :  { %v6720_v36 = vpop.eup %6719 }
 0x563   :  { %v6722_v63 = vpop.eup %6721  ;;  %v1686_v35 = vadd.f32 1.0, %v6720_v36  ;;  %v7508_v36 = vsel %vm127_vm0, %v5736_v42, 0 }
 0x564   :  { %v6724_v38 = vpop.eup %6723  ;;  %v1727_v51 = vadd.f32 1.0, %v6722_v63  ;;  %v7518_v63 = vsel %vm127_vm0, %v5728_v34, 0 }
 0x565   :  { %v6726_v43 = vpop.eup %6725  ;;  %6739 = vrcp.f32 %v1686_v35  ;;  %v1707_v29 = vadd.f32 1.0, %v6724_v38  ;;  %v1930_v35 = vld [vmem:[%s8536_s1] sm:$0xf]  ;;  %v7526_v38 = vld [vmem:[%s8532_s2 + $0x6c] ss:$16 sps:$4 sm:$0xff]  }
 0x566   :  { %v6728_v49 = vpop.eup %6727  ;;  %v1744_v30 = vmul.f32 %v6726_v43, %v6716_v26  ;;  %v7499_v26 = vld [vmem:[%s8532_s2 + $0x98] ss:$16 sps:$4 sm:$0xff]  }
 0x567   :  { %v6730_v46 = vpop.eup %6729  ;;  %6741 = vrcp.f32 %v1707_v29  ;;  %v38_v43 = vld [vmem:[%s8532_s2 + $0x88] sm:$0xff] }
 0x568   :  { %v6732_v31 = vpop.eup %6731  ;;  %v1741_v59 = vmul.f32 %v6730_v46, %v7354_v0  ;;  %6743 = vrcp.f32 %v1726_v44  ;;  %v7537_v29 = vld [vmem:[%s8532_s2 + $0x68] ss:$16 sps:$4 sm:$0xff]  }
 0x569   :  { %v1745_v10 = vmul.f32 %v6732_v31, %v6728_v49  ;;  %v6734_v47 = vpop.eup %6733  ;;  %v7540_v49 = vcombine.high %v38_v43, %v38_v43  ;;  %v7560_v44 = vld [vmem:[%s8535_s3 + $0x24] sm:$0xff]   ;;  %v7566_v31 = vld [vmem:[%s8535_s3 + $0x2c] sm:$0xff]  }
 0x56a   :  { %v1747_v22 = vadd.f32 %v1744_v30, %v1741_v59  ;;  %v1742_v3 = vmul.f32 %v6734_v47, %v7358_v2  ;;  %v6736_v52 = vpop.eup %6735  ;;  %v43_v2 = vld [vmem:[%s8532_s2 + $0xb0] sm:$0xff]  ;;  %v5738_v30 = vcombine.low %v38_v43, %v38_v43  ;;  %v8538_v43 = vsub.s32 7, %v7108_v28 }
 0x56b   :  { %v6738_v39 = vpop.eup %6737  ;;  %v7449_v58 = vcombine.high %v43_v2, %v43_v2 }
 0x56c   :  { %6745 = vtanh.f32 %v1747_v22  ;;  %v1748_v53 = vadd.f32 %v1745_v10, %v1742_v3  ;;  %v1728_v11 = vadd.f32 1.0, %v6738_v39  ;;  %v7550_v46 = vsel %vm127_vm0, %v5738_v30, 0 }
 0x56d   :  { %6747 = vrcp.f32 %v1727_v51 }
 0x56e   :  { %6749 = vtanh.f32 %v1748_v53 }
 0x56f   :  { %v6740_v4 = vpop.eup %6739  ;;  %6751 = vrcp.f32 %v1728_v11 }
 0x570   :  { %v1746_v32 = vmul.f32 %v6740_v4, %v6736_v52 }
 0x571   :  { %v6742_v45 = vpop.eup %6741 }
 0x572   :  { %v1743_v13 = vmul.f32 %v6742_v45, %v7362_v62  ;;  %v6744_v16 = vpop.eup %6743  ;;  %v5726_v62 = vcombine.low %v43_v2, %v43_v2  ;;  %v2195_v2 = vsub.s32 5, %v7108_v28 }
 0x574   :  { %v1749_v0 = vadd.f32 %v1746_v32, %v1743_v13  ;;  %v7463_v23 = vsel %vm127_vm0, %v5726_v62, 0 }
 0x576   :  { %v6746_v17 = vpop.eup %6745  ;;  %6753 = vtanh.f32 %v1749_v0  ;;  %v8542_v0 = vsub.s32 4, %v7108_v28 }
 0x577   :  { %v1753_v54 = vmul.f32 %v6746_v17, %v6744_v16  ;;  %v6748_v55 = vpop.eup %6747 }
 0x578   :  { %v6750_v50 = vpop.eup %6749 }
 0x579   :  { %v1756_v57 = vpack.c.bf16 %v1753_v54, %v1753_v54  ;;  %v1754_v6 = vmul.f32 %v6750_v50, %v6748_v55  ;;  %v6752_v5 = vpop.eup %6751  ;;  %v7576_v50 = vld [vmem:[%s8534_s4] sm:$0xff] }
 0x57b   :  { %6029 = vmatmul.mubr.msk.bf16.vlgmr.msra.gmra.mrb[60].mxu1 %vm123_vm1, %v1756_v57  ;;  %v1757_v19 = vpack.c.bf16 %v1754_v6, %v1754_v6  ;;  %v7581_v57 = vrot.slane %v7576_v50, %v8542_v0  ;;  %v7586_v6 = vrot.slane %v7576_v50, %v2195_v2 }
 0x57c   :  { %1974 = vmatpush1.bf16.msra.mxu1 %v7447_v56  ;;  %2005 = vmatprep.mubr.bf16.mxu1 %v8539_v1 }
 0x57d   :  { %5730 = vmatprep.subr.msk.bf16.mxu1 %vm127_vm0, %v7449_v58  ;;  %6021 = vmatmul.mubr.msk.bf16.vlgmr.msra.gmra.mrb[60].mxu0 %vm123_vm1, %v1757_v19 }
 0x57e   :  { %6033 = vmatpush3.bf16.msra.mxu0 %v6480_v9  ;;  %6036 = vmatprep.mubr.msk.bf16.mxu0 %vm6945_vm2, %v8543_v24 }
 0x57f   :  { %6034 = vmatprep.subr.bf16.mxu0 %v8543_v24 }
 0x580   :  { %v6754_v7 = vpop.eup %6753  ;;  %1976 = vmatpush1.bf16.msra.mxu1 %v7463_v23 }
 0x581   :  { %2100 = vmatprep.subr.bf16.mxu1 %v7468_v12  ;;  %v1755_v20 = vmul.f32 %v6754_v7, %v6752_v5 }
 0x582   :  { %6035 = vmatpush3.bf16.msra.mxu0 %v1882_v8 }
 0x583   :  { %2006 = vmatmul.mubr.bf16.vlgmr.msra.gmra.mrb[64].mxu1 %v8539_v1  ;;  %v1868_v61 = vpack.c.bf16 %v1755_v20, %v1755_v20  ;;  %2014 = vmatprep.subr.bf16.mxu0 %v7487_v40 }
 0x584   :  { %2101 = vmatpush1.bf16.msra.mxu1 %v7482_v18  ;;  %2132 = vmatprep.mubr.bf16.mxu1 %v8539_v1 }
 0x585   :  { %5740 = vmatprep.subr.msk.bf16.mxu1 %vm127_vm0, %v7490_v27  ;;  %6037 = vmatmul.mubr.msk.bf16.vlgmr.msra.gmra.mrb[64].mxu0 %vm123_vm1, %v1868_v61 }
 0x586   :  { %2015 = vmatpush1.bf16.msra.mxu0 %v7499_v26  ;;  %2046 = vmatprep.mubr.bf16.mxu0 %v8539_v1 }
 0x587   :  { %5731 = vmatprep.subr.msk.bf16.mxu0 %vm127_vm0, %v7503_v25 }
 0x588   :  { %2103 = vmatpush1.bf16.msra.mxu1 %v7508_v36 }
 0x589   :  { %6040 = vmatprep.subr.bf16.mxu1 %v8543_v24 }
 0x58a   :  { %2017 = vmatpush1.bf16.msra.mxu0 %v7518_v63 }
 0x58b   :  { %5741 = vmatmul.mubr.msk.bf16.vlgmr.msra.gmra.mrb[68].mxu1 %vm123_vm1, %v1930_v35  ;;  %2141 = vmatprep.subr.bf16.mxu0 %v7526_v38 }
 0x58c   :  { %6046 = vmatprep.mubr.msk.bf16.mxu1 %vm6945_vm2, %v8543_v24  ;;  %6041 = vmatpush3.bf16.msra.mxu1 %v7560_v44 }
 0x58d   :  { %2047 = vmatmul.mubr.bf16.vlgmr.msra.gmra.mrb[68].mxu0 %v8539_v1  ;;  %6042 = vmatprep.subr.bf16.mxu1 %v8543_v24 }
 0x58e   :  { %2142 = vmatpush1.bf16.msra.mxu0 %v7537_v29  ;;  %2173 = vmatprep.mubr.bf16.mxu0 %v8539_v1 }
 0x58f   :  { %5742 = vmatprep.subr.msk.bf16.mxu0 %vm127_vm0, %v7540_v49 }
 0x590   :  { %6043 = vmatpush3.bf16.msra.mxu1 %v7566_v31 }
 0x591   :  { %6044 = vmatprep.subr.bf16.mxu1 %v8543_v24 }
 0x592   :  { %2144 = vmatpush1.bf16.msra.mxu0 %v7550_v46 }
 0x593   :  { %6050 = vmatprep.subr.bf16.mxu0 %v8543_v24 }
 0x595   :  { %5743 = vmatmul.mubr.msk.bf16.vlgmr.msra.gmra.mrb[72].mxu0 %vm123_vm1, %v1930_v35 }
 0x596   :  { %6052 = vmatprep.mubr.msk.bf16.mxu0 %vm6945_vm2, %v8543_v24 }
 0x64e   :  { %v1862_v59 = vpop.f32.mrb[60].mxu1 }
 0x64f   :  { %v6030_v10 = vpop.f32.mrb[61].mxu1 }
 0x650   :  { %v1865_v47 = vpop.f32.mrb[62].mxu1  ;;  %v1807_v22 = vpop.f32.mrb[60].mxu0 }
 0x651   :  { %v6031_v51 = vpop.f32.mrb[63].mxu1  ;;  %v1863_v3 = vadd.f32 %v1862_v59, %v1807_v22  ;;  %v6022_v52 = vpop.f32.mrb[61].mxu0  ;;  %v7594_v59 = vrot.slane %v7576_v50, %v8538_v43 }
 0x652   :  { %v1810_v53 = vpop.f32.mrb[62].mxu0 }
 0x653   :  { %v6023_v39 = vpop.f32.mrb[63].mxu0 }
 0x656   :  { %v2007_v4 = vpop.f32.mrb[64].mxu1 }
 0x657   :  { %v2009_v32 = vpop.f32.mrb[65].mxu1 }
 0x658   :  { %v2011_v45 = vpop.f32.mrb[66].mxu1  ;;  %v1918_v11 = vpop.f32.mrb[64].mxu0 }
 0x659   :  { %v2012_v13 = vpop.f32.mrb[67].mxu1  ;;  %v1924_v16 = vadd.f32 %v1918_v11, %v1863_v3  ;;  %v6038_v17 = vpop.f32.mrb[65].mxu0  ;;  %v7602_v45 = vld [vmem:[%s8534_s4 + $0x8] sm:$0xff]  ;;  %v7607_v11 = vld [vmem:[%s8535_s3 + $0x34] sm:$0xff]  }
 0x65a   :  { %v1921_v54 = vpop.f32.mrb[66].mxu0  ;;  %v1928_v13 = vrot.slane %v7602_v45, %v7111_v33  ;;  %6045 = vmatpush3.bf16.msra.mxu1 %v7607_v11 }
 0x65b   :  { %v6039_v55 = vpop.f32.mrb[67].mxu0  ;;  %6056 = vmatprep.subr.bf16.mxu1 %v8543_v24 }
 0x65c   :  { %v7613_v55 = vadd.f32 %v1928_v13, %v1924_v16  ;;  %v7628_v16 = vld [vmem:[%s8535_s3 + $0x3c] sm:$0xff]  }
 0x65d   :  { %6051 = vmatpush3.bf16.msra.mxu0 %v7628_v16 }
 0x65e   :  { %v2134_v62 = vpop.f32.mrb[68].mxu1  ;;  %6066 = vmatprep.subr.bf16.mxu0 %v8543_v24 }
 0x65f   :  { %v2135_v9 = vadd.f32 %v2134_v62, %v2007_v4  ;;  %v2136_v19 = vpop.f32.mrb[69].mxu1 }
 0x660   :  { %v2137_v21 = vadd.f32 %v2136_v19, %v2009_v32  ;;  %v2138_v14 = vpop.f32.mrb[70].mxu1  ;;  %v2048_v8 = vpop.f32.mrb[68].mxu0 }
 0x661   :  { %v2186_v5 = vadd.f32 %v7581_v57, %v2135_v9  ;;  %v2139_v7 = vpop.f32.mrb[71].mxu1  ;;  %v2050_v42 = vpop.f32.mrb[69].mxu0 }
 0x662   :  { %v2197_v20 = vadd.f32 %v7586_v6, %v2137_v21  ;;  %v2052_v61 = vpop.f32.mrb[70].mxu0 }
 0x663   :  { %v5744_v60 = vmul.f32 -1.442695, %v2186_v5  ;;  %v2053_v35 = vpop.f32.mrb[71].mxu0 }
 0x664   :  { %v5745_v34 = vmul.f32 -1.442695, %v2197_v20 }
 0x665   :  { %6755 = vpow2.f32 %v5744_v60 }
 0x666   :  { %6757 = vpow2.f32 %v5745_v34 }
 0x668   :  { %v2175_v30 = vpop.f32.mrb[72].mxu0 }
 0x669   :  { %v7596_v10 = vadd.f32 %v2175_v30, %v2048_v8  ;;  %v2177_v47 = vpop.f32.mrb[73].mxu0  ;;  %v7635_v8 = vrot.slane %v7602_v45, %v427_v37 }
 0x66a   :  { %v2178_v22 = vadd.f32 %v2177_v47, %v2050_v42  ;;  %v2179_v51 = vpop.f32.mrb[74].mxu0  ;;  %v7644_v47 = vrot.slane %v7602_v45, %v452_v41  ;;  %v2488_v41 = vpack.c.bf16 %v7613_v55, %v7613_v55 }
 0x66b   :  { %v2180_v3 = vpop.f32.mrb[75].mxu0 }
 0x66c   :  { %v2219_v52 = vadd.f32 %v7594_v59, %v2178_v22 }
 0x66e   :  { %6759 = vtanh.f32 %v2219_v52 }
 0x66f   :  { %v6756_v53 = vpop.eup %6755 }
 0x670   :  { %v6758_v39 = vpop.eup %6757  ;;  %v2190_v4 = vadd.f32 1.0, %v6756_v53 }
 0x671   :  { %v2201_v32 = vadd.f32 1.0, %v6758_v39 }
 0x672   :  { %6761 = vrcp.f32 %v2190_v4 }
 0x673   :  { %6763 = vrcp.f32 %v2201_v32 }
 0x678   :  { %v6760_v17 = vpop.eup %6759 }
 0x67c   :  { %v6762_v54 = vpop.eup %6761 }
 0x67d   :  { %v6764_v62 = vpop.eup %6763  ;;  %v2222_v9 = vmul.f32 %v6762_v54, %v6760_v17  ;;  %v7655_v54 = vld [vmem:[%s8535_s3 + $0x44] sm:$0xff]  }
 0x67e   :  { %v2221_v19 = vmul.f32 %v6764_v62, %v7613_v55  ;;  %v7662_v62 = vld [vmem:[%s8535_s3 + $0x4c] sm:$0xff]  }
 0x680   :  { %v7616_v21 = vadd.f32 %v2222_v9, %v2221_v19  ;;  %v7668_v9 = vld [vmem:[%s8535_s3 + $0x54] sm:$0xff]   ;;  %v8541_v19 = vsub.s32 6, %v7108_v28 }
 0x682   :  { %2227 = vrot.lane.b32.xlu0 %v7616_v21, %s6946_s26 }
 0x6f4   :  { %v2228_v14 = vpop.permute.xlu0 %2227 }
 0x6f5   :  { %v2230_v5 = vsel %vm123_vm1, %v7613_v55, %v2228_v14  ;;  %v7677_v14 = vrot.slane %v7576_v50, %v8541_v19  ;;  %v7692_v50 = vld [vmem:[%s8535_s3 + $0x6c] sm:$0xff]  }
 0x6f6   :  { %v2231_v7 = vpack.c.bf16 %v2230_v5, %v2230_v5 }
 0x6f8   :  { %6047 = vmatmul.mubr.msk.bf16.vlgmr.msra.gmra.mrb[72].mxu1 %vm2254_vm3, %v2231_v7  ;;  %v2208_v7 = vadd.f32 %v7677_v14, %v7596_v10  ;;  %v7701_v10 = vld [vmem:[%s8535_s3 + $0x74] sm:$0xff]  }
 0x6f9   :  { %6062 = vmatprep.mubr.msk.bf16.mxu1 %vm6945_vm2, %v8543_v24  ;;  %6057 = vmatpush3.bf16.msra.mxu1 %v7655_v54 }
 0x6fa   :  { %6058 = vmatprep.subr.bf16.mxu1 %v8543_v24 }
 0x6fd   :  { %6059 = vmatpush3.bf16.msra.mxu1 %v7662_v62 }
 0x6fe   :  { %6060 = vmatprep.subr.bf16.mxu1 %v8543_v24 }
 0x701   :  { %6061 = vmatpush3.bf16.msra.mxu1 %v7668_v9 }
 0x702   :  { %6078 = vmatprep.subr.bf16.mxu1 %v8543_v24 }
 0x7cb   :  { %v2292_v20 = vpop.f32.mrb[72].mxu1 }
 0x7cc   :  { %v2293_v42 = vadd.f32 %v2292_v20, %v7635_v8  ;;  %v6048_v60 = vpop.f32.mrb[73].mxu1  ;;  %v5746_v20 = vmul.f32 -1.442695, %v2208_v7 }
 0x7cd   :  { %v2295_v61 = vpop.f32.mrb[74].mxu1 }
 0x7ce   :  { %v2298_v34 = vmax.f32 %v2293_v42, 0.0  ;;  %v6049_v35 = vpop.f32.mrb[75].mxu1 }
 0x7d0   :  { %v2299_v30 = vpack.c.bf16 %v2298_v34, %v2298_v34 }
 0x7d2   :  { %6053 = vmatmul.mubr.msk.bf16.vlgmr.msra.gmra.mrb[76].mxu0 %vm2310_vm4, %v2299_v30  ;;  %v7684_v30 = vld [vmem:[%s8535_s3 + $0x64] sm:$0xff]  }
 0x7d3   :  { %6068 = vmatprep.mubr.msk.bf16.mxu0 %vm6945_vm2, %v8543_v24 }
 0x8a5   :  { %v2348_v37 = vpop.f32.mrb[76].mxu0 }
 0x8a6   :  { %v2349_v22 = vadd.f32 %v2348_v37, %v7644_v47  ;;  %v6054_v51 = vpop.f32.mrb[77].mxu0 }
 0x8a7   :  { %v2351_v3 = vpop.f32.mrb[78].mxu0 }
 0x8a8   :  { %v6055_v52 = vpop.f32.mrb[79].mxu0  ;;  %v2354_v53 = vsel %vm2254_vm3, %v2349_v22, -inf }
 0x8a9   :  { %2355 = vmax.xlane.f32.xlu0 %v2354_v53  ;;  %v7741_v53 = vld [vmem:[%s8535_s3 + $0x5c] sm:$0xff]  }
 0x8aa   :  { %6067 = vmatpush3.bf16.msra.mxu0 %v7741_v53 }
 0x8ab   :  { %6072 = vmatprep.subr.bf16.mxu0 %v8543_v24 }
 0x936   :  { %v2356_v39 = vpop.xlane.xlu0 %2355 }
 0x937   :  { %v2357_v4 = vsub.f32 %v2349_v22, %v2356_v39  ;;  %v7748_v39 = vrot.slane %v7602_v45, %v477_v48 }
 0x939   :  { %v2358_v32 = vmul.f32 1.442695, %v2357_v4 }
 0x93b   :  { %6765 = vpow2.f32 %v2358_v32 }
 0x945   :  { %v6766_v13 = vpop.eup %6765 }
 0x946   :  { %v2360_v17 = vsel %vm2254_vm3, %v6766_v13, 0.0 }
 0x947   :  { %2361 = vadd.xlane.f32.xlu1 %v2360_v17 }
 0x958   :  { %2490 = vrot.lane.b32.xlu1 %v2488_v41, %s6947_s29  ;;  %v76_v41 = vld [vmem:[%s8535_s3 + $0x7c] sm:$0xf] }
 0x9d4   :  { %v2362_v42 = vpop.xlane.xlu1 %2361 }
 0x9d5   :  { %6767 = vrcp.f32 %v2362_v42 }
 0x9d6   :  { %6769 = vpow2.f32 %v5746_v20 }
 0x9d7   :  { %6771 = vtanh.f32 %v7616_v21 }
 0x9df   :  { %v6768_v60 = vpop.eup %6767 }
 0x9e0   :  { %v2364_v61 = vmul.f32 %v6768_v60, %v6766_v13  ;;  %v6770_v34 = vpop.eup %6769  ;;  %v7755_v60 = vsel %vm127_vm0, %v76_v41, 0 }
 0x9e1   :  { %v2212_v22 = vadd.f32 1.0, %v6770_v34  ;;  %v2491_v34 = vpop.permute.xlu1 %2490 }
 0x9e2   :  { %v2365_v35 = vmul.f32 %v2364_v61, %v2230_v5  ;;  %v6772_v5 = vpop.eup %6771 }
 0x9e3   :  { %6773 = vrcp.f32 %v2212_v22 }
 0x9e4   :  { %v2366_v37 = vpack.c.bf16 %v2365_v35, %v2365_v35 }
 0x9e6   :  { %6063 = vmatmul.mubr.msk.bf16.vlgmr.msra.gmra.mrb[76].mxu1 %vm2254_vm3, %v2366_v37 }
 0x9e7   :  { %6079 = vmatpush3.bf16.msra.mxu1 %v7684_v30  ;;  %6084 = vmatprep.mubr.msk.bf16.mxu1 %vm6945_vm2, %v8543_v24 }
 0x9e8   :  { %6080 = vmatprep.subr.bf16.mxu1 %v8543_v24 }
 0x9eb   :  { %6081 = vmatpush3.bf16.msra.mxu1 %v7692_v50 }
 0x9ec   :  { %6082 = vmatprep.subr.bf16.mxu1 %v8543_v24 }
 0x9ed   :  { %v6774_v51 = vpop.eup %6773 }
 0x9ee   :  { %v2225_v3 = vmul.f32 %v6774_v51, %v6772_v5 }
 0x9ef   :  { %6083 = vmatpush3.bf16.msra.mxu1 %v7701_v10 }
 0x9f0   :  { %2691 = vmatprep.subr.bf16.mxu1 %v7422_v15  ;;  %v7712_v52 = vpack.c.bf16 %v2225_v3, %v2225_v3  ;;  %v7725_v15 = vld [vmem:[%s8536_s1 + $0x4] sm:$0xf] }
 0x9f2   :  { %6085 = vmatmul.mubr.msk.bf16.vlgmr.msra.gmra.mrb[80].mxu1 %vm2254_vm3, %v2366_v37 }
 0x9f3   :  { %2692 = vmatpush1.bf16.msra.mxu1 %v7447_v56  ;;  %2723 = vmatprep.mubr.bf16.mxu1 %v8539_v1 }
 0x9f4   :  { %5769 = vmatprep.subr.msk.bf16.mxu1 %vm127_vm0, %v7449_v58 }
 0x9f7   :  { %2694 = vmatpush1.bf16.msra.mxu1 %v7463_v23 }
 0x9f8   :  { %2776 = vmatprep.subr.bf16.mxu1 %v7468_v12 }
 0x9fa   :  { %5770 = vmatmul.mubr.msk.bf16.vlgmr.msra.gmra.mrb[84].mxu1 %vm123_vm1, %v7712_v52 }
 0x9fb   :  { %2777 = vmatpush1.bf16.msra.mxu1 %v7482_v18  ;;  %2808 = vmatprep.mubr.bf16.mxu1 %v8539_v1 }
 0x9fc   :  { %5773 = vmatprep.subr.msk.bf16.mxu1 %vm127_vm0, %v7490_v27 }
 0x9ff   :  { %2779 = vmatpush1.bf16.msra.mxu1 %v7508_v36 }
 0xa00   :  { %6096 = vmatprep.subr.bf16.mxu1 %v8543_v24 }
 0xa02   :  { %5774 = vmatmul.mubr.msk.bf16.vlgmr.msra.gmra.mrb[88].mxu1 %vm123_vm1, %v7725_v15 }
 0xa03   :  { %6097 = vmatpush3.bf16.msra.mxu1 %v7560_v44  ;;  %6102 = vmatprep.mubr.msk.bf16.mxu1 %vm6945_vm2, %v8543_v24 }
 0xa04   :  { %6098 = vmatprep.subr.bf16.mxu1 %v8543_v24 }
 0xa07   :  { %6099 = vmatpush3.bf16.msra.mxu1 %v7566_v31 }
 0xa08   :  { %6100 = vmatprep.subr.bf16.mxu1 %v8543_v24 }
 0xa0b   :  { %6101 = vmatpush3.bf16.msra.mxu1 %v7607_v11 }
 0xa0c   :  { %6122 = vmatprep.subr.bf16.mxu1 %v8543_v24 }
 0xab9   :  { %v2426_v4 = vpop.f32.mrb[76].mxu1 }
 0xaba   :  { %v2427_v32 = vadd.f32 %v2426_v4, %v7748_v39  ;;  %v6064_v13 = vpop.f32.mrb[77].mxu1 }
 0xabb   :  { %v2429_v17 = vpop.f32.mrb[78].mxu1 }
 0xabc   :  { %v2432_v7 = vmax.f32 %v2427_v32, 0.0  ;;  %v6065_v20 = vpop.f32.mrb[79].mxu1 }
 0xabd   :  { %v7768_v20 = vld [vmem:[%s8535_s3 + $0x80] sm:$0xff]  }
 0xabe   :  { %v2433_v42 = vpack.c.bf16 %v2432_v7, %v2432_v7 }
 0xac0   :  { %6069 = vmatmul.mubr.msk.bf16.vlgmr.msra.gmra.mrb[80].mxu0 %vm2310_vm4, %v2433_v42  ;;  %v7775_v42 = vld [vmem:[%s8535_s3 + $0x88] sm:$0xff]  }
 0xac1   :  { %6073 = vmatpush3.bf16.msra.mxu0 %v7755_v60  ;;  %6074 = vmatprep.mubr.msk.bf16.mxu0 %vm6945_vm2, %v8543_v24 }
 0xac2   :  { %6088 = vmatprep.subr.bf16.mxu0 %v8543_v24 }
 0xac5   :  { %v2591_v48 = vpop.f32.mrb[80].mxu1 }
 0xac6   :  { %v6086_v61 = vpop.f32.mrb[81].mxu1 }
 0xac7   :  { %v2594_v35 = vpop.f32.mrb[82].mxu1 }
 0xac8   :  { %v6087_v37 = vpop.f32.mrb[83].mxu1  ;;  %6075 = vmatmul.mubr.msk.bf16.vlgmr.msra.gmra.mrb[84].mxu0 %vm2492_vm5, %v2491_v34 }
 0xac9   :  { %6092 = vmatprep.mubr.msk.bf16.mxu0 %vm6945_vm2, %v8543_v24  ;;  %6089 = vmatpush3.bf16.msra.mxu0 %v7768_v20 }
 0xaca   :  { %6090 = vmatprep.subr.bf16.mxu0 %v8543_v24 }
 0xacd   :  { %v2725_v22 = vpop.f32.mrb[84].mxu1  ;;  %6091 = vmatpush3.bf16.msra.mxu0 %v7775_v42 }
 0xace   :  { %v2727_v5 = vpop.f32.mrb[85].mxu1  ;;  %2732 = vmatprep.subr.bf16.mxu0 %v7487_v40 }
 0xacf   :  { %v2729_v51 = vpop.f32.mrb[86].mxu1 }
 0xad0   :  { %v2730_v3 = vpop.f32.mrb[87].mxu1 }
 0xad5   :  { %v2810_v4 = vpop.f32.mrb[88].mxu1 }
 0xad6   :  { %v2811_v32 = vadd.f32 %v2810_v4, %v2725_v22  ;;  %v2812_v13 = vpop.f32.mrb[89].mxu1  ;;  %v7784_v22 = vrot.slane %v7602_v45, %v2195_v2 }
 0xad7   :  { %v2813_v17 = vadd.f32 %v2812_v13, %v2727_v5  ;;  %v2814_v41 = vpop.f32.mrb[90].mxu1 }
 0xad8   :  { %v2815_v7 = vpop.f32.mrb[91].mxu1 }
 0xad9   :  { %v2865_v2 = vadd.f32 %v2813_v17, %v7586_v6 }
 0xb93   :  { %v7779_v61 = vpop.f32.mrb[80].mxu0 }
 0xb94   :  { %v6070_v34 = vpop.f32.mrb[81].mxu0 }
 0xb95   :  { %v2484_v35 = vpop.f32.mrb[82].mxu0 }
 0xb96   :  { %v6071_v37 = vpop.f32.mrb[83].mxu0 }
 0xb9b   :  { %v2533_v5 = vpop.f32.mrb[84].mxu0 }
 0xb9c   :  { %v2592_v51 = vadd.f32 %v2591_v48, %v2533_v5  ;;  %v6076_v3 = vpop.f32.mrb[85].mxu0 }
 0xb9d   :  { %v2536_v4 = vpop.f32.mrb[86].mxu0 }
 0xb9e   :  { %v2601_v13 = vadd.f32 %v7784_v22, %v2592_v51  ;;  %v6077_v41 = vpop.f32.mrb[87].mxu0 }
 0xba0   :  { %v2602_v7 = vmax.f32 %v2601_v13, 0.0 }
 0xba2   :  { %v2603_v43 = vpack.c.bf16 %v2602_v7, %v2602_v7 }
 0xba4   :  { %6093 = vmatmul.mubr.msk.bf16.vlgmr.msra.gmra.mrb[88].mxu0 %vm2620_vm6, %v2603_v43  ;;  %v2858_v43 = vadd.f32 %v2811_v32, %v7581_v57 }
 0xba5   :  { %2733 = vmatpush1.bf16.msra.mxu0 %v7499_v26  ;;  %2764 = vmatprep.mubr.bf16.mxu0 %v8539_v1 }
 0xba6   :  { %5771 = vmatprep.subr.msk.bf16.mxu0 %vm127_vm0, %v7503_v25  ;;  %v5777_v48 = vmul.f32 -1.442695, %v2858_v43 }
 0xba9   :  { %2735 = vmatpush1.bf16.msra.mxu0 %v7518_v63 }
 0xbaa   :  { %2817 = vmatprep.subr.bf16.mxu0 %v7526_v38 }
 0xbac   :  { %5772 = vmatmul.mubr.msk.bf16.vlgmr.msra.gmra.mrb[92].mxu0 %vm123_vm1, %v7712_v52  ;;  %v5778_v52 = vmul.f32 -1.442695, %v2865_v2 }
 0xbad   :  { %2818 = vmatpush1.bf16.msra.mxu0 %v7537_v29  ;;  %2849 = vmatprep.mubr.bf16.mxu0 %v8539_v1 }
 0xbae   :  { %5775 = vmatprep.subr.msk.bf16.mxu0 %vm127_vm0, %v7540_v49  ;;  %6775 = vpow2.f32 %v5778_v52 }
 0xbaf   :  { %6777 = vpow2.f32 %v5777_v48 }
 0xbb1   :  { %2820 = vmatpush1.bf16.msra.mxu0 %v7550_v46 }
 0xbb2   :  { %6106 = vmatprep.subr.bf16.mxu0 %v8543_v24 }
 0xbb4   :  { %5776 = vmatmul.mubr.msk.bf16.vlgmr.msra.gmra.mrb[96].mxu0 %vm123_vm1, %v7725_v15 }
 0xbb5   :  { %6107 = vmatpush3.bf16.msra.mxu0 %v7628_v16  ;;  %6108 = vmatprep.mubr.msk.bf16.mxu0 %vm6945_vm2, %v8543_v24 }
 0xbb6   :  { %6112 = vmatprep.subr.bf16.mxu0 %v8543_v24 }
 0xbb8   :  { %v6776_v13 = vpop.eup %6775 }
 0xbb9   :  { %v6778_v41 = vpop.eup %6777  ;;  %v2869_v7 = vadd.f32 1.0, %v6776_v13 }
 0xbba   :  { %v2862_v17 = vadd.f32 1.0, %v6778_v41 }
 0xbbb   :  { %6779 = vrcp.f32 %v2869_v7 }
 0xbbc   :  { %6781 = vrcp.f32 %v2862_v17 }
 0xbc5   :  { %v6780_v48 = vpop.eup %6779 }
 0xc77   :  { %v7810_v34 = vpop.f32.mrb[88].mxu0 }
 0xc78   :  { %v6094_v35 = vpop.f32.mrb[89].mxu0 }
 0xc79   :  { %v2661_v37 = vpop.f32.mrb[90].mxu0  ;;  %v6782_v35 = vpop.eup %6781 }
 0xc7a   :  { %v6095_v5 = vpop.f32.mrb[91].mxu0 }
 0xc7b   :  { %v2881_v5 = vmul.f32 %v6780_v48, %v7616_v21 }
 0xc7f   :  { %v2766_v15 = vpop.f32.mrb[92].mxu0 }
 0xc80   :  { %v2768_v51 = vpop.f32.mrb[93].mxu0 }
 0xc81   :  { %v2770_v3 = vpop.f32.mrb[94].mxu0 }
 0xc82   :  { %v2771_v4 = vpop.f32.mrb[95].mxu0 }
 0xc87   :  { %v2851_v1 = vpop.f32.mrb[96].mxu0 }
 0xc88   :  { %v7812_v19 = vadd.f32 %v2851_v1, %v2766_v15  ;;  %v2853_v32 = vpop.f32.mrb[97].mxu0 }
 0xc89   :  { %v2854_v2 = vadd.f32 %v2853_v32, %v2768_v51  ;;  %v2855_v43 = vpop.f32.mrb[98].mxu0 }
 0xc8a   :  { %v2856_v0 = vpop.f32.mrb[99].mxu0 }
 0xc8b   :  { %v2879_v52 = vadd.f32 %v2854_v2, %v7594_v59 }
 0xc8d   :  { %6783 = vtanh.f32 %v2879_v52 }
 0xc97   :  { %v6784_v37 = vpop.eup %6783 }
 0xc98   :  { %v2882_v3 = vmul.f32 %v6784_v37, %v6782_v35 }
 0xc9a   :  { %v7816_v4 = vadd.f32 %v2882_v3, %v2881_v5 }
 0xc9c   :  { %2887 = vrot.lane.b32.xlu1 %v7816_v4, %s6946_s26 }
 0xd0e   :  { %v2888_v1 = vpop.permute.xlu1 %2887 }
 0xd0f   :  { %v7822_v0 = vsel %vm123_vm1, %v7616_v21, %v2888_v1 }
 0xd10   :  { %v2891_v15 = vpack.c.bf16 %v7822_v0, %v7822_v0 }
 0xd12   :  { %6103 = vmatmul.mubr.msk.bf16.vlgmr.msra.gmra.mrb[92].mxu1 %vm2254_vm3, %v2891_v15 }
 0xd13   :  { %6123 = vmatpush3.bf16.msra.mxu1 %v7741_v53  ;;  %6124 = vmatprep.mubr.msk.bf16.mxu1 %vm6945_vm2, %v8543_v24 }
 0xd14   :  { %6128 = vmatprep.subr.bf16.mxu1 %v8543_v24 }
 0xde5   :  { %v2929_v51 = vpop.f32.mrb[92].mxu1 }
 0xde6   :  { %v2930_v13 = vadd.f32 %v2929_v51, %v7635_v8  ;;  %v6104_v41 = vpop.f32.mrb[93].mxu1 }
 0xde7   :  { %v2932_v7 = vpop.f32.mrb[94].mxu1 }
 0xde8   :  { %v2935_v17 = vmax.f32 %v2930_v13, 0.0  ;;  %v6105_v21 = vpop.f32.mrb[95].mxu1  ;;  %v8549_v13 = vsub.s32 4, %v7108_v28 }
 0xde9   :  { %v8550_v21 = vsub.s32 6, %v7108_v28 }
 0xdea   :  { %v2936_v32 = vpack.c.bf16 %v2935_v17, %v2935_v17  ;;  %v7847_v41 = vrot.slane %v7602_v45, %v8549_v13 }
 0xdec   :  { %6109 = vmatmul.mubr.msk.bf16.vlgmr.msra.gmra.mrb[100].mxu0 %vm2310_vm4, %v2936_v32  ;;  %v2482_v7 = vadd.f32 %v7779_v61, %v7847_v41  ;;  %v7857_v32 = vrot.slane %v7602_v45, %v8550_v21 }
 0xded   :  { %6113 = vmatpush3.bf16.msra.mxu0 %v7655_v54  ;;  %6118 = vmatprep.mubr.msk.bf16.mxu0 %vm6945_vm2, %v8543_v24 }
 0xdee   :  { %6114 = vmatprep.subr.bf16.mxu0 %v8543_v24 }
 0xdf1   :  { %6115 = vmatpush3.bf16.msra.mxu0 %v7662_v62 }
 0xdf2   :  { %6116 = vmatprep.subr.bf16.mxu0 %v8543_v24 }
 0xdf5   :  { %6117 = vmatpush3.bf16.msra.mxu0 %v7668_v9 }
 0xdf6   :  { %6134 = vmatprep.subr.bf16.mxu0 %v8543_v24 }
 0xebf   :  { %v2974_v2 = vpop.f32.mrb[100].mxu0 }
 0xec0   :  { %v2975_v43 = vadd.f32 %v2974_v2, %v7644_v47  ;;  %v6110_v52 = vpop.f32.mrb[101].mxu0  ;;  %v2659_v2 = vadd.f32 %v7810_v34, %v7857_v32 }
 0xec1   :  { %v2977_v48 = vpop.f32.mrb[102].mxu0 }
 0xec2   :  { %v6111_v35 = vpop.f32.mrb[103].mxu0  ;;  %v2980_v37 = vsel %vm2254_vm3, %v2975_v43, -inf  ;;  %v2872_v48 = vadd.f32 %v7812_v19, %v7677_v14 }
 0xec3   :  { %2981 = vmax.xlane.f32.xlu1 %v2980_v37 }
 0xec4   :  { %v5779_v35 = vmul.f32 -1.442695, %v2872_v48 }
 0xf50   :  { %v2982_v5 = vpop.xlane.xlu1 %2981 }
 0xf51   :  { %v2983_v3 = vsub.f32 %v2975_v43, %v2982_v5  ;;  %v5767_v43 = vmul.f32 -1.442695, %v2659_v2 }
 0xf53   :  { %v2984_v1 = vmul.f32 1.442695, %v2983_v3 }
 0xf55   :  { %6785 = vpow2.f32 %v2984_v1 }
 0xf56   :  { %6787 = vtanh.f32 %v2482_v7 }
 0xf57   :  { %6789 = vpow2.f32 %v5767_v43 }
 0xf5f   :  { %v6786_v15 = vpop.eup %6785 }
 0xf60   :  { %v2986_v51 = vsel %vm2254_vm3, %v6786_v15, 0.0  ;;  %v6788_v17 = vpop.eup %6787 }
 0xf61   :  { %2987 = vadd.xlane.f32.xlu0 %v2986_v51  ;;  %v6790_v52 = vpop.eup %6789 }
 0xf62   :  { %v2667_v61 = vadd.f32 1.0, %v6790_v52 }
 0xf64   :  { %6791 = vrcp.f32 %v2667_v61 }
 0xf65   :  { %6793 = vpow2.f32 %v5779_v35 }
 0xf77   :  { %2676 = vrot.lane.b32.xlu0 %v6788_v17, %s6948_s27  ;;  %v8551_v17 = vmov 0  }
 0xf7b   :  { %2671 = vrot.lane.b32.xlu0 %v7613_v55, %s6947_s29  ;;  %v6792_v55 = vpop.eup %6791 }
 0xf7c   :  { %v6794_v45 = vpop.eup %6793 }
 0xf7d   :  { %v2876_v51 = vadd.f32 1.0, %v6794_v45 }
 0xfee   :  { %v2988_v37 = vpop.xlane.xlu0 %2987 }
 0xfef   :  { %6795 = vrcp.f32 %v2988_v37 }
 0xff0   :  { %6797 = vrcp.f32 %v2876_v51 }
 0xff1   :  { %6799 = vtanh.f32 %v7816_v4 }
 0xff2   :  { %v2677_v5 = vpop.permute.xlu0 %2676 }
 0xff3   :  { %v2679_v3 = vmul.f32 %v6792_v55, %v2677_v5 }
 0xff5   :  { %2681 = vrot.lane.b32.xlu1 %v2679_v3, %s6949_s28 }
 0xff6   :  { %v2672_v48 = vpop.permute.xlu0 %2671 }
 0xff7   :  { %v2674_v5 = vmul.f32 %v6792_v55, %v2672_v48 }
 0xff9   :  { %v6796_v34 = vpop.eup %6795 }
 0xffa   :  { %v2990_v1 = vmul.f32 %v6796_v34, %v6786_v15  ;;  %v6798_v19 = vpop.eup %6797 }
 0xffb   :  { %v6800_v15 = vpop.eup %6799 }
 0xffc   :  { %v2991_v13 = vmul.f32 %v2990_v1, %v7822_v0  ;;  %v7877_v0 = vld [vmem:[%s8532_s2 + $0x94] ss:$16 sps:$4 sm:$0xff]   ;;  %v2885_v21 = vmul.f32 %v6800_v15, %v6798_v19 }
 0xffe   :  { %v2992_v7 = vpack.c.bf16 %v2991_v13, %v2991_v13  ;;  %v7886_v2 = vpack.c.bf16 %v2885_v21, %v2885_v21 }
0x1000   :  { %6119 = vmatmul.mubr.msk.bf16.vlgmr.msra.gmra.mrb[104].mxu0 %vm2254_vm3, %v2992_v7 }
0x1001   :  { %6135 = vmatpush3.bf16.msra.mxu0 %v7684_v30  ;;  %6140 = vmatprep.mubr.msk.bf16.mxu0 %vm6945_vm2, %v8543_v24 }
0x1002   :  { %6136 = vmatprep.subr.bf16.mxu0 %v8543_v24 }
0x1005   :  { %6137 = vmatpush3.bf16.msra.mxu0 %v7692_v50 }
0x1006   :  { %6138 = vmatprep.subr.bf16.mxu0 %v8543_v24 }
0x1009   :  { %6139 = vmatpush3.bf16.msra.mxu0 %v7701_v10 }
0x100a   :  { %3235 = vmatprep.subr.bf16.mxu0 %v7877_v0 }
0x100c   :  { %6141 = vmatmul.mubr.msk.bf16.vlgmr.msra.gmra.mrb[108].mxu0 %vm2254_vm3, %v2992_v7 }
0x100d   :  { %3236 = vmatpush1.bf16.msra.mxu0 %v7447_v56  ;;  %3267 = vmatprep.mubr.bf16.mxu0 %v8551_v17  ;;  %v7899_v56 = vld [vmem:[%s8536_s1 + $0x8] sm:$0xf] }
0x100e   :  { %5789 = vmatprep.subr.msk.bf16.mxu0 %vm127_vm0, %v7449_v58 }
0x1011   :  { %3238 = vmatpush1.bf16.msra.mxu0 %v7463_v23 }
0x1012   :  { %3320 = vmatprep.subr.bf16.mxu0 %v7468_v12 }
0x1014   :  { %5790 = vmatmul.mubr.msk.bf16.vlgmr.msra.gmra.mrb[112].mxu0 %vm123_vm1, %v7886_v2 }
0x1015   :  { %3321 = vmatpush1.bf16.msra.mxu0 %v7482_v18  ;;  %3352 = vmatprep.mubr.bf16.mxu0 %v8551_v17 }
0x1016   :  { %5793 = vmatprep.subr.msk.bf16.mxu0 %vm127_vm0, %v7490_v27 }
0x1019   :  { %3323 = vmatpush1.bf16.msra.mxu0 %v7508_v36 }
0x101a   :  { %6152 = vmatprep.subr.bf16.mxu0 %v8543_v24 }
0x101c   :  { %5794 = vmatmul.mubr.msk.bf16.vlgmr.msra.gmra.mrb[116].mxu0 %vm123_vm1, %v7899_v56 }
0x101d   :  { %6153 = vmatpush3.bf16.msra.mxu0 %v7560_v44  ;;  %6158 = vmatprep.mubr.msk.bf16.mxu0 %vm6945_vm2, %v8543_v24 }
0x101e   :  { %6154 = vmatprep.subr.bf16.mxu0 %v8543_v24 }
0x1021   :  { %6155 = vmatpush3.bf16.msra.mxu0 %v7566_v31 }
0x1022   :  { %6156 = vmatprep.subr.bf16.mxu0 %v8543_v24 }
0x1025   :  { %6157 = vmatpush3.bf16.msra.mxu0 %v7607_v11 }
0x1026   :  { %6178 = vmatprep.subr.bf16.mxu0 %v8543_v24 }
0x1067   :  { %v2682_v37 = vpop.permute.xlu1 %2681 }
0x1068   :  { %v7917_v31 = vadd.f32 %v2682_v37, %v2674_v5 }
0x106a   :  { %v3082_v45 = vpack.c.bf16 %v7917_v31, %v7917_v31 }
0x10d3   :  { %v3030_v12 = vpop.f32.mrb[104].mxu0 }
0x10d4   :  { %v3031_v18 = vadd.f32 %v3030_v12, %v7748_v39  ;;  %v6120_v43 = vpop.f32.mrb[105].mxu0 }
0x10d5   :  { %v3033_v52 = vpop.f32.mrb[106].mxu0 }
0x10d6   :  { %v3036_v61 = vmax.f32 %v3031_v18, 0.0  ;;  %v6121_v44 = vpop.f32.mrb[107].mxu0 }
0x10d8   :  { %v3037_v35 = vpack.c.bf16 %v3036_v61, %v3036_v61 }
0x10da   :  { %6125 = vmatmul.mubr.msk.bf16.vlgmr.msra.gmra.mrb[96].mxu1 %vm2310_vm4, %v3037_v35 }
0x10db   :  { %6129 = vmatpush3.bf16.msra.mxu1 %v7755_v60  ;;  %6130 = vmatprep.mubr.msk.bf16.mxu1 %vm6945_vm2, %v8543_v24 }
0x10dc   :  { %6144 = vmatprep.subr.bf16.mxu1 %v8543_v24 }
0x10df   :  { %v3160_v3 = vpop.f32.mrb[108].mxu0 }
0x10e0   :  { %v6142_v34 = vpop.f32.mrb[109].mxu0 }
0x10e1   :  { %v3163_v1 = vpop.f32.mrb[110].mxu0 }
0x10e2   :  { %v6143_v51 = vpop.f32.mrb[111].mxu0  ;;  %6131 = vmatmul.mubr.msk.bf16.vlgmr.msra.gmra.mrb[100].mxu1 %vm2492_vm5, %v3082_v45 }
0x10e3   :  { %6145 = vmatpush3.bf16.msra.mxu1 %v7768_v20  ;;  %6148 = vmatprep.mubr.msk.bf16.mxu1 %vm6945_vm2, %v8543_v24 }
0x10e4   :  { %6146 = vmatprep.subr.bf16.mxu1 %v8543_v24 }
0x10e7   :  { %v3269_v55 = vpop.f32.mrb[112].mxu0  ;;  %6147 = vmatpush3.bf16.msra.mxu1 %v7775_v42 }
0x10e8   :  { %v3271_v13 = vpop.f32.mrb[113].mxu0  ;;  %3276 = vmatprep.subr.bf16.mxu1 %v7487_v40 }
0x10e9   :  { %v3273_v7 = vpop.f32.mrb[114].mxu0 }
0x10ea   :  { %v3274_v19 = vpop.f32.mrb[115].mxu0 }
0x10ef   :  { %v3354_v15 = vpop.f32.mrb[116].mxu0 }
0x10f0   :  { %v3355_v21 = vadd.f32 %v3354_v15, %v3269_v55  ;;  %v3356_v12 = vpop.f32.mrb[117].mxu0 }
0x10f1   :  { %v3357_v18 = vadd.f32 %v3356_v12, %v3271_v13  ;;  %v3358_v43 = vpop.f32.mrb[118].mxu0 }
0x10f2   :  { %v3359_v52 = vpop.f32.mrb[119].mxu0 }
0x11ad   :  { %v7929_v61 = vpop.f32.mrb[96].mxu1 }
0x11ae   :  { %v6126_v44 = vpop.f32.mrb[97].mxu1 }
0x11af   :  { %v3078_v48 = vpop.f32.mrb[98].mxu1 }
0x11b0   :  { %v6127_v35 = vpop.f32.mrb[99].mxu1 }
0x11b5   :  { %v3120_v37 = vpop.f32.mrb[100].mxu1 }
0x11b6   :  { %v3161_v5 = vadd.f32 %v3160_v3, %v3120_v37  ;;  %v6132_v45 = vpop.f32.mrb[101].mxu1 }
0x11b7   :  { %v3123_v34 = vpop.f32.mrb[102].mxu1 }
0x11b8   :  { %v3166_v1 = vadd.f32 %v3161_v5, %v7784_v22  ;;  %v6133_v40 = vpop.f32.mrb[103].mxu1 }
0x11ba   :  { %v3167_v51 = vmax.f32 %v3166_v1, 0.0 }
0x11bc   :  { %v3168_v7 = vpack.c.bf16 %v3167_v51, %v3167_v51 }
0x11be   :  { %6149 = vmatmul.mubr.msk.bf16.vlgmr.msra.gmra.mrb[104].mxu1 %vm2620_vm6, %v3168_v7 }
0x11bf   :  { %3277 = vmatpush1.bf16.msra.mxu1 %v7499_v26  ;;  %3308 = vmatprep.mubr.bf16.mxu1 %v8551_v17  ;;  %v3409_v26 = vadd.f32 %v3357_v18, %v7586_v6 }
0x11c0   :  { %5791 = vmatprep.subr.msk.bf16.mxu1 %vm127_vm0, %v7503_v25 }
0x11c3   :  { %3279 = vmatpush1.bf16.msra.mxu1 %v7518_v63 }
0x11c4   :  { %3361 = vmatprep.subr.bf16.mxu1 %v7526_v38  ;;  %v3402_v38 = vadd.f32 %v3355_v21, %v7581_v57 }
0x11c6   :  { %5792 = vmatmul.mubr.msk.bf16.vlgmr.msra.gmra.mrb[108].mxu1 %vm123_vm1, %v7886_v2  ;;  %v5797_v2 = vmul.f32 -1.442695, %v3402_v38 }
0x11c7   :  { %3362 = vmatpush1.bf16.msra.mxu1 %v7537_v29  ;;  %3393 = vmatprep.mubr.bf16.mxu1 %v8551_v17  ;;  %v5798_v29 = vmul.f32 -1.442695, %v3409_v26 }
0x11c8   :  { %5795 = vmatprep.subr.msk.bf16.mxu1 %vm127_vm0, %v7540_v49 }
0x11c9   :  { %6801 = vpow2.f32 %v5798_v29 }
0x11ca   :  { %6803 = vpow2.f32 %v5797_v2 }
0x11cb   :  { %3364 = vmatpush1.bf16.msra.mxu1 %v7550_v46 }
0x11cc   :  { %6162 = vmatprep.subr.bf16.mxu1 %v8543_v24 }
0x11ce   :  { %5796 = vmatmul.mubr.msk.bf16.vlgmr.msra.gmra.mrb[112].mxu1 %vm123_vm1, %v7899_v56 }
0x11cf   :  { %6163 = vmatpush3.bf16.msra.mxu1 %v7628_v16  ;;  %6164 = vmatprep.mubr.msk.bf16.mxu1 %vm6945_vm2, %v8543_v24 }
0x11d0   :  { %6168 = vmatprep.subr.bf16.mxu1 %v8543_v24 }
0x11d3   :  { %v6802_v43 = vpop.eup %6801 }
0x11d4   :  { %v6804_v52 = vpop.eup %6803  ;;  %v3413_v44 = vadd.f32 1.0, %v6802_v43 }
0x11d5   :  { %v3406_v18 = vadd.f32 1.0, %v6804_v52 }
0x11d6   :  { %6805 = vrcp.f32 %v3413_v44 }
0x11d7   :  { %6807 = vrcp.f32 %v3406_v18 }
0x11e0   :  { %v6806_v1 = vpop.eup %6805 }
0x11e1   :  { %v6808_v40 = vpop.eup %6807  ;;  %v3425_v7 = vmul.f32 %v6806_v1, %v7816_v4 }
0x1291   :  { %v7955_v3 = vpop.f32.mrb[104].mxu1 }
0x1292   :  { %v6150_v55 = vpop.f32.mrb[105].mxu1 }
0x1293   :  { %v3209_v13 = vpop.f32.mrb[106].mxu1 }
0x1294   :  { %v6151_v19 = vpop.f32.mrb[107].mxu1 }
0x1299   :  { %v3310_v56 = vpop.f32.mrb[108].mxu1 }
0x129a   :  { %v3312_v16 = vpop.f32.mrb[109].mxu1 }
0x129b   :  { %v3314_v15 = vpop.f32.mrb[110].mxu1 }
0x129c   :  { %v3315_v12 = vpop.f32.mrb[111].mxu1 }
0x12a1   :  { %v3395_v48 = vpop.f32.mrb[112].mxu1 }
0x12a2   :  { %v7957_v35 = vadd.f32 %v3395_v48, %v3310_v56  ;;  %v3397_v21 = vpop.f32.mrb[113].mxu1 }
0x12a3   :  { %v3398_v37 = vadd.f32 %v3397_v21, %v3312_v16  ;;  %v3399_v5 = vpop.f32.mrb[114].mxu1  ;;  %v3076_v21 = vadd.f32 %v7929_v61, %v7847_v41 }
0x12a4   :  { %v3400_v45 = vpop.f32.mrb[115].mxu1 }
0x12a5   :  { %v3423_v34 = vadd.f32 %v3398_v37, %v7594_v59 }
0x12a7   :  { %6809 = vtanh.f32 %v3423_v34 }
0x12a8   :  { %6811 = vtanh.f32 %v3076_v21 }
0x12b1   :  { %v6810_v51 = vpop.eup %6809 }
0x12b2   :  { %v3426_v26 = vmul.f32 %v6810_v51, %v6808_v40 }
0x12b4   :  { %v7961_v38 = vadd.f32 %v3426_v26, %v3425_v7 }
0x12b6   :  { %3431 = vrot.lane.b32.xlu0 %v7961_v38, %s6946_s26 }
0x1328   :  { %v3432_v29 = vpop.permute.xlu0 %3431 }
0x1329   :  { %v3434_v2 = vsel %vm123_vm1, %v7816_v4, %v3432_v29 }
0x132a   :  { %v3435_v55 = vpack.c.bf16 %v3434_v2, %v3434_v2 }
0x132c   :  { %6159 = vmatmul.mubr.msk.bf16.vlgmr.msra.gmra.mrb[120].mxu0 %vm2254_vm3, %v3435_v55 }
0x132d   :  { %6179 = vmatpush3.bf16.msra.mxu0 %v7741_v53  ;;  %6180 = vmatprep.mubr.msk.bf16.mxu0 %vm6945_vm2, %v8543_v24 }
0x132e   :  { %6184 = vmatprep.subr.bf16.mxu0 %v8543_v24 }
0x13ff   :  { %v3473_v13 = vpop.f32.mrb[120].mxu0 }
0x1400   :  { %v3474_v19 = vadd.f32 %v3473_v13, %v7635_v8  ;;  %v6160_v56 = vpop.f32.mrb[121].mxu0 }
0x1401   :  { %v3476_v16 = vpop.f32.mrb[122].mxu0 }
0x1402   :  { %v3479_v15 = vmax.f32 %v3474_v19, 0.0  ;;  %v6161_v12 = vpop.f32.mrb[123].mxu0 }
0x1404   :  { %v3480_v43 = vpack.c.bf16 %v3479_v15, %v3479_v15 }
0x1406   :  { %6165 = vmatmul.mubr.msk.bf16.vlgmr.msra.gmra.mrb[116].mxu1 %vm2310_vm4, %v3480_v43 }
0x1407   :  { %6169 = vmatpush3.bf16.msra.mxu1 %v7655_v54  ;;  %6174 = vmatprep.mubr.msk.bf16.mxu1 %vm6945_vm2, %v8543_v24 }
0x1408   :  { %6170 = vmatprep.subr.bf16.mxu1 %v8543_v24 }
0x140b   :  { %6171 = vmatpush3.bf16.msra.mxu1 %v7662_v62  ;;  %v6812_v62 = vpop.eup %6811 }
0x140c   :  { %6172 = vmatprep.subr.bf16.mxu1 %v8543_v24 }
0x140f   :  { %6173 = vmatpush3.bf16.msra.mxu1 %v7668_v9  ;;  %v3207_v9 = vadd.f32 %v7955_v3, %v7857_v32  ;;  %v3416_v3 = vadd.f32 %v7957_v35, %v7677_v14 }
0x1410   :  { %6190 = vmatprep.subr.bf16.mxu1 %v8543_v24 }
0x1411   :  { %v5787_v37 = vmul.f32 -1.442695, %v3207_v9  ;;  %v5799_v55 = vmul.f32 -1.442695, %v3416_v3  ;;  %v8080_v3 = vld [vmem:[%s8532_s2 + $0x9c] ss:$16 sps:$4 sm:$0xff]  }
0x1413   :  { %6813 = vpow2.f32 %v5787_v37 }
0x141d   :  { %v6814_v1 = vpop.eup %6813 }
0x141e   :  { %v3215_v7 = vadd.f32 1.0, %v6814_v1 }
0x14d9   :  { %v3518_v4 = vpop.f32.mrb[116].mxu1 }
0x14da   :  { %v3519_v52 = vadd.f32 %v3518_v4, %v7644_v47  ;;  %v6166_v44 = vpop.f32.mrb[117].mxu1  ;;  %v8019_v4 = vld [vmem:[%s8532_s2 + $0x64] ss:$16 sps:$4 sm:$0xff]  }
0x14db   :  { %v3521_v48 = vpop.f32.mrb[118].mxu1  ;;  %v8037_v44 = vld [vmem:[%s8536_s1 + $0xc] sm:$0xf] }
0x14dc   :  { %v6167_v18 = vpop.f32.mrb[119].mxu1  ;;  %v3524_v54 = vsel %vm2254_vm3, %v3519_v52, -inf  ;;  %v8045_v48 = vld [vmem:[%s8535_s3 + $0x24] sm:$0xff]  }
0x14dd   :  { %3525 = vmax.xlane.f32.xlu0 %v3524_v54  ;;  %v8054_v18 = vld [vmem:[%s8535_s3 + $0x2c] sm:$0xff]  }
0x14f3   :  { %3220 = vrot.lane.b32.xlu0 %v6812_v62, %s6948_s27 }
0x156a   :  { %v3526_v5 = vpop.xlane.xlu0 %3525 }
0x156b   :  { %v3527_v45 = vsub.f32 %v3519_v52, %v3526_v5  ;;  %v8027_v52 = vld [vmem:[%s8532_s2 + $0x60] ss:$16 sps:$4 sm:$0xff]  }
0x156d   :  { %v3528_v34 = vmul.f32 1.442695, %v3527_v45 }
0x156e   :  { %v3221_v61 = vpop.permute.xlu0 %3220 }
0x156f   :  { %6815 = vpow2.f32 %v3528_v34 }
0x1570   :  { %6817 = vrcp.f32 %v3215_v7 }
0x1571   :  { %6819 = vpow2.f32 %v5799_v55 }
0x1579   :  { %v6816_v40 = vpop.eup %6815 }
0x157a   :  { %v3530_v51 = vsel %vm2254_vm3, %v6816_v40, 0.0  ;;  %v6818_v26 = vpop.eup %6817 }
0x157b   :  { %3531 = vadd.xlane.f32.xlu1 %v3530_v51  ;;  %v3223_v29 = vmul.f32 %v6818_v26, %v3221_v61  ;;  %v6820_v19 = vpop.eup %6819  ;;  %v3218_v1 = vmul.f32 %v6818_v26, %v7917_v31 }
0x157c   :  { %v3420_v15 = vadd.f32 1.0, %v6820_v19 }
0x158c   :  { %3225 = vrot.lane.b32.xlu1 %v3223_v29, %s6949_s28 }
0x1608   :  { %v3532_v13 = vpop.xlane.xlu1 %3531 }
0x1609   :  { %6821 = vrcp.f32 %v3532_v13 }
0x160a   :  { %6823 = vrcp.f32 %v3420_v15 }
0x160b   :  { %6825 = vtanh.f32 %v7961_v38 }
0x160c   :  { %v3226_v34 = vpop.permute.xlu1 %3225 }
0x1613   :  { %v6822_v56 = vpop.eup %6821 }
0x1614   :  { %v3534_v16 = vmul.f32 %v6822_v56, %v6816_v40  ;;  %v6824_v35 = vpop.eup %6823 }
0x1616   :  { %v3535_v12 = vmul.f32 %v3534_v16, %v3434_v2  ;;  %v6826_v2 = vpop.eup %6825 }
0x1618   :  { %v3536_v43 = vpack.c.bf16 %v3535_v12, %v3535_v12 }
0x161a   :  { %6175 = vmatmul.mubr.msk.bf16.vlgmr.msra.gmra.mrb[120].mxu1 %vm2254_vm3, %v3536_v43 }
0x161b   :  { %6191 = vmatpush3.bf16.msra.mxu1 %v7684_v30  ;;  %6196 = vmatprep.mubr.msk.bf16.mxu1 %vm6945_vm2, %v8543_v24  ;;  %v8007_v30 = vld [vmem:[%s8532_s2 + $0x90] ss:$16 sps:$4 sm:$0xff]  }
0x161c   :  { %6192 = vmatprep.subr.bf16.mxu1 %v8543_v24 }
0x161f   :  { %6193 = vmatpush3.bf16.msra.mxu1 %v7692_v50  ;;  %v3429_v50 = vmul.f32 %v6826_v2, %v6824_v35 }
0x1620   :  { %6194 = vmatprep.subr.bf16.mxu1 %v8543_v24 }
0x1623   :  { %6195 = vmatpush3.bf16.msra.mxu1 %v7701_v10  ;;  %v8014_v10 = vpack.c.bf16 %v3429_v50, %v3429_v50 }
0x1624   :  { %3779 = vmatprep.subr.bf16.mxu1 %v7877_v0 }
0x1626   :  { %6197 = vmatmul.mubr.msk.bf16.vlgmr.msra.gmra.mrb[124].mxu1 %vm2254_vm3, %v3536_v43 }
0x1627   :  { %3780 = vmatpush1.bf16.msra.mxu1 %v8007_v30  ;;  %3811 = vmatprep.mubr.bf16.mxu1 %v8551_v17 }
0x1628   :  { %5809 = vmatprep.subr.msk.bf16.mxu1 %vm127_vm0, %v7449_v58 }
0x162b   :  { %3782 = vmatpush1.bf16.msra.mxu1 %v7463_v23 }
0x162c   :  { %3864 = vmatprep.subr.bf16.mxu1 %v8019_v4 }
0x162e   :  { %5810 = vmatmul.mubr.msk.bf16.vlgmr.msra.gmra.mrb[128].mxu1 %vm123_vm1, %v8014_v10 }
0x162f   :  { %3865 = vmatpush1.bf16.msra.mxu1 %v8027_v52  ;;  %3896 = vmatprep.mubr.bf16.mxu1 %v8551_v17 }
0x1630   :  { %5813 = vmatprep.subr.msk.bf16.mxu1 %vm127_vm0, %v7490_v27 }
0x1633   :  { %3867 = vmatpush1.bf16.msra.mxu1 %v7508_v36 }
0x1634   :  { %6208 = vmatprep.subr.bf16.mxu1 %v8543_v24 }
0x1636   :  { %5814 = vmatmul.mubr.msk.bf16.vlgmr.msra.gmra.mrb[132].mxu1 %vm123_vm1, %v8037_v44 }
0x1637   :  { %6209 = vmatpush3.bf16.msra.mxu1 %v8045_v48  ;;  %6214 = vmatprep.mubr.msk.bf16.mxu1 %vm6945_vm2, %v8543_v24 }
0x1638   :  { %6210 = vmatprep.subr.bf16.mxu1 %v8543_v24 }
0x163b   :  { %6211 = vmatpush3.bf16.msra.mxu1 %v8054_v18 }
0x163c   :  { %6212 = vmatprep.subr.bf16.mxu1 %v8543_v24 }
0x163f   :  { %6213 = vmatpush3.bf16.msra.mxu1 %v7607_v11  ;;  %v8066_v11 = vadd.f32 %v3226_v34, %v3218_v1  ;;  %v8090_v34 = vld [vmem:[%s8532_s2 + $0x98] ss:$16 sps:$4 sm:$0xff]   ;;  %v8100_v1 = vld [vmem:[%s8532_s2 + $0x6c] ss:$16 sps:$4 sm:$0xff]  }
0x1640   :  { %6234 = vmatprep.subr.bf16.mxu1 %v8543_v24 }
0x1641   :  { %v3626_v51 = vpack.c.bf16 %v8066_v11, %v8066_v11 }
0x16ed   :  { %v3574_v54 = vpop.f32.mrb[120].mxu1 }
0x16ee   :  { %v3575_v21 = vadd.f32 %v3574_v54, %v7748_v39  ;;  %v6176_v62 = vpop.f32.mrb[121].mxu1 }
0x16ef   :  { %v3577_v9 = vpop.f32.mrb[122].mxu1 }
0x16f0   :  { %v3580_v37 = vmax.f32 %v3575_v21, 0.0  ;;  %v6177_v5 = vpop.f32.mrb[123].mxu1 }
0x16f2   :  { %v3581_v45 = vpack.c.bf16 %v3580_v37, %v3580_v37 }
0x16f4   :  { %6181 = vmatmul.mubr.msk.bf16.vlgmr.msra.gmra.mrb[124].mxu0 %vm2310_vm4, %v3581_v45 }
0x16f5   :  { %6185 = vmatpush3.bf16.msra.mxu0 %v7755_v60  ;;  %6186 = vmatprep.mubr.msk.bf16.mxu0 %vm6945_vm2, %v8543_v24 }
0x16f6   :  { %6200 = vmatprep.subr.bf16.mxu0 %v8543_v24 }
0x16f9   :  { %v3704_v40 = vpop.f32.mrb[124].mxu1 }
0x16fa   :  { %v6198_v7 = vpop.f32.mrb[125].mxu1 }
0x16fb   :  { %v3707_v61 = vpop.f32.mrb[126].mxu1 }
0x16fc   :  { %v6199_v29 = vpop.f32.mrb[127].mxu1  ;;  %6187 = vmatmul.mubr.msk.bf16.vlgmr.msra.gmra.mrb[128].mxu0 %vm2492_vm5, %v3626_v51 }
0x16fd   :  { %6201 = vmatpush3.bf16.msra.mxu0 %v7768_v20  ;;  %6204 = vmatprep.mubr.msk.bf16.mxu0 %vm6945_vm2, %v8543_v24 }
0x16fe   :  { %6202 = vmatprep.subr.bf16.mxu0 %v8543_v24 }
0x1701   :  { %v3813_v31 = vpop.f32.mrb[128].mxu1  ;;  %6203 = vmatpush3.bf16.msra.mxu0 %v7775_v42 }
0x1702   :  { %v3815_v26 = vpop.f32.mrb[129].mxu1  ;;  %3820 = vmatprep.subr.bf16.mxu0 %v8080_v3 }
0x1703   :  { %v3817_v55 = vpop.f32.mrb[130].mxu1 }
0x1704   :  { %v3818_v13 = vpop.f32.mrb[131].mxu1 }
0x1709   :  { %v3898_v19 = vpop.f32.mrb[132].mxu1 }
0x170a   :  { %v3899_v20 = vadd.f32 %v3898_v19, %v3813_v31  ;;  %v3900_v56 = vpop.f32.mrb[133].mxu1 }
0x170b   :  { %v3901_v16 = vadd.f32 %v3900_v56, %v3815_v26  ;;  %v3902_v15 = vpop.f32.mrb[134].mxu1 }
0x170c   :  { %v3903_v12 = vpop.f32.mrb[135].mxu1  ;;  %v3946_v7 = vadd.f32 %v3899_v20, %v7581_v57 }
0x170d   :  { %v3953_v51 = vadd.f32 %v3901_v16, %v7586_v6 }
0x170e   :  { %v5817_v29 = vmul.f32 -1.442695, %v3946_v7 }
0x170f   :  { %v5818_v61 = vmul.f32 -1.442695, %v3953_v51 }
0x1711   :  { %6827 = vpow2.f32 %v5818_v61 }
0x1712   :  { %6829 = vpow2.f32 %v5817_v29 }
0x171b   :  { %v6828_v12 = vpop.eup %6827 }
0x17c7   :  { %v8083_v43 = vpop.f32.mrb[124].mxu0 }
0x17c8   :  { %v6182_v35 = vpop.f32.mrb[125].mxu0 }
0x17c9   :  { %v3622_v42 = vpop.f32.mrb[126].mxu0  ;;  %v6830_v35 = vpop.eup %6829 }
0x17ca   :  { %v6183_v2 = vpop.f32.mrb[127].mxu0  ;;  %v3957_v42 = vadd.f32 1.0, %v6828_v12  ;;  %v3950_v16 = vadd.f32 1.0, %v6830_v35 }
0x17cc   :  { %6831 = vrcp.f32 %v3957_v42  ;;  %v8167_v42 = vld [vmem:[%s8535_s3 + $0x54] sm:$0xff]  }
0x17cd   :  { %6833 = vrcp.f32 %v3950_v16 }
0x17cf   :  { %v3664_v50 = vpop.f32.mrb[128].mxu0 }
0x17d0   :  { %v3705_v54 = vadd.f32 %v3704_v40, %v3664_v50  ;;  %v6188_v21 = vpop.f32.mrb[129].mxu0  ;;  %v8108_v40 = vld [vmem:[%s8532_s2 + $0x68] ss:$16 sps:$4 sm:$0xff]  }
0x17d1   :  { %v3667_v62 = vpop.f32.mrb[130].mxu0 }
0x17d2   :  { %v3710_v9 = vadd.f32 %v3705_v54, %v7784_v22  ;;  %v6189_v37 = vpop.f32.mrb[131].mxu0 }
0x17d4   :  { %v3711_v5 = vmax.f32 %v3710_v9, 0.0 }
0x17d6   :  { %v3712_v45 = vpack.c.bf16 %v3711_v5, %v3711_v5  ;;  %v6832_v37 = vpop.eup %6831 }
0x17d7   :  { %v6834_v5 = vpop.eup %6833  ;;  %v3969_v51 = vmul.f32 %v6832_v37, %v7961_v38 }
0x17d8   :  { %6205 = vmatmul.mubr.msk.bf16.vlgmr.msra.gmra.mrb[132].mxu0 %vm2620_vm6, %v3712_v45 }
0x17d9   :  { %3821 = vmatpush1.bf16.msra.mxu0 %v8090_v34  ;;  %3852 = vmatprep.mubr.bf16.mxu0 %v8551_v17 }
0x17da   :  { %5811 = vmatprep.subr.msk.bf16.mxu0 %vm127_vm0, %v7503_v25 }
0x17dd   :  { %3823 = vmatpush1.bf16.msra.mxu0 %v7518_v63 }
0x17de   :  { %3905 = vmatprep.subr.bf16.mxu0 %v8100_v1 }
0x17e0   :  { %5812 = vmatmul.mubr.msk.bf16.vlgmr.msra.gmra.mrb[136].mxu0 %vm123_vm1, %v8014_v10  ;;  %v8121_v10 = vld [vmem:[%s8535_s3 + $0x3c] sm:$0xff]  }
0x17e1   :  { %3906 = vmatpush1.bf16.msra.mxu0 %v8108_v40  ;;  %3937 = vmatprep.mubr.bf16.mxu0 %v8551_v17 }
0x17e2   :  { %5815 = vmatprep.subr.msk.bf16.mxu0 %vm127_vm0, %v7540_v49 }
0x17e5   :  { %3908 = vmatpush1.bf16.msra.mxu0 %v7550_v46 }
0x17e6   :  { %6218 = vmatprep.subr.bf16.mxu0 %v8543_v24 }
0x17e8   :  { %5816 = vmatmul.mubr.msk.bf16.vlgmr.msra.gmra.mrb[140].mxu0 %vm123_vm1, %v8037_v44 }
0x17e9   :  { %6219 = vmatpush3.bf16.msra.mxu0 %v8121_v10  ;;  %6220 = vmatprep.mubr.msk.bf16.mxu0 %vm6945_vm2, %v8543_v24 }
0x17ea   :  { %6224 = vmatprep.subr.bf16.mxu0 %v8543_v24 }
0x18ab   :  { %v8129_v31 = vpop.f32.mrb[132].mxu0 }
0x18ac   :  { %v6206_v44 = vpop.f32.mrb[133].mxu0 }
0x18ad   :  { %v3753_v26 = vpop.f32.mrb[134].mxu0 }
0x18ae   :  { %v6207_v55 = vpop.f32.mrb[135].mxu0 }
0x18b3   :  { %v3854_v13 = vpop.f32.mrb[136].mxu0 }
0x18b4   :  { %v3856_v19 = vpop.f32.mrb[137].mxu0 }
0x18b5   :  { %v3858_v56 = vpop.f32.mrb[138].mxu0 }
0x18b6   :  { %v3859_v15 = vpop.f32.mrb[139].mxu0 }
0x18bb   :  { %v3939_v2 = vpop.f32.mrb[140].mxu0 }
0x18bc   :  { %v8131_v50 = vadd.f32 %v3939_v2, %v3854_v13  ;;  %v3941_v20 = vpop.f32.mrb[141].mxu0 }
0x18bd   :  { %v3942_v54 = vadd.f32 %v3941_v20, %v3856_v19  ;;  %v3943_v21 = vpop.f32.mrb[142].mxu0 }
0x18be   :  { %v3944_v62 = vpop.f32.mrb[143].mxu0 }
0x18bf   :  { %v3967_v9 = vadd.f32 %v3942_v54, %v7594_v59 }
0x18c1   :  { %6835 = vtanh.f32 %v3967_v9  ;;  %v3620_v9 = vadd.f32 %v8083_v43, %v7847_v41 }
0x18c3   :  { %6837 = vtanh.f32 %v3620_v9  ;;  %v8187_v9 = vld [vmem:[%s8535_s3 + $0x64] sm:$0xff]  }
0x18cb   :  { %v6836_v45 = vpop.eup %6835 }
0x18cc   :  { %v3970_v7 = vmul.f32 %v6836_v45, %v6834_v5  ;;  %v3751_v5 = vadd.f32 %v8129_v31, %v7857_v32  ;;  %v3960_v31 = vadd.f32 %v8131_v50, %v7677_v14  ;;  %v8196_v50 = vld [vmem:[%s8535_s3 + $0x6c] sm:$0xff]  }
0x18cd   :  { %v6838_v37 = vpop.eup %6837 }
0x18ce   :  { %v8135_v61 = vadd.f32 %v3970_v7, %v3969_v51  ;;  %v5807_v45 = vmul.f32 -1.442695, %v3751_v5 }
0x18d0   :  { %3975 = vrot.lane.b32.xlu0 %v8135_v61, %s6946_s26  ;;  %6839 = vpow2.f32 %v5807_v45 }
0x1942   :  { %v3976_v29 = vpop.permute.xlu0 %3975 }
0x1943   :  { %v3978_v44 = vsel %vm123_vm1, %v7961_v38, %v3976_v29  ;;  %v8151_v38 = vld [vmem:[%s8535_s3 + $0x44] sm:$0xff]  }
0x1944   :  { %v3979_v26 = vpack.c.bf16 %v3978_v44, %v3978_v44 }
0x1946   :  { %6215 = vmatmul.mubr.msk.bf16.vlgmr.msra.gmra.mrb[136].mxu1 %vm2254_vm3, %v3979_v26  ;;  %v6840_v26 = vpop.eup %6839 }
0x1947   :  { %6235 = vmatpush3.bf16.msra.mxu1 %v7741_v53  ;;  %6236 = vmatprep.mubr.msk.bf16.mxu1 %vm6945_vm2, %v8543_v24  ;;  %v8160_v53 = vld [vmem:[%s8535_s3 + $0x4c] sm:$0xff]  }
0x1948   :  { %6240 = vmatprep.subr.bf16.mxu1 %v8543_v24 }
0x1a19   :  { %v4017_v55 = vpop.f32.mrb[136].mxu1 }
0x1a1a   :  { %v4018_v13 = vadd.f32 %v4017_v55, %v7635_v8  ;;  %v6216_v19 = vpop.f32.mrb[137].mxu1 }
0x1a1b   :  { %v4020_v56 = vpop.f32.mrb[138].mxu1  ;;  %v3759_v19 = vadd.f32 1.0, %v6840_v26 }
0x1a1c   :  { %v4023_v15 = vmax.f32 %v4018_v13, 0.0  ;;  %v6217_v12 = vpop.f32.mrb[139].mxu1 }
0x1a1d   :  { %v5819_v12 = vmul.f32 -1.442695, %v3960_v31 }
0x1a1e   :  { %v4024_v35 = vpack.c.bf16 %v4023_v15, %v4023_v15 }
0x1a20   :  { %6221 = vmatmul.mubr.msk.bf16.vlgmr.msra.gmra.mrb[144].mxu0 %vm2310_vm4, %v4024_v35 }
0x1a21   :  { %6225 = vmatpush3.bf16.msra.mxu0 %v8151_v38  ;;  %6230 = vmatprep.mubr.msk.bf16.mxu0 %vm6945_vm2, %v8543_v24 }
0x1a22   :  { %6226 = vmatprep.subr.bf16.mxu0 %v8543_v24 }
0x1a25   :  { %6227 = vmatpush3.bf16.msra.mxu0 %v8160_v53 }
0x1a26   :  { %6228 = vmatprep.subr.bf16.mxu0 %v8543_v24 }
0x1a29   :  { %6229 = vmatpush3.bf16.msra.mxu0 %v8167_v42 }
0x1a2a   :  { %6246 = vmatprep.subr.bf16.mxu0 %v8543_v24 }
0x1af3   :  { %v4062_v2 = vpop.f32.mrb[144].mxu0 }
0x1af4   :  { %v4063_v16 = vadd.f32 %v4062_v2, %v7644_v47  ;;  %v6222_v20 = vpop.f32.mrb[145].mxu0 }
0x1af5   :  { %v4065_v54 = vpop.f32.mrb[146].mxu0 }
0x1af6   :  { %v6223_v21 = vpop.f32.mrb[147].mxu0  ;;  %v4068_v62 = vsel %vm2254_vm3, %v4063_v16, -inf }
0x1af7   :  { %4069 = vmax.xlane.f32.xlu0 %v4068_v62 }
0x1b0d   :  { %3764 = vrot.lane.b32.xlu0 %v6838_v37, %s6948_s27 }
0x1b84   :  { %v4070_v51 = vpop.xlane.xlu0 %4069 }
0x1b85   :  { %v4071_v7 = vsub.f32 %v4063_v16, %v4070_v51 }
0x1b87   :  { %v4072_v29 = vmul.f32 1.442695, %v4071_v7  ;;  %v8240_v7 = vld [vmem:[%s8535_s3 + $0x34] sm:$0xff]  }
0x1b88   :  { %v3765_v43 = vpop.permute.xlu0 %3764 }
0x1b89   :  { %6841 = vpow2.f32 %v4072_v29 }
0x1b8a   :  { %6843 = vrcp.f32 %v3759_v19 }
0x1b8b   :  { %6845 = vpow2.f32 %v5819_v12 }
0x1b93   :  { %v6842_v55 = vpop.eup %6841 }
0x1b94   :  { %v4074_v13 = vsel %vm2254_vm3, %v6842_v55, 0.0  ;;  %v6844_v56 = vpop.eup %6843 }
0x1b95   :  { %4075 = vadd.xlane.f32.xlu1 %v4074_v13  ;;  %v3767_v15 = vmul.f32 %v6844_v56, %v3765_v43  ;;  %v6846_v2 = vpop.eup %6845  ;;  %v3762_v12 = vmul.f32 %v6844_v56, %v8066_v11  ;;  %v8259_v11 = vld [vmem:[%s8535_s3 + $0x80] sm:$0xff]  }
0x1b96   :  { %v3964_v54 = vadd.f32 1.0, %v6846_v2 }
0x1ba6   :  { %3769 = vrot.lane.b32.xlu1 %v3767_v15, %s6949_s28 }
0x1c22   :  { %v4076_v35 = vpop.xlane.xlu1 %4075 }
0x1c23   :  { %6847 = vrcp.f32 %v4076_v35 }
0x1c24   :  { %6849 = vrcp.f32 %v3964_v54 }
0x1c25   :  { %6851 = vtanh.f32 %v8135_v61 }
0x1c26   :  { %v3770_v31 = vpop.permute.xlu1 %3769 }
0x1c27   :  { %v8250_v35 = vadd.f32 %v3770_v31, %v3762_v12 }
0x1c2d   :  { %v6848_v16 = vpop.eup %6847 }
0x1c2e   :  { %v4078_v20 = vmul.f32 %v6848_v16, %v6842_v55  ;;  %v6850_v37 = vpop.eup %6849  ;;  %v4170_v16 = vpack.c.bf16 %v8250_v35, %v8250_v35 }
0x1c2f   :  { %v6852_v5 = vpop.eup %6851 }
0x1c30   :  { %v4079_v21 = vmul.f32 %v4078_v20, %v3978_v44  ;;  %v8203_v44 = vld [vmem:[%s8535_s3 + $0x74] sm:$0xff]   ;;  %v3973_v45 = vmul.f32 %v6852_v5, %v6850_v37 }
0x1c32   :  { %v4080_v62 = vpack.c.bf16 %v4079_v21, %v4079_v21  ;;  %v8213_v51 = vpack.c.bf16 %v3973_v45, %v3973_v45 }
0x1c34   :  { %6231 = vmatmul.mubr.msk.bf16.vlgmr.msra.gmra.mrb[148].mxu0 %vm2254_vm3, %v4080_v62 }
0x1c35   :  { %6247 = vmatpush3.bf16.msra.mxu0 %v8187_v9  ;;  %6252 = vmatprep.mubr.msk.bf16.mxu0 %vm6945_vm2, %v8543_v24 }
0x1c36   :  { %6248 = vmatprep.subr.bf16.mxu0 %v8543_v24 }
0x1c39   :  { %6249 = vmatpush3.bf16.msra.mxu0 %v8196_v50 }
0x1c3a   :  { %6250 = vmatprep.subr.bf16.mxu0 %v8543_v24 }
0x1c3d   :  { %6251 = vmatpush3.bf16.msra.mxu0 %v8203_v44 }
0x1c3e   :  { %4323 = vmatprep.subr.bf16.mxu0 %v7877_v0  ;;  %v8226_v0 = vld [vmem:[%s8536_s1 + $0x10] sm:$0xf] }
0x1c40   :  { %6253 = vmatmul.mubr.msk.bf16.vlgmr.msra.gmra.mrb[152].mxu0 %vm2254_vm3, %v4080_v62  ;;  %v8268_v62 = vld [vmem:[%s8535_s3 + $0x88] sm:$0xff]  }
0x1c41   :  { %4324 = vmatpush1.bf16.msra.mxu0 %v8007_v30  ;;  %4355 = vmatprep.mubr.bf16.mxu0 %v8551_v17 }
0x1c42   :  { %5829 = vmatprep.subr.msk.bf16.mxu0 %vm127_vm0, %v7449_v58 }
0x1c45   :  { %4326 = vmatpush1.bf16.msra.mxu0 %v7463_v23 }
0x1c46   :  { %4408 = vmatprep.subr.bf16.mxu0 %v8019_v4 }
0x1c48   :  { %5830 = vmatmul.mubr.msk.bf16.vlgmr.msra.gmra.mrb[156].mxu0 %vm123_vm1, %v8213_v51 }
0x1c49   :  { %4409 = vmatpush1.bf16.msra.mxu0 %v8027_v52  ;;  %4440 = vmatprep.mubr.bf16.mxu0 %v8551_v17 }
0x1c4a   :  { %5833 = vmatprep.subr.msk.bf16.mxu0 %vm127_vm0, %v7490_v27 }
0x1c4d   :  { %4411 = vmatpush1.bf16.msra.mxu0 %v7508_v36 }
0x1c4e   :  { %6264 = vmatprep.subr.bf16.mxu0 %v8543_v24 }
0x1c50   :  { %5834 = vmatmul.mubr.msk.bf16.vlgmr.msra.gmra.mrb[160].mxu0 %vm123_vm1, %v8226_v0 }
0x1c51   :  { %6265 = vmatpush3.bf16.msra.mxu0 %v8045_v48  ;;  %6270 = vmatprep.mubr.msk.bf16.mxu0 %vm6945_vm2, %v8543_v24 }
0x1c52   :  { %6266 = vmatprep.subr.bf16.mxu0 %v8543_v24 }
0x1c55   :  { %6267 = vmatpush3.bf16.msra.mxu0 %v8054_v18 }
0x1c56   :  { %6268 = vmatprep.subr.bf16.mxu0 %v8543_v24 }
0x1c59   :  { %6269 = vmatpush3.bf16.msra.mxu0 %v8240_v7 }
0x1c5a   :  { %6290 = vmatprep.subr.bf16.mxu0 %v8543_v24 }
0x1d07   :  { %v4118_v29 = vpop.f32.mrb[148].mxu0 }
0x1d08   :  { %v4119_v26 = vadd.f32 %v4118_v29, %v7748_v39  ;;  %v6232_v55 = vpop.f32.mrb[149].mxu0 }
0x1d09   :  { %v4121_v13 = vpop.f32.mrb[150].mxu0 }
0x1d0a   :  { %v4124_v19 = vmax.f32 %v4119_v26, 0.0  ;;  %v6233_v43 = vpop.f32.mrb[151].mxu0 }
0x1d0c   :  { %v4125_v15 = vpack.c.bf16 %v4124_v19, %v4124_v19 }
0x1d0e   :  { %6237 = vmatmul.mubr.msk.bf16.vlgmr.msra.gmra.mrb[140].mxu1 %vm2310_vm4, %v4125_v15 }
0x1d0f   :  { %6241 = vmatpush3.bf16.msra.mxu1 %v7755_v60  ;;  %6242 = vmatprep.mubr.msk.bf16.mxu1 %vm6945_vm2, %v8543_v24 }
0x1d10   :  { %6256 = vmatprep.subr.bf16.mxu1 %v8543_v24 }
0x1d13   :  { %v4248_v2 = vpop.f32.mrb[152].mxu0 }
0x1d14   :  { %v6254_v20 = vpop.f32.mrb[153].mxu0 }
0x1d15   :  { %v4251_v54 = vpop.f32.mrb[154].mxu0 }
0x1d16   :  { %v6255_v21 = vpop.f32.mrb[155].mxu0  ;;  %6243 = vmatmul.mubr.msk.bf16.vlgmr.msra.gmra.mrb[144].mxu1 %vm2492_vm5, %v4170_v16 }
0x1d17   :  { %6257 = vmatpush3.bf16.msra.mxu1 %v8259_v11  ;;  %6260 = vmatprep.mubr.msk.bf16.mxu1 %vm6945_vm2, %v8543_v24 }
0x1d18   :  { %6258 = vmatprep.subr.bf16.mxu1 %v8543_v24 }
0x1d1b   :  { %v4357_v56 = vpop.f32.mrb[156].mxu0  ;;  %6259 = vmatpush3.bf16.msra.mxu1 %v8268_v62 }
0x1d1c   :  { %v4359_v37 = vpop.f32.mrb[157].mxu0  ;;  %4364 = vmatprep.subr.bf16.mxu1 %v8080_v3 }
0x1d1d   :  { %v4361_v5 = vpop.f32.mrb[158].mxu0 }
0x1d1e   :  { %v4362_v45 = vpop.f32.mrb[159].mxu0 }
0x1d23   :  { %v4442_v29 = vpop.f32.mrb[160].mxu0 }
0x1d24   :  { %v4443_v26 = vadd.f32 %v4442_v29, %v4357_v56  ;;  %v4444_v55 = vpop.f32.mrb[161].mxu0 }
0x1d25   :  { %v4445_v13 = vadd.f32 %v4444_v55, %v4359_v37  ;;  %v4446_v19 = vpop.f32.mrb[162].mxu0 }
0x1d26   :  { %v4447_v43 = vpop.f32.mrb[163].mxu0 }
0x1de1   :  { %v8272_v15 = vpop.f32.mrb[140].mxu1 }
0x1de2   :  { %v6238_v31 = vpop.f32.mrb[141].mxu1 }
0x1de3   :  { %v4166_v12 = vpop.f32.mrb[142].mxu1 }
0x1de4   :  { %v6239_v16 = vpop.f32.mrb[143].mxu1 }
0x1de9   :  { %v4208_v20 = vpop.f32.mrb[144].mxu1 }
0x1dea   :  { %v4249_v54 = vadd.f32 %v4248_v2, %v4208_v20  ;;  %v6244_v21 = vpop.f32.mrb[145].mxu1 }
0x1deb   :  { %v4211_v24 = vpop.f32.mrb[146].mxu1 }
0x1dec   :  { %v4254_v33 = vadd.f32 %v4249_v54, %v7784_v22  ;;  %v6245_v28 = vpop.f32.mrb[147].mxu1  ;;  %v4490_v24 = vadd.f32 %v4443_v26, %v7581_v57 }
0x1ded   :  { %v8552_v28 = vmov 0.0  }
0x1dee   :  { %v4255_v5 = vmax.f32 %v4254_v33, 0.0  ;;  %v4497_v33 = vadd.f32 %v4445_v13, %v7586_v6  ;;  %v5837_v2 = vmul.f32 -1.442695, %v4490_v24 }
0x1df0   :  { %v4256_v45 = vpack.c.bf16 %v4255_v5, %v4255_v5 }
0x1df2   :  { %6261 = vmatmul.mubr.msk.bf16.vlgmr.msra.gmra.mrb[148].mxu1 %vm2620_vm6, %v4256_v45 }
0x1df3   :  { %4365 = vmatpush1.bf16.msra.mxu1 %v8090_v34  ;;  %4396 = vmatprep.mubr.bf16.mxu1 %v8551_v17 }
0x1df4   :  { %5831 = vmatprep.subr.msk.bf16.mxu1 %vm127_vm0, %v7503_v25 }
0x1df7   :  { %4367 = vmatpush1.bf16.msra.mxu1 %v7518_v63 }
0x1df8   :  { %4449 = vmatprep.subr.bf16.mxu1 %v8100_v1 }
0x1dfa   :  { %5832 = vmatmul.mubr.msk.bf16.vlgmr.msra.gmra.mrb[152].mxu1 %vm123_vm1, %v8213_v51  ;;  %v5838_v51 = vmul.f32 -1.442695, %v4497_v33 }
0x1dfb   :  { %4450 = vmatpush1.bf16.msra.mxu1 %v8108_v40  ;;  %4481 = vmatprep.mubr.bf16.mxu1 %v8551_v17 }
0x1dfc   :  { %5835 = vmatprep.subr.msk.bf16.mxu1 %vm127_vm0, %v7540_v49  ;;  %6853 = vpow2.f32 %v5838_v51 }
0x1dfd   :  { %6855 = vpow2.f32 %v5837_v2 }
0x1dff   :  { %4452 = vmatpush1.bf16.msra.mxu1 %v7550_v46 }
0x1e00   :  { %6274 = vmatprep.subr.bf16.mxu1 %v8552_v28 }
0x1e02   :  { %5836 = vmatmul.mubr.msk.bf16.vlgmr.msra.gmra.mrb[156].mxu1 %vm123_vm1, %v8226_v0 }
0x1e03   :  { %6275 = vmatpush3.bf16.msra.mxu1 %v8121_v10  ;;  %6276 = vmatprep.mubr.msk.bf16.mxu1 %vm6945_vm2, %v8552_v28 }
0x1e04   :  { %6280 = vmatprep.subr.bf16.mxu1 %v8552_v28 }
0x1e06   :  { %v6854_v12 = vpop.eup %6853 }
0x1e07   :  { %v6856_v16 = vpop.eup %6855  ;;  %v4501_v20 = vadd.f32 1.0, %v6854_v12  ;;  %v8314_v12 = vld [vmem:[%s8535_s3 + $0x5c] sm:$0xff]  }
0x1e08   :  { %v4494_v13 = vadd.f32 1.0, %v6856_v16 }
0x1e09   :  { %6857 = vrcp.f32 %v4501_v20 }
0x1e0a   :  { %6859 = vrcp.f32 %v4494_v13 }
0x1e13   :  { %v6858_v51 = vpop.eup %6857 }
0x1e14   :  { %v6860_v2 = vpop.eup %6859 }
0x1ec5   :  { %v8298_v56 = vpop.f32.mrb[148].mxu1 }
0x1ec6   :  { %v6262_v37 = vpop.f32.mrb[149].mxu1 }
0x1ec7   :  { %v4297_v29 = vpop.f32.mrb[150].mxu1 }
0x1ec8   :  { %v6263_v55 = vpop.f32.mrb[151].mxu1  ;;  %v4513_v29 = vmul.f32 %v6858_v51, %v8135_v61 }
0x1ecd   :  { %v4398_v0 = vpop.f32.mrb[152].mxu1 }
0x1ece   :  { %v4400_v19 = vpop.f32.mrb[153].mxu1 }
0x1ecf   :  { %v4402_v43 = vpop.f32.mrb[154].mxu1 }
0x1ed0   :  { %v4403_v31 = vpop.f32.mrb[155].mxu1 }
0x1ed5   :  { %v4483_v54 = vpop.f32.mrb[156].mxu1 }
0x1ed6   :  { %v8300_v21 = vadd.f32 %v4483_v54, %v4398_v0  ;;  %v4485_v26 = vpop.f32.mrb[157].mxu1 }
0x1ed7   :  { %v4486_v5 = vadd.f32 %v4485_v26, %v4400_v19  ;;  %v4487_v45 = vpop.f32.mrb[158].mxu1 }
0x1ed8   :  { %v4488_v33 = vpop.f32.mrb[159].mxu1 }
0x1ed9   :  { %v4511_v24 = vadd.f32 %v4486_v5, %v7594_v59 }
0x1edb   :  { %6861 = vtanh.f32 %v4511_v24 }
0x1ee5   :  { %v6862_v37 = vpop.eup %6861 }
0x1ee6   :  { %v4514_v55 = vmul.f32 %v6862_v37, %v6860_v2 }
0x1ee8   :  { %v8304_v43 = vadd.f32 %v4514_v55, %v4513_v29  ;;  %v4164_v29 = vadd.f32 %v8272_v15, %v7847_v41 }
0x1eea   :  { %4519 = vrot.lane.b32.xlu0 %v8304_v43, %s6946_s26  ;;  %6863 = vtanh.f32 %v4164_v29 }
0x1ef4   :  { %v6864_v55 = vpop.eup %6863 }
0x1f5c   :  { %v4520_v0 = vpop.permute.xlu0 %4519 }
0x1f5d   :  { %v4522_v19 = vsel %vm123_vm1, %v8135_v61, %v4520_v0  ;;  %v4295_v0 = vadd.f32 %v8298_v56, %v7857_v32  ;;  %v4504_v56 = vadd.f32 %v8300_v21, %v7677_v14 }
0x1f5e   :  { %v4523_v31 = vpack.c.bf16 %v4522_v19, %v4522_v19 }
0x1f60   :  { %6271 = vmatmul.mubr.msk.bf16.vlgmr.msra.gmra.mrb[164].mxu0 %vm2254_vm3, %v4523_v31  ;;  %v5827_v31 = vmul.f32 -1.442695, %v4295_v0 }
0x1f61   :  { %6291 = vmatpush3.bf16.msra.mxu0 %v8314_v12  ;;  %6292 = vmatprep.mubr.msk.bf16.mxu0 %vm6945_vm2, %v8552_v28 }
0x1f62   :  { %6296 = vmatprep.subr.bf16.mxu0 %v8552_v28  ;;  %6865 = vpow2.f32 %v5827_v31 }
0x2033   :  { %v4561_v16 = vpop.f32.mrb[164].mxu0 }
0x2034   :  { %v4562_v20 = vadd.f32 %v4561_v16, %v7635_v8  ;;  %v6272_v54 = vpop.f32.mrb[165].mxu0 }
0x2035   :  { %v4564_v61 = vpop.f32.mrb[166].mxu0 }
0x2036   :  { %v4567_v13 = vmax.f32 %v4562_v20, 0.0  ;;  %v6273_v26 = vpop.f32.mrb[167].mxu0  ;;  %v6866_v61 = vpop.eup %6865 }
0x2038   :  { %v4568_v5 = vpack.c.bf16 %v4567_v13, %v4567_v13 }
0x203a   :  { %6277 = vmatmul.mubr.msk.bf16.vlgmr.msra.gmra.mrb[160].mxu1 %vm2310_vm4, %v4568_v5  ;;  %v4303_v5 = vadd.f32 1.0, %v6866_v61 }
0x203b   :  { %6281 = vmatpush3.bf16.msra.mxu1 %v8151_v38  ;;  %6286 = vmatprep.mubr.msk.bf16.mxu1 %vm6945_vm2, %v8552_v28 }
0x203c   :  { %6282 = vmatprep.subr.bf16.mxu1 %v8552_v28 }
0x203f   :  { %6283 = vmatpush3.bf16.msra.mxu1 %v8160_v53 }
0x2040   :  { %6284 = vmatprep.subr.bf16.mxu1 %v8552_v28 }
0x2043   :  { %6285 = vmatpush3.bf16.msra.mxu1 %v8167_v42 }
0x2044   :  { %6302 = vmatprep.subr.bf16.mxu1 %v8552_v28 }
0x210d   :  { %v4606_v45 = vpop.f32.mrb[160].mxu1 }
0x210e   :  { %v4607_v33 = vadd.f32 %v4606_v45, %v7644_v47  ;;  %v6278_v24 = vpop.f32.mrb[161].mxu1 }
0x210f   :  { %v4609_v51 = vpop.f32.mrb[162].mxu1 }
0x2110   :  { %v6279_v2 = vpop.f32.mrb[163].mxu1  ;;  %v4612_v37 = vsel %vm2254_vm3, %v4607_v33, -inf  ;;  %v5839_v51 = vmul.f32 -1.442695, %v4504_v56 }
0x2111   :  { %4613 = vmax.xlane.f32.xlu0 %v4612_v37 }
0x2127   :  { %4308 = vrot.lane.b32.xlu0 %v6864_v55, %s6948_s27 }
0x219e   :  { %v4614_v16 = vpop.xlane.xlu0 %4613 }
0x219f   :  { %v4615_v20 = vsub.f32 %v4607_v33, %v4614_v16 }
0x21a1   :  { %v4616_v54 = vmul.f32 1.442695, %v4615_v20 }
0x21a2   :  { %v4309_v15 = vpop.permute.xlu0 %4308 }
0x21a3   :  { %6867 = vpow2.f32 %v4616_v54 }
0x21a4   :  { %6869 = vrcp.f32 %v4303_v5 }
0x21a5   :  { %6871 = vpow2.f32 %v5839_v51 }
0x21ad   :  { %v6868_v13 = vpop.eup %6867 }
0x21ae   :  { %v4618_v26 = vsel %vm2254_vm3, %v6868_v13, 0.0  ;;  %v6870_v45 = vpop.eup %6869 }
0x21af   :  { %4619 = vadd.xlane.f32.xlu1 %v4618_v26  ;;  %v4311_v24 = vmul.f32 %v6870_v45, %v4309_v15  ;;  %v6872_v2 = vpop.eup %6871 }
0x21b0   :  { %v4508_v55 = vadd.f32 1.0, %v6872_v2 }
0x21c0   :  { %4313 = vrot.lane.b32.xlu1 %v4311_v24, %s6949_s28 }
0x223c   :  { %v4620_v33 = vpop.xlane.xlu1 %4619 }
0x223d   :  { %6873 = vrcp.f32 %v4620_v33 }
0x223e   :  { %6875 = vrcp.f32 %v4508_v55 }
0x223f   :  { %6877 = vtanh.f32 %v8304_v43 }
0x2240   :  { %v4314_v61 = vpop.permute.xlu1 %4313 }
0x2247   :  { %v6874_v37 = vpop.eup %6873 }
0x2248   :  { %v4622_v29 = vmul.f32 %v6874_v37, %v6868_v13  ;;  %v6876_v21 = vpop.eup %6875  ;;  %v4306_v13 = vmul.f32 %v6870_v45, %v8250_v35 }
0x2249   :  { %v6878_v16 = vpop.eup %6877 }
0x224a   :  { %v4623_v0 = vmul.f32 %v4622_v29, %v4522_v19  ;;  %v6941_v19 = vld [vmem:[%s8532_s2 + $0x94] ss:$16 sps:$4 sm:$0xff]   ;;  %v4517_v20 = vmul.f32 %v6878_v16, %v6876_v21 }
0x224c   :  { %v4624_v31 = vpack.c.bf16 %v4623_v0, %v4623_v0  ;;  %v8359_v54 = vpack.c.bf16 %v4517_v20, %v4517_v20 }
0x224e   :  { %6287 = vmatmul.mubr.msk.bf16.vlgmr.msra.gmra.mrb[164].mxu1 %vm2254_vm3, %v4624_v31 }
0x224f   :  { %6303 = vmatpush3.bf16.msra.mxu1 %v8187_v9  ;;  %6308 = vmatprep.mubr.msk.bf16.mxu1 %vm6945_vm2, %v8552_v28 }
0x2250   :  { %6304 = vmatprep.subr.bf16.mxu1 %v8552_v28 }
0x2253   :  { %6305 = vmatpush3.bf16.msra.mxu1 %v8196_v50 }
0x2254   :  { %6306 = vmatprep.subr.bf16.mxu1 %v8552_v28 }
0x2257   :  { %6307 = vmatpush3.bf16.msra.mxu1 %v8203_v44 }
0x2258   :  { %4867 = vmatprep.subr.bf16.mxu1 %v6941_v19 }
0x225a   :  { %6309 = vmatmul.mubr.msk.bf16.vlgmr.msra.gmra.mrb[168].mxu1 %vm2254_vm3, %v4624_v31 }
0x225b   :  { %4868 = vmatpush1.bf16.msra.mxu1 %v8007_v30  ;;  %4899 = vmatprep.mubr.bf16.mxu1 %v8551_v17 }
0x225c   :  { %5849 = vmatprep.subr.msk.bf16.mxu1 %vm127_vm0, %v7449_v58  ;;  %v8372_v58 = vld [vmem:[%s8536_s1 + $0x14] sm:$0xf] }
0x225f   :  { %4870 = vmatpush1.bf16.msra.mxu1 %v7463_v23 }
0x2260   :  { %4952 = vmatprep.subr.bf16.mxu1 %v8019_v4 }
0x2262   :  { %5850 = vmatmul.mubr.msk.bf16.vlgmr.msra.gmra.mrb[172].mxu1 %vm123_vm1, %v8359_v54 }
0x2263   :  { %4953 = vmatpush1.bf16.msra.mxu1 %v8027_v52  ;;  %4984 = vmatprep.mubr.bf16.mxu1 %v8551_v17 }
0x2264   :  { %5853 = vmatprep.subr.msk.bf16.mxu1 %vm127_vm0, %v7490_v27 }
0x2267   :  { %4955 = vmatpush1.bf16.msra.mxu1 %v7508_v36 }
0x2268   :  { %6320 = vmatprep.subr.bf16.mxu1 %v8552_v28 }
0x226a   :  { %5854 = vmatmul.mubr.msk.bf16.vlgmr.msra.gmra.mrb[176].mxu1 %vm123_vm1, %v8372_v58 }
0x226b   :  { %6321 = vmatpush3.bf16.msra.mxu1 %v8045_v48  ;;  %6326 = vmatprep.mubr.msk.bf16.mxu1 %vm6945_vm2, %v8552_v28 }
0x226c   :  { %6322 = vmatprep.subr.bf16.mxu1 %v8552_v28 }
0x226f   :  { %6323 = vmatpush3.bf16.msra.mxu1 %v8054_v18  ;;  %v8391_v18 = vadd.f32 %v4314_v61, %v4306_v13 }
0x2270   :  { %6324 = vmatprep.subr.bf16.mxu1 %v8552_v28 }
0x2271   :  { %v4714_v26 = vpack.c.bf16 %v8391_v18, %v8391_v18 }
0x2273   :  { %6325 = vmatpush3.bf16.msra.mxu1 %v8240_v7 }
0x2274   :  { %6346 = vmatprep.subr.bf16.mxu1 %v8552_v28 }
0x2321   :  { %v4662_v23 = vpop.f32.mrb[164].mxu1 }
0x2322   :  { %v4663_v27 = vadd.f32 %v4662_v23, %v7748_v39  ;;  %v6288_v36 = vpop.f32.mrb[165].mxu1 }
0x2323   :  { %v4665_v30 = vpop.f32.mrb[166].mxu1 }
0x2324   :  { %v4668_v4 = vmax.f32 %v4663_v27, 0.0  ;;  %v6289_v52 = vpop.f32.mrb[167].mxu1 }
0x2326   :  { %v4669_v48 = vpack.c.bf16 %v4668_v4, %v4668_v4 }
0x2328   :  { %6293 = vmatmul.mubr.msk.bf16.vlgmr.msra.gmra.mrb[168].mxu0 %vm2310_vm4, %v4669_v48 }
0x2329   :  { %6297 = vmatpush3.bf16.msra.mxu0 %v7755_v60  ;;  %6298 = vmatprep.mubr.msk.bf16.mxu0 %vm6945_vm2, %v8552_v28 }
0x232a   :  { %6312 = vmatprep.subr.bf16.mxu0 %v8552_v28 }
0x232d   :  { %v4792_v7 = vpop.f32.mrb[168].mxu1 }
0x232e   :  { %v6310_v5 = vpop.f32.mrb[169].mxu1 }
0x232f   :  { %v4795_v15 = vpop.f32.mrb[170].mxu1 }
0x2330   :  { %v6311_v24 = vpop.f32.mrb[171].mxu1  ;;  %6299 = vmatmul.mubr.msk.bf16.vlgmr.msra.gmra.mrb[172].mxu0 %vm2492_vm5, %v4714_v26 }
0x2331   :  { %6313 = vmatpush3.bf16.msra.mxu0 %v8259_v11  ;;  %6316 = vmatprep.mubr.msk.bf16.mxu0 %vm6945_vm2, %v8552_v28 }
0x2332   :  { %6314 = vmatprep.subr.bf16.mxu0 %v8552_v28 }
0x2335   :  { %v4901_v35 = vpop.f32.mrb[172].mxu1  ;;  %6315 = vmatpush3.bf16.msra.mxu0 %v8268_v62 }
0x2336   :  { %v4903_v45 = vpop.f32.mrb[173].mxu1  ;;  %4908 = vmatprep.subr.bf16.mxu0 %v8080_v3 }
0x2337   :  { %v4905_v56 = vpop.f32.mrb[174].mxu1 }
0x2338   :  { %v4906_v51 = vpop.f32.mrb[175].mxu1 }
0x233d   :  { %v4986_v33 = vpop.f32.mrb[176].mxu1 }
0x233e   :  { %v4987_v2 = vadd.f32 %v4986_v33, %v4901_v35  ;;  %v4988_v37 = vpop.f32.mrb[177].mxu1 }
0x233f   :  { %v4989_v29 = vadd.f32 %v4988_v37, %v4903_v45  ;;  %v4990_v55 = vpop.f32.mrb[178].mxu1 }
0x2340   :  { %v4991_v0 = vpop.f32.mrb[179].mxu1 }
0x23fb   :  { %v8403_v31 = vpop.f32.mrb[168].mxu0 }
0x23fc   :  { %v6294_v21 = vpop.f32.mrb[169].mxu0 }
0x23fd   :  { %v4710_v19 = vpop.f32.mrb[170].mxu0 }
0x23fe   :  { %v6295_v16 = vpop.f32.mrb[171].mxu0 }
0x2403   :  { %v4752_v20 = vpop.f32.mrb[172].mxu0 }
0x2404   :  { %v4793_v23 = vadd.f32 %v4792_v7, %v4752_v20  ;;  %v6300_v27 = vpop.f32.mrb[173].mxu0 }
0x2405   :  { %v4755_v36 = vpop.f32.mrb[174].mxu0 }
0x2406   :  { %v4798_v30 = vadd.f32 %v4793_v23, %v7784_v22  ;;  %v6301_v3 = vpop.f32.mrb[175].mxu0 }
0x2408   :  { %v4799_v4 = vmax.f32 %v4798_v30, 0.0 }
0x240a   :  { %v4800_v52 = vpack.c.bf16 %v4799_v4, %v4799_v4 }
0x240c   :  { %6317 = vmatmul.mubr.msk.bf16.vlgmr.msra.gmra.mrb[176].mxu0 %vm2620_vm6, %v4800_v52 }
0x240d   :  { %4909 = vmatpush1.bf16.msra.mxu0 %v8090_v34  ;;  %4940 = vmatprep.mubr.bf16.mxu0 %v8551_v17 }
0x240e   :  { %5851 = vmatprep.subr.msk.bf16.mxu0 %vm127_vm0, %v7503_v25  ;;  %v5041_v25 = vadd.f32 %v4989_v29, %v7586_v6 }
0x2411   :  { %4911 = vmatpush1.bf16.msra.mxu0 %v7518_v63  ;;  %v5034_v63 = vadd.f32 %v4987_v2, %v7581_v57 }
0x2412   :  { %4993 = vmatprep.subr.bf16.mxu0 %v8100_v1 }
0x2414   :  { %5852 = vmatmul.mubr.msk.bf16.vlgmr.msra.gmra.mrb[180].mxu0 %vm123_vm1, %v8359_v54 }
0x2415   :  { %4994 = vmatpush1.bf16.msra.mxu0 %v8108_v40  ;;  %5025 = vmatprep.mubr.bf16.mxu0 %v8551_v17  ;;  %v5858_v17 = vmul.f32 -1.442695, %v5041_v25 }
0x2416   :  { %5855 = vmatprep.subr.msk.bf16.mxu0 %vm127_vm0, %v7540_v49  ;;  %v5857_v49 = vmul.f32 -1.442695, %v5034_v63 }
0x2417   :  { %6879 = vpow2.f32 %v5858_v17 }
0x2418   :  { %6881 = vpow2.f32 %v5857_v49 }
0x2419   :  { %4996 = vmatpush1.bf16.msra.mxu0 %v7550_v46 }
0x241a   :  { %6330 = vmatprep.subr.bf16.mxu0 %v8552_v28 }
0x241c   :  { %5856 = vmatmul.mubr.msk.bf16.vlgmr.msra.gmra.mrb[184].mxu0 %vm123_vm1, %v8372_v58 }
0x241d   :  { %6331 = vmatpush3.bf16.msra.mxu0 %v8121_v10  ;;  %6332 = vmatprep.mubr.msk.bf16.mxu0 %vm6945_vm2, %v8552_v28 }
0x241e   :  { %6336 = vmatprep.subr.bf16.mxu0 %v8552_v28 }
0x2421   :  { %v6880_v61 = vpop.eup %6879 }
0x2422   :  { %v6882_v13 = vpop.eup %6881  ;;  %v5045_v7 = vadd.f32 1.0, %v6880_v61 }
0x2423   :  { %v5038_v6 = vadd.f32 1.0, %v6882_v13 }
0x2424   :  { %6883 = vrcp.f32 %v5045_v7 }
0x2425   :  { %6885 = vrcp.f32 %v5038_v6 }
0x242e   :  { %v6884_v33 = vpop.eup %6883 }
0x242f   :  { %v6886_v2 = vpop.eup %6885  ;;  %v5057_v55 = vmul.f32 %v6884_v33, %v8304_v43 }
0x24df   :  { %v8429_v34 = vpop.f32.mrb[176].mxu0 }
0x24e0   :  { %v6318_v46 = vpop.f32.mrb[177].mxu0 }
0x24e1   :  { %v4841_v1 = vpop.f32.mrb[178].mxu0 }
0x24e2   :  { %v6319_v40 = vpop.f32.mrb[179].mxu0 }
0x24e7   :  { %v4942_v54 = vpop.f32.mrb[180].mxu0 }
0x24e8   :  { %v4944_v10 = vpop.f32.mrb[181].mxu0 }
0x24e9   :  { %v4946_v58 = vpop.f32.mrb[182].mxu0 }
0x24ea   :  { %v4947_v48 = vpop.f32.mrb[183].mxu0 }
0x24ef   :  { %v5027_v26 = vpop.f32.mrb[184].mxu0 }
0x24f0   :  { %v5028_v5 = vadd.f32 %v5027_v26, %v4942_v54  ;;  %v5029_v57 = vpop.f32.mrb[185].mxu0 }
0x24f1   :  { %v5030_v15 = vadd.f32 %v5029_v57, %v4944_v10  ;;  %v5031_v24 = vpop.f32.mrb[186].mxu0 }
0x24f2   :  { %v5048_v35 = vadd.f32 %v5028_v5, %v7677_v14  ;;  %v5032_v45 = vpop.f32.mrb[187].mxu0 }
0x24f3   :  { %v5055_v56 = vadd.f32 %v5030_v15, %v7594_v59 }
0x24f4   :  { %v5859_v51 = vmul.f32 -1.442695, %v5048_v35 }
0x24f5   :  { %6887 = vtanh.f32 %v5055_v56 }
0x24f6   :  { %6889 = vpow2.f32 %v5859_v51 }
0x24ff   :  { %v6888_v37 = vpop.eup %6887 }
0x2500   :  { %v6890_v29 = vpop.eup %6889  ;;  %v5058_v0 = vmul.f32 %v6888_v37, %v6886_v2 }
0x2501   :  { %v5052_v21 = vadd.f32 1.0, %v6890_v29 }
0x2502   :  { %v5059_v19 = vadd.f32 %v5058_v0, %v5057_v55 }
0x2503   :  { %6891 = vrcp.f32 %v5052_v21 }
0x2504   :  { %5063 = vrot.lane.b32.xlu0 %v5059_v19, %s6946_s26  ;;  %6893 = vtanh.f32 %v5059_v19 }
0x250d   :  { %v6892_v14 = vpop.eup %6891 }
0x250e   :  { %v6894_v16 = vpop.eup %6893 }
0x250f   :  { %v8435_v59 = vmul.f32 %v6894_v16, %v6892_v14 }
0x2576   :  { %v5064_v20 = vpop.permute.xlu0 %5063 }
0x2577   :  { %v5066_v23 = vsel %vm123_vm1, %v8304_v43, %v5064_v20 }
0x2578   :  { %v5067_v27 = vpack.c.bf16 %v5066_v23, %v5066_v23 }
0x257a   :  { %6327 = vmatmul.mubr.msk.bf16.vlgmr.msra.gmra.mrb[180].mxu1 %vm2254_vm3, %v5067_v27 }
0x257b   :  { %6347 = vmatpush3.bf16.msra.mxu1 %v8314_v12  ;;  %6348 = vmatprep.mubr.msk.bf16.mxu1 %vm6945_vm2, %v8552_v28 }
0x257c   :  { %6352 = vmatprep.subr.bf16.mxu1 %v8552_v28 }
0x264d   :  { %v5105_v36 = vpop.f32.mrb[180].mxu1 }
0x264e   :  { %v5106_v30 = vadd.f32 %v5105_v36, %v7635_v8  ;;  %v6328_v3 = vpop.f32.mrb[181].mxu1 }
0x264f   :  { %v5108_v4 = vpop.f32.mrb[182].mxu1  ;;  %v6513_v3 = vld [vmem:[%s8535_s3 + $0x98] ss:$0 sps:$4 sm:$0xff]  }
0x2650   :  { %v5111_v52 = vmax.f32 %v5106_v30, 0.0  ;;  %v6329_v25 = vpop.f32.mrb[183].mxu1  ;;  %v5405_v4 = vpack.c.bf16 %v8435_v59, %v8435_v59 }
0x2652   :  { %v5112_v63 = vpack.c.bf16 %v5111_v52, %v5111_v52  ;;  %v84_v52 = vld [vmem:[%s8535_s3 + $0x9c] sm:$0xf] }
0x2653   :  { %v5411_v25 = vsel %vm127_vm0, %v84_v52, 0 }
0x2654   :  { %6333 = vmatmul.mubr.msk.bf16.vlgmr.msra.gmra.mrb[188].mxu0 %vm2310_vm4, %v5112_v63 }
0x2655   :  { %6337 = vmatpush3.bf16.msra.mxu0 %v8151_v38  ;;  %6342 = vmatprep.mubr.msk.bf16.mxu0 %vm6945_vm2, %v8552_v28 }
0x2656   :  { %6338 = vmatprep.subr.bf16.mxu0 %v8552_v28 }
0x2659   :  { %6339 = vmatpush3.bf16.msra.mxu0 %v8160_v53 }
0x265a   :  { %6340 = vmatprep.subr.bf16.mxu0 %v8552_v28 }
0x265d   :  { %6341 = vmatpush3.bf16.msra.mxu0 %v8167_v42  ;;  %v4708_v42 = vadd.f32 %v8403_v31, %v7847_v41 }
0x265e   :  { %6358 = vmatprep.subr.bf16.mxu0 %v8552_v28 }
0x2727   :  { %v5150_v8 = vpop.f32.mrb[188].mxu0 }
0x2728   :  { %v5151_v43 = vadd.f32 %v5150_v8, %v7644_v47  ;;  %v6334_v12 = vpop.f32.mrb[189].mxu0  ;;  %v4839_v47 = vadd.f32 %v8429_v34, %v7857_v32 }
0x2729   :  { %v5153_v17 = vpop.f32.mrb[190].mxu0 }
0x272a   :  { %v6335_v49 = vpop.f32.mrb[191].mxu0  ;;  %v5156_v38 = vsel %vm2254_vm3, %v5151_v43, -inf  ;;  %v5847_v58 = vmul.f32 -1.442695, %v4839_v47 }
0x272b   :  { %5157 = vmax.xlane.f32.xlu1 %v5156_v38 }
0x27b8   :  { %v5158_v46 = vpop.xlane.xlu1 %5157 }
0x27b9   :  { %v5159_v1 = vsub.f32 %v5151_v43, %v5158_v46 }
0x27bb   :  { %v5160_v40 = vmul.f32 1.442695, %v5159_v1 }
0x27bd   :  { %6895 = vpow2.f32 %v5160_v40 }
0x27be   :  { %6897 = vtanh.f32 %v4708_v42 }
0x27bf   :  { %6899 = vpow2.f32 %v5847_v58 }
0x27c7   :  { %v6896_v53 = vpop.eup %6895 }
0x27c8   :  { %v5162_v54 = vsel %vm2254_vm3, %v6896_v53, 0.0  ;;  %v6898_v10 = vpop.eup %6897 }
0x27c9   :  { %5163 = vadd.xlane.f32.xlu0 %v5162_v54  ;;  %v6900_v48 = vpop.eup %6899 }
0x27ca   :  { %v4847_v61 = vadd.f32 1.0, %v6900_v48 }
0x27cc   :  { %6901 = vrcp.f32 %v4847_v61  ;;  %v6514_v61 = vld [vmem:[%s8535_s3 + $0xa0] sm:$0xff]  }
0x27d6   :  { %v6902_v7 = vpop.eup %6901 }
0x27d7   :  { %v4850_v33 = vmul.f32 %v6902_v7, %v8391_v18 }
0x27df   :  { %4852 = vrot.lane.b32.xlu0 %v6898_v10, %s6948_s27 }
0x2856   :  { %v5164_v13 = vpop.xlane.xlu0 %5163 }
0x2857   :  { %6903 = vrcp.f32 %v5164_v13  ;;  %v6942_v13 = vld [vmem:[%s8534_s4 + $0x8] sm:$0xff] }
0x285a   :  { %v4853_v26 = vpop.permute.xlu0 %4852 }
0x285b   :  { %v4855_v6 = vmul.f32 %v6902_v7, %v4853_v26  ;;  %v8553_v7 = vld [vmem:[#allocation2_spill] sm:$0xff] }
0x285c   :  { %v8554_v26 = vsub.s32 7, %v8553_v7 }
0x285d   :  { %4857 = vrot.lane.b32.xlu1 %v4855_v6, %s6949_s28 }
0x285e   :  { %v5511_v6 = vrot.slane %v6942_v13, %v8554_v26 }
0x2861   :  { %v6904_v31 = vpop.eup %6903 }
0x2862   :  { %v5166_v5 = vmul.f32 %v6904_v31, %v6896_v53 }
0x2864   :  { %v5167_v57 = vmul.f32 %v5166_v5, %v5066_v23 }
0x2866   :  { %v5168_v15 = vpack.c.bf16 %v5167_v57, %v5167_v57 }
0x2868   :  { %6343 = vmatmul.mubr.msk.bf16.vlgmr.msra.gmra.mrb[192].mxu0 %vm2254_vm3, %v5168_v15 }
0x2869   :  { %6359 = vmatpush3.bf16.msra.mxu0 %v8187_v9  ;;  %6364 = vmatprep.mubr.msk.bf16.mxu0 %vm6945_vm2, %v8552_v28 }
0x286a   :  { %6360 = vmatprep.subr.bf16.mxu0 %v8552_v28 }
0x286d   :  { %6361 = vmatpush3.bf16.msra.mxu0 %v8196_v50 }
0x286e   :  { %6362 = vmatprep.subr.bf16.mxu0 %v8552_v28 }
0x2871   :  { %6363 = vmatpush3.bf16.msra.mxu0 %v8203_v44 }
0x2872   :  { %6376 = vmatprep.subr.bf16.mxu0 %v8552_v28 }
0x2874   :  { %6365 = vmatmul.mubr.msk.bf16.vlgmr.msra.gmra.mrb[196].mxu0 %vm2254_vm3, %v5168_v15 }
0x2875   :  { %6378 = vmatprep.mubr.msk.bf16.mxu0 %vm6945_vm2, %v8552_v28  ;;  %6377 = vmatpush3.bf16.msra.mxu0 %v5411_v25 }
0x2876   :  { %6390 = vmatprep.subr.bf16.mxu0 %v8552_v28 }
0x28cf   :  { %v4858_v50 = vpop.permute.xlu1 %4857 }
0x28d0   :  { %v4860_v44 = vadd.f32 %v4858_v50, %v4850_v33 }
0x293b   :  { %v5206_v34 = vpop.f32.mrb[192].mxu0 }
0x293c   :  { %v5207_v9 = vadd.f32 %v5206_v34, %v7748_v39  ;;  %v6344_v24 = vpop.f32.mrb[193].mxu0  ;;  %v5258_v39 = vpack.c.bf16 %v4860_v44, %v4860_v44 }
0x293d   :  { %v5209_v35 = vpop.f32.mrb[194].mxu0 }
0x293e   :  { %v5212_v45 = vmax.f32 %v5207_v9, 0.0  ;;  %v6345_v56 = vpop.f32.mrb[195].mxu0  ;;  %v89_v35 = vld [vmem:[%s8534_s4 + $0x10] sm:$0xff] }
0x2940   :  { %v5213_v51 = vpack.c.bf16 %v5212_v45, %v5212_v45  ;;  %v8555_v45 = vld [vmem:[#allocation3_spill] sm:$0xff] }
0x2941   :  { %v5518_v56 = vrot.slane %v89_v35, %v8555_v45 }
0x2942   :  { %6349 = vmatmul.mubr.msk.bf16.vlgmr.msra.gmra.mrb[184].mxu1 %vm2310_vm4, %v5213_v51 }
0x2943   :  { %6353 = vmatpush3.bf16.msra.mxu1 %v7755_v60  ;;  %6354 = vmatprep.mubr.msk.bf16.mxu1 %vm6945_vm2, %v8552_v28 }
0x2944   :  { %6368 = vmatprep.subr.bf16.mxu1 %v8552_v28 }
0x2947   :  { %v5336_v2 = vpop.f32.mrb[196].mxu0 }
0x2948   :  { %v6366_v37 = vpop.f32.mrb[197].mxu0 }
0x2949   :  { %v5339_v29 = vpop.f32.mrb[198].mxu0 }
0x294a   :  { %v6367_v55 = vpop.f32.mrb[199].mxu0  ;;  %6355 = vmatmul.mubr.msk.bf16.vlgmr.msra.gmra.mrb[188].mxu1 %vm2492_vm5, %v5258_v39 }
0x294b   :  { %6369 = vmatpush3.bf16.msra.mxu1 %v8259_v11  ;;  %6372 = vmatprep.mubr.msk.bf16.mxu1 %vm6945_vm2, %v8552_v28 }
0x294c   :  { %6370 = vmatprep.subr.bf16.mxu1 %v8552_v28 }
0x294f   :  { %6371 = vmatpush3.bf16.msra.mxu1 %v8268_v62  ;;  %v6512_v62 = vld [vmem:[%s8535_s3 + $0x90] sm:$0xff]  }
0x2950   :  { %6382 = vmatprep.subr.bf16.mxu1 %v8552_v28 }
0x2a15   :  { %v5251_v60 = vpop.f32.mrb[184].mxu1 }
0x2a16   :  { %v5252_v18 = vadd.f32 %v5251_v60, %v7847_v41  ;;  %v6350_v0 = vpop.f32.mrb[185].mxu1 }
0x2a17   :  { %v5254_v21 = vpop.f32.mrb[186].mxu1 }
0x2a18   :  { %6905 = vtanh.f32 %v5252_v18  ;;  %v6351_v19 = vpop.f32.mrb[187].mxu1 }
0x2a1d   :  { %v5296_v14 = vpop.f32.mrb[188].mxu1 }
0x2a1e   :  { %v5337_v16 = vadd.f32 %v5336_v2, %v5296_v14  ;;  %v6356_v20 = vpop.f32.mrb[189].mxu1 }
0x2a1f   :  { %v5299_v11 = vpop.f32.mrb[190].mxu1 }
0x2a20   :  { %v5342_v23 = vadd.f32 %v5337_v16, %v7784_v22  ;;  %v6357_v27 = vpop.f32.mrb[191].mxu1  ;;  %v5466_v22 = vsel %vm127_vm0, %v6513_v3, 0 }
0x2a22   :  { %v6906_v36 = vpop.eup %6905  ;;  %v5343_v30 = vmax.f32 %v5342_v23, 0.0 }
0x2a23   :  { %5396 = vrot.lane.b32.xlu1 %v6906_v36, %s6948_s27 }
0x2a24   :  { %v5344_v41 = vpack.c.bf16 %v5343_v30, %v5343_v30 }
0x2a26   :  { %6373 = vmatmul.mubr.msk.bf16.vlgmr.msra.gmra.mrb[192].mxu1 %vm2620_vm6, %v5344_v41 }
0x2a27   :  { %6383 = vmatpush3.bf16.msra.mxu1 %v6512_v62  ;;  %6386 = vmatprep.mubr.msk.bf16.mxu1 %vm6945_vm2, %v8552_v28 }
0x2a28   :  { %6384 = vmatprep.subr.bf16.mxu1 %v8552_v28 }
0x2a2b   :  { %6385 = vmatpush3.bf16.msra.mxu1 %v5466_v22 }
0x2a2e   :  { %6387 = vmatmul.mubr.msk.bf16.vlgmr.msra.gmra.mrb[196].mxu1 %vm123_vm1, %v5405_v4 }
0x2a95   :  { %v5397_v42 = vpop.permute.xlu1 %5396 }
0x2af9   :  { %v5382_v63 = vpop.f32.mrb[192].mxu1 }
0x2afa   :  { %v5383_v8 = vadd.f32 %v5382_v63, %v7857_v32  ;;  %v6374_v43 = vpop.f32.mrb[193].mxu1 }
0x2afb   :  { %v5385_v12 = vpop.f32.mrb[194].mxu1 }
0x2afc   :  { %v5867_v17 = vmul.f32 -1.442695, %v5383_v8  ;;  %v6375_v49 = vpop.f32.mrb[195].mxu1 }
0x2afe   :  { %6907 = vpow2.f32 %v5867_v17 }
0x2b01   :  { %v5502_v59 = vpop.f32.mrb[196].mxu1 }
0x2b02   :  { %v6388_v38 = vpop.f32.mrb[197].mxu1 }
0x2b03   :  { %v5505_v46 = vpop.f32.mrb[198].mxu1 }
0x2b04   :  { %v6389_v1 = vpop.f32.mrb[199].mxu1 }
0x2b08   :  { %v6908_v40 = vpop.eup %6907 }
0x2b09   :  { %v5391_v53 = vadd.f32 1.0, %v6908_v40 }
0x2b0b   :  { %6909 = vrcp.f32 %v5391_v53 }
0x2b15   :  { %v6910_v54 = vpop.eup %6909 }
0x2b16   :  { %v5399_v10 = vmul.f32 %v6910_v54, %v5397_v42  ;;  %v5394_v47 = vmul.f32 %v6910_v54, %v4860_v44 }
0x2b18   :  { %5401 = vrot.lane.b32.xlu0 %v5399_v10, %s6949_s28 }
0x2b8a   :  { %v5402_v58 = vpop.permute.xlu0 %5401 }
0x2b8b   :  { %v5404_v32 = vadd.f32 %v5402_v58, %v5394_v47 }
0x2b8d   :  { %v5406_v48 = vpack.c.bf16 %v5404_v32, %v5404_v32 }
0x2b8f   :  { %6379 = vmatmul.mubr.msk.bf16.vlgmr.msra.gmra.mrb[200].mxu0 %vm2492_vm5, %v5406_v48 }
0x2b90   :  { %6392 = vmatprep.mubr.msk.bf16.mxu0 %vm6945_vm2, %v8552_v28  ;;  %6391 = vmatpush3.bf16.msra.mxu0 %v6514_v61 }
0x2c62   :  { %v5447_v31 = vpop.f32.mrb[200].mxu0 }
0x2c63   :  { %v5503_v5 = vadd.f32 %v5502_v59, %v5447_v31  ;;  %v6380_v57 = vpop.f32.mrb[201].mxu0 }
0x2c64   :  { %v5450_v15 = vpop.f32.mrb[202].mxu0 }
0x2c65   :  { %v5512_v34 = vadd.f32 %v5511_v6, %v5503_v5  ;;  %v6381_v9 = vpop.f32.mrb[203].mxu0 }
0x2c67   :  { %v5513_v24 = vmax.f32 %v5512_v34, 0.0 }
0x2c69   :  { %v5514_v28 = vpack.c.bf16 %v5513_v24, %v5513_v24 }
0x2c6b   :  { %6393 = vmatmul.mubr.msk.bf16.vlgmr.msra.gmra.mrb[204].mxu0 %vm2310_vm4, %v5514_v28 }
0x2d3e   :  { %v5562_v51 = vpop.f32.mrb[204].mxu0 }
0x2d3f   :  { %v5563_v50 = vadd.f32 %v5562_v51, %v5518_v56  ;;  %v6394_v33 = vpop.f32.mrb[205].mxu0 }
0x2d40   :  { %v5565_v44 = vpop.f32.mrb[206].mxu0 }
0x2d41   :  { %5569 = vst.msk [vmem:[%s8537_s5] sm:$0xff] %vm5568_vm7, %v5563_v50  ;;  %v6395_v2 = vpop.f32.mrb[207].mxu0 }

</bundles_post_ra>
